<compile_context>
chip_gen: v6e
topology: v6e:2x2x1
jax: 0.10.0
libtpu: 0.0.40
codegen_flags: <defaults>
</compile_context>

<pallas_src>
import math
import numpy as np
import jax
import jax.numpy as jnp
from jax.experimental import pallas as pl
from jax.experimental.pallas import tpu as pltpu

D_MODEL = 32
HEADS = 4
D_K = D_MODEL // HEADS
D_FF = 64
N_LAYERS = 2
EPS = 1e-6


def _layer_norm(x, a, b):
    # Matches the torch Norm module: unbiased std (n-1 divisor), eps added to std.
    d = x.shape[-1]
    mu = jnp.mean(x, axis=-1, keepdims=True)
    xc = x - mu
    var = jnp.sum(xc * xc, axis=-1, keepdims=True) * (1.0 / (d - 1))
    inv = pl.reciprocal(jnp.sqrt(var) + EPS, approx=True)   # EUP, co-issued
    return a * (xc * inv) + b


def encoder_kernel(xyz_ref, feat_ref,
                   pos_w_ref, pos_b_ref,
                   ln1_a_ref, ln1_b_ref,
                   w_qkv_ref, b_qkv_ref,
                   wo_ref, bo_ref,
                   ln2_a_ref, ln2_b_ref,
                   w1_ref, b1_ref, w2_ref, b2_ref,
                   fn_a_ref, fn_b_ref,
                   out_ref, scores_ref):
    xyz = xyz_ref[...]                      # (Bb, n, 3)
    x = feat_ref[...]                       # (Bb, n, D)
    Bb, n, D = x.shape
    G = Bb * HEADS                          # all (batch, head) pairs at once

    # PositionalEncoder: pairwise_dist.mean(dim=1) == xyz_i - mean_j(xyz_j), per batch.
    centered = xyz - jnp.mean(xyz, axis=1, keepdims=True)
    pos_w = jnp.broadcast_to(pos_w_ref[...][None], (Bb, 3, D))
    x = x + jnp.einsum('bnc,bcd->bnd', centered, pos_w,
                       preferred_element_type=jnp.float32) + pos_b_ref[...]

    scale = 1.0 / math.sqrt(D_K)
    last_scores = None

    for l in range(N_LAYERS):
        # ------------ multi-head self-attention (pre-norm, residual) ------------
        x2 = _layer_norm(x, ln1_a_ref[l], ln1_b_ref[l])                 # (Bb, n, D)

        # Fused QKV projection for every (batch, head) pair in one einsum.
        xg = jnp.broadcast_to(x2[:, None], (Bb, HEADS, n, D)).reshape(G, n, D)
        wg = jnp.broadcast_to(w_qkv_ref[l][None],
                              (Bb, HEADS, D, 3 * D_K)).reshape(G, D, 3 * D_K)
        bg = jnp.broadcast_to(b_qkv_ref[l][None],
                              (Bb, HEADS, 1, 3 * D_K)).reshape(G, 1, 3 * D_K)
        qkv = jnp.einsum('gnd,gde->gne', xg, wg,
                         preferred_element_type=jnp.float32) + bg       # (G, n, 3*D_K)
        q = qkv[..., 0:D_K]
        k = qkv[..., D_K:2 * D_K]
        v = qkv[..., 2 * D_K:3 * D_K]

        s = jnp.einsum('gik,gjk->gij', q, k,
                       preferred_element_type=jnp.float32) * scale      # (G, n, n)

        if l == N_LAYERS - 1:      # only the last layer's sigmoid scores are kept
            sig = jax.nn.sigmoid(s).reshape(Bb, HEADS, n, n)
            last_scores = jnp.mean(sig, axis=1)                          # (Bb, n, n)

        s = s - jnp.max(s, axis=-1, keepdims=True)
        p = jnp.exp(s)
        p = p * pl.reciprocal(jnp.sum(p, axis=-1, keepdims=True), approx=True)
        o = jnp.einsum('gij,gjk->gik', p, v,
                       preferred_element_type=jnp.float32)               # (G, n, D_K)

        # Output projection: concat(heads) @ Wo == sum_h head_h @ Wo[h*D_K:(h+1)*D_K].
        wog = jnp.broadcast_to(wo_ref[l][None],
                               (Bb, HEADS, D_K, D)).reshape(G, D_K, D)
        proj = jnp.einsum('gnk,gkd->gnd', o, wog,
                          preferred_element_type=jnp.float32)            # (G, n, D)
        attn = jnp.sum(proj.reshape(Bb, HEADS, n, D), axis=1) + bo_ref[l]
        x = x + attn                              # dropout == identity (inference)

        # ------------------------------ feed-forward -----------------------------
        x2 = _layer_norm(x, ln2_a_ref[l], ln2_b_ref[l])
        w1g = jnp.broadcast_to(w1_ref[l][None], (Bb, D, D_FF))
        w2g = jnp.broadcast_to(w2_ref[l][None], (Bb, D_FF, D))
        h = jnp.maximum(
            jnp.einsum('bnd,bdf->bnf', x2, w1g,
                       preferred_element_type=jnp.float32) + b1_ref[l], 0.0)
        x = x + jnp.einsum('bnf,bfd->bnd', h, w2g,
                           preferred_element_type=jnp.float32) + b2_ref[l]

    out_ref[...] = _layer_norm(x, fn_a_ref[...], fn_b_ref[...])
    scores_ref[...] = last_scores


WEIGHT_NAMES = ["pos_w", "pos_b", "ln1_a", "ln1_b", "w_qkv", "b_qkv",
                "wo_h", "bo", "ln2_a", "ln2_b", "w1", "b1", "w2", "b2",
                "fn_a", "fn_b"]


def pack_params(p):
    """Host-side repacking: split Q/K/V/O weights per head so the kernel can run
    one head-batched einsum per op (no lane shuffles inside the kernel)."""
    def heads_cols(w):          # (N, D, D) -> (N, H, D, D_K)
        return w.reshape(N_LAYERS, D_MODEL, HEADS, D_K).transpose(0, 2, 1, 3)

    def heads_bias(b):          # (N, 1, D) -> (N, H, 1, D_K)
        return b.reshape(N_LAYERS, 1, HEADS, D_K).transpose(0, 2, 1, 3)

    return {
        "pos_w": p["pos_w"], "pos_b": p["pos_b"],
        "ln1_a": p["ln1_a"], "ln1_b": p["ln1_b"],
        "w_qkv": jnp.concatenate([heads_cols(p["wq"]), heads_cols(p["wk"]),
                                  heads_cols(p["wv"])], axis=-1),   # (N, H, D, 3*D_K)
        "b_qkv": jnp.concatenate([heads_bias(p["bq"]), heads_bias(p["bk"]),
                                  heads_bias(p["bv"])], axis=-1),   # (N, H, 1, 3*D_K)
        "wo_h": p["wo"].reshape(N_LAYERS, HEADS, D_K, D_MODEL),
        "bo": p["bo"],
        "ln2_a": p["ln2_a"], "ln2_b": p["ln2_b"],
        "w1": p["w1"], "b1": p["b1"], "w2": p["w2"], "b2": p["b2"],
        "fn_a": p["fn_a"], "fn_b": p["fn_b"],
    }


def transformer_encoder(xyz, features, params, num_batches, pts_per_batch,
                        batches_per_block=8):
    P, D = features.shape
    assert D == D_MODEL
    B, n = num_batches, pts_per_batch
    assert P == B * n

    B_BLK = max(1, min(batches_per_block, B))
    while B % B_BLK:
        B_BLK -= 1
    num_blocks = B // B_BLK

    xyz_b = xyz.reshape(B, n, 3)
    feat_b = features.reshape(B, n, D)

    packed = pack_params(params)
    weights = [packed[nm] for nm in WEIGHT_NAMES]

    def full_spec(arr):
        nd = arr.ndim
        return pl.BlockSpec(arr.shape, lambda g, nd=nd: (0,) * nd)

    in_specs = ([pl.BlockSpec((B_BLK, n, 3), lambda g: (g, 0, 0)),
                 pl.BlockSpec((B_BLK, n, D), lambda g: (g, 0, 0))]
                + [full_spec(w) for w in weights])

    out_shape = (jax.ShapeDtypeStruct((B, n, D), jnp.float32),
                 jax.ShapeDtypeStruct((B, n, n), jnp.float32))
    out_specs = (pl.BlockSpec((B_BLK, n, D), lambda g: (g, 0, 0)),
                 pl.BlockSpec((B_BLK, n, n), lambda g: (g, 0, 0)))

    out_feat_b, scores_blocks = pl.pallas_call(
        encoder_kernel,
        grid=(num_blocks,),
        in_specs=in_specs,
        out_specs=out_specs,
        out_shape=out_shape,
        compiler_params=pltpu.CompilerParams(
            dimension_semantics=("parallel",)),
    )(xyz_b, feat_b, *weights)

    return out_feat_b.reshape(P, D), scores_blocks


def assemble_dense_scores(scores_blocks):
    """Optional glue: one vectorized op building the block-diagonal (P, P)
    matrix the torch module returns (replaces the serialized per-batch
    dynamic_update_slice loop)."""
    B, n, _ = scores_blocks.shape
    eye = jnp.eye(B, dtype=scores_blocks.dtype)
    dense = eye[:, None, :, None] * scores_blocks[:, :, None, :]
    return dense.reshape(B * n, B * n)


def init_params(key):
    keys = iter(jax.random.split(key, 64))

    def linear(fan_in, fan_out):
        bound = 1.0 / math.sqrt(fan_in)
        w = jax.random.uniform(next(keys), (fan_in, fan_out), jnp.float32,
                               -bound, bound)
        b = jax.random.uniform(next(keys), (1, fan_out), jnp.float32,
                               -bound, bound)
        return w, b

    def stack_linear(fan_in, fan_out):
        ws, bs = [], []
        for _ in range(N_LAYERS):
            w, b = linear(fan_in, fan_out)
            ws.append(w)
            bs.append(b)
        return jnp.stack(ws), jnp.stack(bs)        # (N, in, out), (N, 1, out)

    p = {}
    p["pos_w"], p["pos_b"] = linear(3, D_MODEL)
    p["wq"], p["bq"] = stack_linear(D_MODEL, D_MODEL)
    p["wk"], p["bk"] = stack_linear(D_MODEL, D_MODEL)
    p["wv"], p["bv"] = stack_linear(D_MODEL, D_MODEL)
    p["wo"], p["bo"] = stack_linear(D_MODEL, D_MODEL)
    p["w1"], p["b1"] = stack_linear(D_MODEL, D_FF)
    p["w2"], p["b2"] = stack_linear(D_FF, D_MODEL)
    p["ln1_a"] = jnp.ones((N_LAYERS, 1, D_MODEL), jnp.float32)
    p["ln1_b"] = jnp.zeros((N_LAYERS, 1, D_MODEL), jnp.float32)
    p["ln2_a"] = jnp.ones((N_LAYERS, 1, D_MODEL), jnp.float32)
    p["ln2_b"] = jnp.zeros((N_LAYERS, 1, D_MODEL), jnp.float32)
    p["fn_a"] = jnp.ones((1, D_MODEL), jnp.float32)
    p["fn_b"] = jnp.zeros((1, D_MODEL), jnp.float32)
    return p


def reference_encoder(xyz, features, params, num_batches, pts_per_batch):
    """Pure numpy mirror of the PyTorch forward (eval mode) for validation."""
    xyz = np.asarray(xyz)
    features = np.asarray(features)
    pr = {k: np.asarray(v) for k, v in params.items()}
    B, n = num_batches, pts_per_batch
    P, D = features.shape
    out = np.zeros((P, D), np.float32)
    scores_blocks = np.zeros((B, n, n), np.float32)

    def lnorm(x, a, b):
        mu = x.mean(-1, keepdims=True)
        xc = x - mu
        std = np.sqrt((xc * xc).sum(-1, keepdims=True) / (x.shape[-1] - 1))
        return a * xc / (std + EPS) + b

    def softmax(x):
        e = np.exp(x - x.max(-1, keepdims=True))
        return e / e.sum(-1, keepdims=True)

    for b in range(B):
        s0, e0 = b * n, (b + 1) * n
        bxyz, bfeat = xyz[s0:e0], features[s0:e0]
        pdist = (bxyz[:, None, :] - bxyz[None, :, :]).mean(axis=1)
        x = bfeat + pdist @ pr["pos_w"] + pr["pos_b"][0]
        last = None
        for l in range(N_LAYERS):
            x2 = lnorm(x, pr["ln1_a"][l, 0], pr["ln1_b"][l, 0])
            q = (x2 @ pr["wq"][l] + pr["bq"][l, 0]).reshape(n, HEADS, D_K).transpose(1, 0, 2)
            k = (x2 @ pr["wk"][l] + pr["bk"][l, 0]).reshape(n, HEADS, D_K).transpose(1, 0, 2)
            v = (x2 @ pr["wv"][l] + pr["bv"][l, 0]).reshape(n, HEADS, D_K).transpose(1, 0, 2)
            sc = q @ k.transpose(0, 2, 1) / math.sqrt(D_K)
            s_nn = 1.0 / (1.0 + np.exp(-sc))
            o = softmax(sc) @ v
            concat = o.transpose(1, 0, 2).reshape(n, D)
            x = x + concat @ pr["wo"][l] + pr["bo"][l, 0]
            x2 = lnorm(x, pr["ln2_a"][l, 0], pr["ln2_b"][l, 0])
            h1 = np.maximum(x2 @ pr["w1"][l] + pr["b1"][l, 0], 0.0)
            x = x + h1 @ pr["w2"][l] + pr["b2"][l, 0]
            last = s_nn.mean(axis=0)
        out[s0:e0] = lnorm(x, pr["fn_a"][0], pr["fn_b"][0])
        scores_blocks[b] = last
    return out, scores_blocks


if __name__ == "__main__":
    key = jax.random.PRNGKey(0)
    k1, k2, k3 = jax.random.split(key, 3)

    B = 4              # number of point-cloud batches
    n = 8              # points per batch (equal-sized, contiguous batch_ids)
    P = B * n
    xyz = jax.random.normal(k1, (P, 3), jnp.float32)
    features = jax.random.normal(k2, (P, D_MODEL), jnp.float32)
    params = init_params(k3)

    # B_BLK = 2 -> grid of 2 parallel steps (keeps both v7x TensorCores busy).
    out_feat, scores_blocks = transformer_encoder(xyz, features, params, B, n,
                                                  batches_per_block=2)
    out_feat = jax.block_until_ready(out_feat)
    scores_blocks = jax.block_until_ready(scores_blocks)

    ref_out, ref_scores = reference_encoder(xyz, features, params, B, n)
    # Tolerance loosened vs. exact math because softmax/LayerNorm use the EUP
    # approximate reciprocal (pl.reciprocal(approx=True)).
    assert np.allclose(np.asarray(out_feat), ref_out, atol=1e-2, rtol=1e-2), \
        float(np.abs(np.asarray(out_feat) - ref_out).max())
    assert np.allclose(np.asarray(scores_blocks), ref_scores, atol=1e-2, rtol=1e-2), \
        float(np.abs(np.asarray(scores_blocks) - ref_scores).max())
    print("KERNEL_OK")
</pallas_src>

<mosaic_0001>
module attributes {stable_mosaic.version = 11 : i64} {
  func.func @encoder_kernel(%arg0: i32, %arg1: memref<2x8x3xf32, #tpu.memory_space<vmem>>, %arg2: memref<2x8x32xf32, #tpu.memory_space<vmem>>, %arg3: memref<3x32xf32, #tpu.memory_space<vmem>>, %arg4: memref<1x32xf32, #tpu.memory_space<vmem>>, %arg5: memref<2x1x32xf32, #tpu.memory_space<vmem>>, %arg6: memref<2x1x32xf32, #tpu.memory_space<vmem>>, %arg7: memref<2x4x32x24xf32, #tpu.memory_space<vmem>>, %arg8: memref<2x4x1x24xf32, #tpu.memory_space<vmem>>, %arg9: memref<2x4x8x32xf32, #tpu.memory_space<vmem>>, %arg10: memref<2x1x32xf32, #tpu.memory_space<vmem>>, %arg11: memref<2x1x32xf32, #tpu.memory_space<vmem>>, %arg12: memref<2x1x32xf32, #tpu.memory_space<vmem>>, %arg13: memref<2x32x64xf32, #tpu.memory_space<vmem>>, %arg14: memref<2x1x64xf32, #tpu.memory_space<vmem>>, %arg15: memref<2x64x32xf32, #tpu.memory_space<vmem>>, %arg16: memref<2x1x32xf32, #tpu.memory_space<vmem>>, %arg17: memref<1x32xf32, #tpu.memory_space<vmem>>, %arg18: memref<1x32xf32, #tpu.memory_space<vmem>>, %arg19: memref<2x8x32xf32, #tpu.memory_space<vmem>>, %arg20: memref<2x8x8xf32, #tpu.memory_space<vmem>>) attributes {dimension_semantics = [#tpu.dimension_semantics<parallel>], iteration_bounds = array<i64: 2>, scalar_prefetch = 0 : i64, scratch_operands = 0 : i64, tpu.core_type = #tpu.core_type<tc>, window_params = [{transform_indices = @transform_0, window_bounds = array<i64: 2, 8, 3>}, {transform_indices = @transform_1, window_bounds = array<i64: 2, 8, 32>}, {pipeline_mode = #tpu.pipeline_mode<synchronous>, transform_indices = @transform_2, window_bounds = array<i64: 3, 32>}, {pipeline_mode = #tpu.pipeline_mode<synchronous>, transform_indices = @transform_3, window_bounds = array<i64: 1, 32>}, {pipeline_mode = #tpu.pipeline_mode<synchronous>, transform_indices = @transform_4, window_bounds = array<i64: 2, 1, 32>}, {pipeline_mode = #tpu.pipeline_mode<synchronous>, transform_indices = @transform_5, window_bounds = array<i64: 2, 1, 32>}, {pipeline_mode = #tpu.pipeline_mode<synchronous>, transform_indices = @transform_6, window_bounds = array<i64: 2, 4, 32, 24>}, {pipeline_mode = #tpu.pipeline_mode<synchronous>, transform_indices = @transform_7, window_bounds = array<i64: 2, 4, 1, 24>}, {pipeline_mode = #tpu.pipeline_mode<synchronous>, transform_indices = @transform_8, window_bounds = array<i64: 2, 4, 8, 32>}, {pipeline_mode = #tpu.pipeline_mode<synchronous>, transform_indices = @transform_9, window_bounds = array<i64: 2, 1, 32>}, {pipeline_mode = #tpu.pipeline_mode<synchronous>, transform_indices = @transform_10, window_bounds = array<i64: 2, 1, 32>}, {pipeline_mode = #tpu.pipeline_mode<synchronous>, transform_indices = @transform_11, window_bounds = array<i64: 2, 1, 32>}, {pipeline_mode = #tpu.pipeline_mode<synchronous>, transform_indices = @transform_12, window_bounds = array<i64: 2, 32, 64>}, {pipeline_mode = #tpu.pipeline_mode<synchronous>, transform_indices = @transform_13, window_bounds = array<i64: 2, 1, 64>}, {pipeline_mode = #tpu.pipeline_mode<synchronous>, transform_indices = @transform_14, window_bounds = array<i64: 2, 64, 32>}, {pipeline_mode = #tpu.pipeline_mode<synchronous>, transform_indices = @transform_15, window_bounds = array<i64: 2, 1, 32>}, {pipeline_mode = #tpu.pipeline_mode<synchronous>, transform_indices = @transform_16, window_bounds = array<i64: 1, 32>}, {pipeline_mode = #tpu.pipeline_mode<synchronous>, transform_indices = @transform_17, window_bounds = array<i64: 1, 32>}, {transform_indices = @transform_18, window_bounds = array<i64: 2, 8, 32>}, {transform_indices = @transform_19, window_bounds = array<i64: 2, 8, 8>}]} {
    %c0 = arith.constant 0 : index
    %c0_0 = arith.constant 0 : index
    %c0_1 = arith.constant 0 : index
    %0 = vector.load %arg1[%c0, %c0_0, %c0_1] : memref<2x8x3xf32, #tpu.memory_space<vmem>>, vector<2x8x3xf32>
    %c0_2 = arith.constant 0 : index
    %c0_3 = arith.constant 0 : index
    %c0_4 = arith.constant 0 : index
    %1 = vector.load %arg2[%c0_2, %c0_3, %c0_4] : memref<2x8x32xf32, #tpu.memory_space<vmem>>, vector<2x8x32xf32>
    %cst = arith.constant dense<0.000000e+00> : vector<2x3xf32>
    %2 = vector.multi_reduction <add>, %0, %cst [1] : vector<2x8x3xf32> to vector<2x3xf32>
    %3 = vector.shape_cast %2 : vector<2x3xf32> to vector<2x1x3xf32>
    %cst_5 = arith.constant 8.000000e+00 : f32
    %4 = vector.broadcast %cst_5 : f32 to vector<2x1x3xf32>
    %5 = arith.divf %3, %4 : vector<2x1x3xf32>
    %6 = vector.broadcast %5 : vector<2x1x3xf32> to vector<2x8x3xf32>
    %7 = arith.subf %0, %6 : vector<2x8x3xf32>
    %c0_6 = arith.constant 0 : index
    %c0_7 = arith.constant 0 : index
    %8 = vector.load %arg3[%c0_6, %c0_7] : memref<3x32xf32, #tpu.memory_space<vmem>>, vector<3x32xf32>
    %9 = vector.shape_cast %8 : vector<3x32xf32> to vector<1x3x32xf32>
    %10 = vector.shape_cast %9 : vector<1x3x32xf32> to vector<1x3x32xf32>
    %11 = vector.broadcast %10 : vector<1x3x32xf32> to vector<2x3x32xf32>
    "tpu.trace_start"() <{level = 10 : i32, message = "bnc,bcd->bnd"}> : () -> ()
    %cst_8 = arith.constant dense<0.000000e+00> : vector<2x8x32xf32>
    %12 = tpu.matmul %7, %11, %cst_8 {dimension_numbers = #tpu.dot_dimension_numbers<[2], [1], [1], [2], [0, 0, 0, 1, 1, 2], [0], [0]>} : vector<2x8x3xf32>, vector<2x3x32xf32>, vector<2x8x32xf32> -> vector<2x8x32xf32>
    "tpu.trace_stop"() : () -> ()
    %13 = arith.addf %1, %12 : vector<2x8x32xf32>
    %c0_9 = arith.constant 0 : index
    %c0_10 = arith.constant 0 : index
    %14 = vector.load %arg4[%c0_9, %c0_10] : memref<1x32xf32, #tpu.memory_space<vmem>>, vector<1x32xf32>
    %15 = vector.shape_cast %14 : vector<1x32xf32> to vector<1x1x32xf32>
    %16 = vector.broadcast %15 : vector<1x1x32xf32> to vector<2x8x32xf32>
    %17 = arith.addf %13, %16 : vector<2x8x32xf32>
    %c0_11 = arith.constant 0 : index
    %c0_12 = arith.constant 0 : index
    %c0_13 = arith.constant 0 : index
    %18 = vector.load %arg5[%c0_11, %c0_12, %c0_13] : memref<2x1x32xf32, #tpu.memory_space<vmem>>, vector<1x1x32xf32>
    %19 = vector.shape_cast %18 : vector<1x1x32xf32> to vector<1x32xf32>
    %c0_14 = arith.constant 0 : index
    %c0_15 = arith.constant 0 : index
    %c0_16 = arith.constant 0 : index
    %20 = vector.load %arg6[%c0_14, %c0_15, %c0_16] : memref<2x1x32xf32, #tpu.memory_space<vmem>>, vector<1x1x32xf32>
    %21 = vector.shape_cast %20 : vector<1x1x32xf32> to vector<1x32xf32>
    %cst_17 = arith.constant dense<0.000000e+00> : vector<2x8xf32>
    %22 = vector.multi_reduction <add>, %17, %cst_17 [2] : vector<2x8x32xf32> to vector<2x8xf32>
    %23 = vector.shape_cast %22 : vector<2x8xf32> to vector<2x8x1xf32>
    %cst_18 = arith.constant 3.200000e+01 : f32
    %24 = vector.broadcast %cst_18 : f32 to vector<2x8x1xf32>
    %25 = arith.divf %23, %24 : vector<2x8x1xf32>
    %26 = vector.broadcast %25 : vector<2x8x1xf32> to vector<2x8x32xf32>
    %27 = arith.subf %17, %26 : vector<2x8x32xf32>
    %28 = arith.mulf %27, %27 : vector<2x8x32xf32>
    %cst_19 = arith.constant dense<0.000000e+00> : vector<2x8xf32>
    %29 = vector.multi_reduction <add>, %28, %cst_19 [2] : vector<2x8x32xf32> to vector<2x8xf32>
    %30 = vector.shape_cast %29 : vector<2x8xf32> to vector<2x8x1xf32>
    %cst_20 = arith.constant 0.0322580636 : f32
    %31 = vector.broadcast %cst_20 : f32 to vector<2x8x1xf32>
    %32 = arith.mulf %30, %31 : vector<2x8x1xf32>
    %33 = math.sqrt %32 : vector<2x8x1xf32>
    %cst_21 = arith.constant 9.99999997E-7 : f32
    %34 = vector.broadcast %cst_21 : f32 to vector<2x8x1xf32>
    %35 = arith.addf %33, %34 : vector<2x8x1xf32>
    %36 = tpu.reciprocal %35 {approx = true} : vector<2x8x1xf32> -> vector<2x8x1xf32>
    %37 = vector.broadcast %36 : vector<2x8x1xf32> to vector<2x8x32xf32>
    %38 = arith.mulf %27, %37 : vector<2x8x32xf32>
    %39 = vector.shape_cast %19 : vector<1x32xf32> to vector<1x1x32xf32>
    %40 = vector.broadcast %39 : vector<1x1x32xf32> to vector<2x8x32xf32>
    %41 = arith.mulf %40, %38 : vector<2x8x32xf32>
    %42 = vector.shape_cast %21 : vector<1x32xf32> to vector<1x1x32xf32>
    %43 = vector.broadcast %42 : vector<1x1x32xf32> to vector<2x8x32xf32>
    %44 = arith.addf %41, %43 : vector<2x8x32xf32>
    %45 = vector.shape_cast %44 : vector<2x8x32xf32> to vector<2x1x8x32xf32>
    %46 = vector.shape_cast %45 : vector<2x1x8x32xf32> to vector<2x1x8x32xf32>
    %47 = vector.broadcast %46 : vector<2x1x8x32xf32> to vector<2x4x8x32xf32>
    %48 = vector.shape_cast %47 : vector<2x4x8x32xf32> to vector<8x8x32xf32>
    %c0_22 = arith.constant 0 : index
    %c0_23 = arith.constant 0 : index
    %c0_24 = arith.constant 0 : index
    %c0_25 = arith.constant 0 : index
    %49 = vector.load %arg7[%c0_22, %c0_23, %c0_24, %c0_25] : memref<2x4x32x24xf32, #tpu.memory_space<vmem>>, vector<1x4x32x24xf32>
    %50 = vector.shape_cast %49 : vector<1x4x32x24xf32> to vector<4x32x24xf32>
    %51 = vector.shape_cast %50 : vector<4x32x24xf32> to vector<1x4x32x24xf32>
    %52 = vector.shape_cast %51 : vector<1x4x32x24xf32> to vector<1x4x32x24xf32>
    %53 = vector.broadcast %52 : vector<1x4x32x24xf32> to vector<2x4x32x24xf32>
    %54 = vector.shape_cast %53 : vector<2x4x32x24xf32> to vector<8x32x24xf32>
    %c0_26 = arith.constant 0 : index
    %c0_27 = arith.constant 0 : index
    %c0_28 = arith.constant 0 : index
    %c0_29 = arith.constant 0 : index
    %55 = vector.load %arg8[%c0_26, %c0_27, %c0_28, %c0_29] : memref<2x4x1x24xf32, #tpu.memory_space<vmem>>, vector<1x4x1x24xf32>
    %56 = vector.shape_cast %55 : vector<1x4x1x24xf32> to vector<4x1x24xf32>
    %57 = vector.shape_cast %56 : vector<4x1x24xf32> to vector<1x4x1x24xf32>
    %58 = vector.shape_cast %57 : vector<1x4x1x24xf32> to vector<1x4x1x24xf32>
    %59 = vector.broadcast %58 : vector<1x4x1x24xf32> to vector<2x4x1x24xf32>
    %60 = vector.shape_cast %59 : vector<2x4x1x24xf32> to vector<8x1x24xf32>
    "tpu.trace_start"() <{level = 10 : i32, message = "gnd,gde->gne"}> : () -> ()
    %cst_30 = arith.constant dense<0.000000e+00> : vector<8x8x24xf32>
    %61 = tpu.matmul %48, %54, %cst_30 {dimension_numbers = #tpu.dot_dimension_numbers<[2], [1], [1], [2], [0, 0, 0, 1, 1, 2], [0], [0]>} : vector<8x8x32xf32>, vector<8x32x24xf32>, vector<8x8x24xf32> -> vector<8x8x24xf32>
    "tpu.trace_stop"() : () -> ()
    %62 = vector.broadcast %60 : vector<8x1x24xf32> to vector<8x8x24xf32>
    %63 = arith.addf %61, %62 : vector<8x8x24xf32>
    %64 = vector.extract_strided_slice %63 {offsets = [0, 0, 0], sizes = [8, 8, 8], strides = [1, 1, 1]} : vector<8x8x24xf32> to vector<8x8x8xf32>
    %65 = vector.extract_strided_slice %63 {offsets = [0, 0, 8], sizes = [8, 8, 8], strides = [1, 1, 1]} : vector<8x8x24xf32> to vector<8x8x8xf32>
    %66 = vector.extract_strided_slice %63 {offsets = [0, 0, 16], sizes = [8, 8, 8], strides = [1, 1, 1]} : vector<8x8x24xf32> to vector<8x8x8xf32>
    "tpu.trace_start"() <{level = 10 : i32, message = "gik,gjk->gij"}> : () -> ()
    %cst_31 = arith.constant dense<0.000000e+00> : vector<8x8x8xf32>
    %67 = tpu.matmul %64, %65, %cst_31 {dimension_numbers = #tpu.dot_dimension_numbers<[2], [2], [1], [1], [0, 0, 0, 1, 1, 1], [0], [0]>} : vector<8x8x8xf32>, vector<8x8x8xf32>, vector<8x8x8xf32> -> vector<8x8x8xf32>
    "tpu.trace_stop"() : () -> ()
    %cst_32 = arith.constant 0.353553385 : f32
    %68 = vector.broadcast %cst_32 : f32 to vector<8x8x8xf32>
    %69 = arith.mulf %67, %68 : vector<8x8x8xf32>
    %cst_33 = arith.constant dense<0xFF800000> : vector<8x8xf32>
    %70 = vector.multi_reduction <maximumf>, %69, %cst_33 [2] : vector<8x8x8xf32> to vector<8x8xf32>
    %71 = vector.shape_cast %70 : vector<8x8xf32> to vector<8x8x1xf32>
    %72 = vector.broadcast %71 : vector<8x8x1xf32> to vector<8x8x8xf32>
    %73 = arith.subf %69, %72 : vector<8x8x8xf32>
    %74 = math.exp %73 : vector<8x8x8xf32>
    %cst_34 = arith.constant dense<0.000000e+00> : vector<8x8xf32>
    %75 = vector.multi_reduction <add>, %74, %cst_34 [2] : vector<8x8x8xf32> to vector<8x8xf32>
    %76 = vector.shape_cast %75 : vector<8x8xf32> to vector<8x8x1xf32>
    %77 = tpu.reciprocal %76 {approx = true} : vector<8x8x1xf32> -> vector<8x8x1xf32>
    %78 = vector.broadcast %77 : vector<8x8x1xf32> to vector<8x8x8xf32>
    %79 = arith.mulf %74, %78 : vector<8x8x8xf32>
    "tpu.trace_start"() <{level = 10 : i32, message = "gij,gjk->gik"}> : () -> ()
    %cst_35 = arith.constant dense<0.000000e+00> : vector<8x8x8xf32>
    %80 = tpu.matmul %79, %66, %cst_35 {dimension_numbers = #tpu.dot_dimension_numbers<[2], [1], [1], [2], [0, 0, 0, 1, 1, 2], [0], [0]>} : vector<8x8x8xf32>, vector<8x8x8xf32>, vector<8x8x8xf32> -> vector<8x8x8xf32>
    "tpu.trace_stop"() : () -> ()
    %c0_36 = arith.constant 0 : index
    %c0_37 = arith.constant 0 : index
    %c0_38 = arith.constant 0 : index
    %c0_39 = arith.constant 0 : index
    %81 = vector.load %arg9[%c0_36, %c0_37, %c0_38, %c0_39] : memref<2x4x8x32xf32, #tpu.memory_space<vmem>>, vector<1x4x8x32xf32>
    %82 = vector.shape_cast %81 : vector<1x4x8x32xf32> to vector<4x8x32xf32>
    %83 = vector.shape_cast %82 : vector<4x8x32xf32> to vector<1x4x8x32xf32>
    %84 = vector.shape_cast %83 : vector<1x4x8x32xf32> to vector<1x4x8x32xf32>
    %85 = vector.broadcast %84 : vector<1x4x8x32xf32> to vector<2x4x8x32xf32>
    %86 = vector.shape_cast %85 : vector<2x4x8x32xf32> to vector<8x8x32xf32>
    "tpu.trace_start"() <{level = 10 : i32, message = "gnk,gkd->gnd"}> : () -> ()
    %cst_40 = arith.constant dense<0.000000e+00> : vector<8x8x32xf32>
    %87 = tpu.matmul %80, %86, %cst_40 {dimension_numbers = #tpu.dot_dimension_numbers<[2], [1], [1], [2], [0, 0, 0, 1, 1, 2], [0], [0]>} : vector<8x8x8xf32>, vector<8x8x32xf32>, vector<8x8x32xf32> -> vector<8x8x32xf32>
    "tpu.trace_stop"() : () -> ()
    %88 = vector.shape_cast %87 : vector<8x8x32xf32> to vector<2x4x8x32xf32>
    %cst_41 = arith.constant dense<0.000000e+00> : vector<2x8x32xf32>
    %89 = vector.multi_reduction <add>, %88, %cst_41 [1] : vector<2x4x8x32xf32> to vector<2x8x32xf32>
    %c0_42 = arith.constant 0 : index
    %c0_43 = arith.constant 0 : index
    %c0_44 = arith.constant 0 : index
    %90 = vector.load %arg10[%c0_42, %c0_43, %c0_44] : memref<2x1x32xf32, #tpu.memory_space<vmem>>, vector<1x1x32xf32>
    %91 = vector.shape_cast %90 : vector<1x1x32xf32> to vector<1x32xf32>
    %92 = vector.shape_cast %91 : vector<1x32xf32> to vector<1x1x32xf32>
    %93 = vector.broadcast %92 : vector<1x1x32xf32> to vector<2x8x32xf32>
    %94 = arith.addf %89, %93 : vector<2x8x32xf32>
    %95 = arith.addf %17, %94 : vector<2x8x32xf32>
    %c0_45 = arith.constant 0 : index
    %c0_46 = arith.constant 0 : index
    %c0_47 = arith.constant 0 : index
    %96 = vector.load %arg11[%c0_45, %c0_46, %c0_47] : memref<2x1x32xf32, #tpu.memory_space<vmem>>, vector<1x1x32xf32>
    %97 = vector.shape_cast %96 : vector<1x1x32xf32> to vector<1x32xf32>
    %c0_48 = arith.constant 0 : index
    %c0_49 = arith.constant 0 : index
    %c0_50 = arith.constant 0 : index
    %98 = vector.load %arg12[%c0_48, %c0_49, %c0_50] : memref<2x1x32xf32, #tpu.memory_space<vmem>>, vector<1x1x32xf32>
    %99 = vector.shape_cast %98 : vector<1x1x32xf32> to vector<1x32xf32>
    %cst_51 = arith.constant dense<0.000000e+00> : vector<2x8xf32>
    %100 = vector.multi_reduction <add>, %95, %cst_51 [2] : vector<2x8x32xf32> to vector<2x8xf32>
    %101 = vector.shape_cast %100 : vector<2x8xf32> to vector<2x8x1xf32>
    %cst_52 = arith.constant 3.200000e+01 : f32
    %102 = vector.broadcast %cst_52 : f32 to vector<2x8x1xf32>
    %103 = arith.divf %101, %102 : vector<2x8x1xf32>
    %104 = vector.broadcast %103 : vector<2x8x1xf32> to vector<2x8x32xf32>
    %105 = arith.subf %95, %104 : vector<2x8x32xf32>
    %106 = arith.mulf %105, %105 : vector<2x8x32xf32>
    %cst_53 = arith.constant dense<0.000000e+00> : vector<2x8xf32>
    %107 = vector.multi_reduction <add>, %106, %cst_53 [2] : vector<2x8x32xf32> to vector<2x8xf32>
    %108 = vector.shape_cast %107 : vector<2x8xf32> to vector<2x8x1xf32>
    %cst_54 = arith.constant 0.0322580636 : f32
    %109 = vector.broadcast %cst_54 : f32 to vector<2x8x1xf32>
    %110 = arith.mulf %108, %109 : vector<2x8x1xf32>
    %111 = math.sqrt %110 : vector<2x8x1xf32>
    %cst_55 = arith.constant 9.99999997E-7 : f32
    %112 = vector.broadcast %cst_55 : f32 to vector<2x8x1xf32>
    %113 = arith.addf %111, %112 : vector<2x8x1xf32>
    %114 = tpu.reciprocal %113 {approx = true} : vector<2x8x1xf32> -> vector<2x8x1xf32>
    %115 = vector.broadcast %114 : vector<2x8x1xf32> to vector<2x8x32xf32>
    %116 = arith.mulf %105, %115 : vector<2x8x32xf32>
    %117 = vector.shape_cast %97 : vector<1x32xf32> to vector<1x1x32xf32>
    %118 = vector.broadcast %117 : vector<1x1x32xf32> to vector<2x8x32xf32>
    %119 = arith.mulf %118, %116 : vector<2x8x32xf32>
    %120 = vector.shape_cast %99 : vector<1x32xf32> to vector<1x1x32xf32>
    %121 = vector.broadcast %120 : vector<1x1x32xf32> to vector<2x8x32xf32>
    %122 = arith.addf %119, %121 : vector<2x8x32xf32>
    %c0_56 = arith.constant 0 : index
    %c0_57 = arith.constant 0 : index
    %c0_58 = arith.constant 0 : index
    %123 = vector.load %arg13[%c0_56, %c0_57, %c0_58] : memref<2x32x64xf32, #tpu.memory_space<vmem>>, vector<1x32x64xf32>
    %124 = vector.shape_cast %123 : vector<1x32x64xf32> to vector<32x64xf32>
    %125 = vector.shape_cast %124 : vector<32x64xf32> to vector<1x32x64xf32>
    %126 = vector.shape_cast %125 : vector<1x32x64xf32> to vector<1x32x64xf32>
    %127 = vector.broadcast %126 : vector<1x32x64xf32> to vector<2x32x64xf32>
    %c0_59 = arith.constant 0 : index
    %c0_60 = arith.constant 0 : index
    %c0_61 = arith.constant 0 : index
    %128 = vector.load %arg15[%c0_59, %c0_60, %c0_61] : memref<2x64x32xf32, #tpu.memory_space<vmem>>, vector<1x64x32xf32>
    %129 = vector.shape_cast %128 : vector<1x64x32xf32> to vector<64x32xf32>
    %130 = vector.shape_cast %129 : vector<64x32xf32> to vector<1x64x32xf32>
    %131 = vector.shape_cast %130 : vector<1x64x32xf32> to vector<1x64x32xf32>
    %132 = vector.broadcast %131 : vector<1x64x32xf32> to vector<2x64x32xf32>
    "tpu.trace_start"() <{level = 10 : i32, message = "bnd,bdf->bnf"}> : () -> ()
    %cst_62 = arith.constant dense<0.000000e+00> : vector<2x8x64xf32>
    %133 = tpu.matmul %122, %127, %cst_62 {dimension_numbers = #tpu.dot_dimension_numbers<[2], [1], [1], [2], [0, 0, 0, 1, 1, 2], [0], [0]>} : vector<2x8x32xf32>, vector<2x32x64xf32>, vector<2x8x64xf32> -> vector<2x8x64xf32>
    "tpu.trace_stop"() : () -> ()
    %c0_63 = arith.constant 0 : index
    %c0_64 = arith.constant 0 : index
    %c0_65 = arith.constant 0 : index
    %134 = vector.load %arg14[%c0_63, %c0_64, %c0_65] : memref<2x1x64xf32, #tpu.memory_space<vmem>>, vector<1x1x64xf32>
    %135 = vector.shape_cast %134 : vector<1x1x64xf32> to vector<1x64xf32>
    %136 = vector.shape_cast %135 : vector<1x64xf32> to vector<1x1x64xf32>
    %137 = vector.broadcast %136 : vector<1x1x64xf32> to vector<2x8x64xf32>
    %138 = arith.addf %133, %137 : vector<2x8x64xf32>
    %cst_66 = arith.constant 0.000000e+00 : f32
    %139 = vector.broadcast %cst_66 : f32 to vector<2x8x64xf32>
    %140 = arith.maximumf %138, %139 : vector<2x8x64xf32>
    "tpu.trace_start"() <{level = 10 : i32, message = "bnf,bfd->bnd"}> : () -> ()
    %cst_67 = arith.constant dense<0.000000e+00> : vector<2x8x32xf32>
    %141 = tpu.matmul %140, %132, %cst_67 {dimension_numbers = #tpu.dot_dimension_numbers<[2], [1], [1], [2], [0, 0, 0, 1, 1, 2], [0], [0]>} : vector<2x8x64xf32>, vector<2x64x32xf32>, vector<2x8x32xf32> -> vector<2x8x32xf32>
    "tpu.trace_stop"() : () -> ()
    %142 = arith.addf %95, %141 : vector<2x8x32xf32>
    %c0_68 = arith.constant 0 : index
    %c0_69 = arith.constant 0 : index
    %c0_70 = arith.constant 0 : index
    %143 = vector.load %arg16[%c0_68, %c0_69, %c0_70] : memref<2x1x32xf32, #tpu.memory_space<vmem>>, vector<1x1x32xf32>
    %144 = vector.shape_cast %143 : vector<1x1x32xf32> to vector<1x32xf32>
    %145 = vector.shape_cast %144 : vector<1x32xf32> to vector<1x1x32xf32>
    %146 = vector.broadcast %145 : vector<1x1x32xf32> to vector<2x8x32xf32>
    %147 = arith.addf %142, %146 : vector<2x8x32xf32>
    %c1 = arith.constant 1 : index
    %c0_71 = arith.constant 0 : index
    %c0_72 = arith.constant 0 : index
    %148 = vector.load %arg5[%c1, %c0_71, %c0_72] : memref<2x1x32xf32, #tpu.memory_space<vmem>>, vector<1x1x32xf32>
    %149 = vector.shape_cast %148 : vector<1x1x32xf32> to vector<1x32xf32>
    %c1_73 = arith.constant 1 : index
    %c0_74 = arith.constant 0 : index
    %c0_75 = arith.constant 0 : index
    %150 = vector.load %arg6[%c1_73, %c0_74, %c0_75] : memref<2x1x32xf32, #tpu.memory_space<vmem>>, vector<1x1x32xf32>
    %151 = vector.shape_cast %150 : vector<1x1x32xf32> to vector<1x32xf32>
    %cst_76 = arith.constant dense<0.000000e+00> : vector<2x8xf32>
    %152 = vector.multi_reduction <add>, %147, %cst_76 [2] : vector<2x8x32xf32> to vector<2x8xf32>
    %153 = vector.shape_cast %152 : vector<2x8xf32> to vector<2x8x1xf32>
    %cst_77 = arith.constant 3.200000e+01 : f32
    %154 = vector.broadcast %cst_77 : f32 to vector<2x8x1xf32>
    %155 = arith.divf %153, %154 : vector<2x8x1xf32>
    %156 = vector.broadcast %155 : vector<2x8x1xf32> to vector<2x8x32xf32>
    %157 = arith.subf %147, %156 : vector<2x8x32xf32>
    %158 = arith.mulf %157, %157 : vector<2x8x32xf32>
    %cst_78 = arith.constant dense<0.000000e+00> : vector<2x8xf32>
    %159 = vector.multi_reduction <add>, %158, %cst_78 [2] : vector<2x8x32xf32> to vector<2x8xf32>
    %160 = vector.shape_cast %159 : vector<2x8xf32> to vector<2x8x1xf32>
    %cst_79 = arith.constant 0.0322580636 : f32
    %161 = vector.broadcast %cst_79 : f32 to vector<2x8x1xf32>
    %162 = arith.mulf %160, %161 : vector<2x8x1xf32>
    %163 = math.sqrt %162 : vector<2x8x1xf32>
    %cst_80 = arith.constant 9.99999997E-7 : f32
    %164 = vector.broadcast %cst_80 : f32 to vector<2x8x1xf32>
    %165 = arith.addf %163, %164 : vector<2x8x1xf32>
    %166 = tpu.reciprocal %165 {approx = true} : vector<2x8x1xf32> -> vector<2x8x1xf32>
    %167 = vector.broadcast %166 : vector<2x8x1xf32> to vector<2x8x32xf32>
    %168 = arith.mulf %157, %167 : vector<2x8x32xf32>
    %169 = vector.shape_cast %149 : vector<1x32xf32> to vector<1x1x32xf32>
    %170 = vector.broadcast %169 : vector<1x1x32xf32> to vector<2x8x32xf32>
    %171 = arith.mulf %170, %168 : vector<2x8x32xf32>
    %172 = vector.shape_cast %151 : vector<1x32xf32> to vector<1x1x32xf32>
    %173 = vector.broadcast %172 : vector<1x1x32xf32> to vector<2x8x32xf32>
    %174 = arith.addf %171, %173 : vector<2x8x32xf32>
    %175 = vector.shape_cast %174 : vector<2x8x32xf32> to vector<2x1x8x32xf32>
    %176 = vector.shape_cast %175 : vector<2x1x8x32xf32> to vector<2x1x8x32xf32>
    %177 = vector.broadcast %176 : vector<2x1x8x32xf32> to vector<2x4x8x32xf32>
    %178 = vector.shape_cast %177 : vector<2x4x8x32xf32> to vector<8x8x32xf32>
    %c1_81 = arith.constant 1 : index
    %c0_82 = arith.constant 0 : index
    %c0_83 = arith.constant 0 : index
    %c0_84 = arith.constant 0 : index
    %179 = vector.load %arg7[%c1_81, %c0_82, %c0_83, %c0_84] : memref<2x4x32x24xf32, #tpu.memory_space<vmem>>, vector<1x4x32x24xf32>
    %180 = vector.shape_cast %179 : vector<1x4x32x24xf32> to vector<4x32x24xf32>
    %181 = vector.shape_cast %180 : vector<4x32x24xf32> to vector<1x4x32x24xf32>
    %182 = vector.shape_cast %181 : vector<1x4x32x24xf32> to vector<1x4x32x24xf32>
    %183 = vector.broadcast %182 : vector<1x4x32x24xf32> to vector<2x4x32x24xf32>
    %184 = vector.shape_cast %183 : vector<2x4x32x24xf32> to vector<8x32x24xf32>
    %c1_85 = arith.constant 1 : index
    %c0_86 = arith.constant 0 : index
    %c0_87 = arith.constant 0 : index
    %c0_88 = arith.constant 0 : index
    %185 = vector.load %arg8[%c1_85, %c0_86, %c0_87, %c0_88] : memref<2x4x1x24xf32, #tpu.memory_space<vmem>>, vector<1x4x1x24xf32>
    %186 = vector.shape_cast %185 : vector<1x4x1x24xf32> to vector<4x1x24xf32>
    %187 = vector.shape_cast %186 : vector<4x1x24xf32> to vector<1x4x1x24xf32>
    %188 = vector.shape_cast %187 : vector<1x4x1x24xf32> to vector<1x4x1x24xf32>
    %189 = vector.broadcast %188 : vector<1x4x1x24xf32> to vector<2x4x1x24xf32>
    %190 = vector.shape_cast %189 : vector<2x4x1x24xf32> to vector<8x1x24xf32>
    "tpu.trace_start"() <{level = 10 : i32, message = "gnd,gde->gne"}> : () -> ()
    %cst_89 = arith.constant dense<0.000000e+00> : vector<8x8x24xf32>
    %191 = tpu.matmul %178, %184, %cst_89 {dimension_numbers = #tpu.dot_dimension_numbers<[2], [1], [1], [2], [0, 0, 0, 1, 1, 2], [0], [0]>} : vector<8x8x32xf32>, vector<8x32x24xf32>, vector<8x8x24xf32> -> vector<8x8x24xf32>
    "tpu.trace_stop"() : () -> ()
    %192 = vector.broadcast %190 : vector<8x1x24xf32> to vector<8x8x24xf32>
    %193 = arith.addf %191, %192 : vector<8x8x24xf32>
    %194 = vector.extract_strided_slice %193 {offsets = [0, 0, 0], sizes = [8, 8, 8], strides = [1, 1, 1]} : vector<8x8x24xf32> to vector<8x8x8xf32>
    %195 = vector.extract_strided_slice %193 {offsets = [0, 0, 8], sizes = [8, 8, 8], strides = [1, 1, 1]} : vector<8x8x24xf32> to vector<8x8x8xf32>
    %196 = vector.extract_strided_slice %193 {offsets = [0, 0, 16], sizes = [8, 8, 8], strides = [1, 1, 1]} : vector<8x8x24xf32> to vector<8x8x8xf32>
    "tpu.trace_start"() <{level = 10 : i32, message = "gik,gjk->gij"}> : () -> ()
    %cst_90 = arith.constant dense<0.000000e+00> : vector<8x8x8xf32>
    %197 = tpu.matmul %194, %195, %cst_90 {dimension_numbers = #tpu.dot_dimension_numbers<[2], [2], [1], [1], [0, 0, 0, 1, 1, 1], [0], [0]>} : vector<8x8x8xf32>, vector<8x8x8xf32>, vector<8x8x8xf32> -> vector<8x8x8xf32>
    "tpu.trace_stop"() : () -> ()
    %cst_91 = arith.constant 0.353553385 : f32
    %198 = vector.broadcast %cst_91 : f32 to vector<8x8x8xf32>
    %199 = arith.mulf %197, %198 : vector<8x8x8xf32>
    %200 = arith.negf %199 : vector<8x8x8xf32>
    %201 = math.exp %200 : vector<8x8x8xf32>
    %cst_92 = arith.constant 1.000000e+00 : f32
    %202 = vector.broadcast %cst_92 : f32 to vector<8x8x8xf32>
    %203 = arith.addf %202, %201 : vector<8x8x8xf32>
    %204 = arith.divf %202, %203 : vector<8x8x8xf32>
    %205 = vector.shape_cast %204 : vector<8x8x8xf32> to vector<2x4x8x8xf32>
    %cst_93 = arith.constant dense<0.000000e+00> : vector<2x8x8xf32>
    %206 = vector.multi_reduction <add>, %205, %cst_93 [1] : vector<2x4x8x8xf32> to vector<2x8x8xf32>
    %cst_94 = arith.constant 4.000000e+00 : f32
    %207 = vector.broadcast %cst_94 : f32 to vector<2x8x8xf32>
    %208 = arith.divf %206, %207 : vector<2x8x8xf32>
    %cst_95 = arith.constant dense<0xFF800000> : vector<8x8xf32>
    %209 = vector.multi_reduction <maximumf>, %199, %cst_95 [2] : vector<8x8x8xf32> to vector<8x8xf32>
    %210 = vector.shape_cast %209 : vector<8x8xf32> to vector<8x8x1xf32>
    %211 = vector.broadcast %210 : vector<8x8x1xf32> to vector<8x8x8xf32>
    %212 = arith.subf %199, %211 : vector<8x8x8xf32>
    %213 = math.exp %212 : vector<8x8x8xf32>
    %cst_96 = arith.constant dense<0.000000e+00> : vector<8x8xf32>
    %214 = vector.multi_reduction <add>, %213, %cst_96 [2] : vector<8x8x8xf32> to vector<8x8xf32>
    %215 = vector.shape_cast %214 : vector<8x8xf32> to vector<8x8x1xf32>
    %216 = tpu.reciprocal %215 {approx = true} : vector<8x8x1xf32> -> vector<8x8x1xf32>
    %217 = vector.broadcast %216 : vector<8x8x1xf32> to vector<8x8x8xf32>
    %218 = arith.mulf %213, %217 : vector<8x8x8xf32>
    "tpu.trace_start"() <{level = 10 : i32, message = "gij,gjk->gik"}> : () -> ()
    %cst_97 = arith.constant dense<0.000000e+00> : vector<8x8x8xf32>
    %219 = tpu.matmul %218, %196, %cst_97 {dimension_numbers = #tpu.dot_dimension_numbers<[2], [1], [1], [2], [0, 0, 0, 1, 1, 2], [0], [0]>} : vector<8x8x8xf32>, vector<8x8x8xf32>, vector<8x8x8xf32> -> vector<8x8x8xf32>
    "tpu.trace_stop"() : () -> ()
    %c1_98 = arith.constant 1 : index
    %c0_99 = arith.constant 0 : index
    %c0_100 = arith.constant 0 : index
    %c0_101 = arith.constant 0 : index
    %220 = vector.load %arg9[%c1_98, %c0_99, %c0_100, %c0_101] : memref<2x4x8x32xf32, #tpu.memory_space<vmem>>, vector<1x4x8x32xf32>
    %221 = vector.shape_cast %220 : vector<1x4x8x32xf32> to vector<4x8x32xf32>
    %222 = vector.shape_cast %221 : vector<4x8x32xf32> to vector<1x4x8x32xf32>
    %223 = vector.shape_cast %222 : vector<1x4x8x32xf32> to vector<1x4x8x32xf32>
    %224 = vector.broadcast %223 : vector<1x4x8x32xf32> to vector<2x4x8x32xf32>
    %225 = vector.shape_cast %224 : vector<2x4x8x32xf32> to vector<8x8x32xf32>
    "tpu.trace_start"() <{level = 10 : i32, message = "gnk,gkd->gnd"}> : () -> ()
    %cst_102 = arith.constant dense<0.000000e+00> : vector<8x8x32xf32>
    %226 = tpu.matmul %219, %225, %cst_102 {dimension_numbers = #tpu.dot_dimension_numbers<[2], [1], [1], [2], [0, 0, 0, 1, 1, 2], [0], [0]>} : vector<8x8x8xf32>, vector<8x8x32xf32>, vector<8x8x32xf32> -> vector<8x8x32xf32>
    "tpu.trace_stop"() : () -> ()
    %227 = vector.shape_cast %226 : vector<8x8x32xf32> to vector<2x4x8x32xf32>
    %cst_103 = arith.constant dense<0.000000e+00> : vector<2x8x32xf32>
    %228 = vector.multi_reduction <add>, %227, %cst_103 [1] : vector<2x4x8x32xf32> to vector<2x8x32xf32>
    %c1_104 = arith.constant 1 : index
    %c0_105 = arith.constant 0 : index
    %c0_106 = arith.constant 0 : index
    %229 = vector.load %arg10[%c1_104, %c0_105, %c0_106] : memref<2x1x32xf32, #tpu.memory_space<vmem>>, vector<1x1x32xf32>
    %230 = vector.shape_cast %229 : vector<1x1x32xf32> to vector<1x32xf32>
    %231 = vector.shape_cast %230 : vector<1x32xf32> to vector<1x1x32xf32>
    %232 = vector.broadcast %231 : vector<1x1x32xf32> to vector<2x8x32xf32>
    %233 = arith.addf %228, %232 : vector<2x8x32xf32>
    %234 = arith.addf %147, %233 : vector<2x8x32xf32>
    %c1_107 = arith.constant 1 : index
    %c0_108 = arith.constant 0 : index
    %c0_109 = arith.constant 0 : index
    %235 = vector.load %arg11[%c1_107, %c0_108, %c0_109] : memref<2x1x32xf32, #tpu.memory_space<vmem>>, vector<1x1x32xf32>
    %236 = vector.shape_cast %235 : vector<1x1x32xf32> to vector<1x32xf32>
    %c1_110 = arith.constant 1 : index
    %c0_111 = arith.constant 0 : index
    %c0_112 = arith.constant 0 : index
    %237 = vector.load %arg12[%c1_110, %c0_111, %c0_112] : memref<2x1x32xf32, #tpu.memory_space<vmem>>, vector<1x1x32xf32>
    %238 = vector.shape_cast %237 : vector<1x1x32xf32> to vector<1x32xf32>
    %cst_113 = arith.constant dense<0.000000e+00> : vector<2x8xf32>
    %239 = vector.multi_reduction <add>, %234, %cst_113 [2] : vector<2x8x32xf32> to vector<2x8xf32>
    %240 = vector.shape_cast %239 : vector<2x8xf32> to vector<2x8x1xf32>
    %cst_114 = arith.constant 3.200000e+01 : f32
    %241 = vector.broadcast %cst_114 : f32 to vector<2x8x1xf32>
    %242 = arith.divf %240, %241 : vector<2x8x1xf32>
    %243 = vector.broadcast %242 : vector<2x8x1xf32> to vector<2x8x32xf32>
    %244 = arith.subf %234, %243 : vector<2x8x32xf32>
    %245 = arith.mulf %244, %244 : vector<2x8x32xf32>
    %cst_115 = arith.constant dense<0.000000e+00> : vector<2x8xf32>
    %246 = vector.multi_reduction <add>, %245, %cst_115 [2] : vector<2x8x32xf32> to vector<2x8xf32>
    %247 = vector.shape_cast %246 : vector<2x8xf32> to vector<2x8x1xf32>
    %cst_116 = arith.constant 0.0322580636 : f32
    %248 = vector.broadcast %cst_116 : f32 to vector<2x8x1xf32>
    %249 = arith.mulf %247, %248 : vector<2x8x1xf32>
    %250 = math.sqrt %249 : vector<2x8x1xf32>
    %cst_117 = arith.constant 9.99999997E-7 : f32
    %251 = vector.broadcast %cst_117 : f32 to vector<2x8x1xf32>
    %252 = arith.addf %250, %251 : vector<2x8x1xf32>
    %253 = tpu.reciprocal %252 {approx = true} : vector<2x8x1xf32> -> vector<2x8x1xf32>
    %254 = vector.broadcast %253 : vector<2x8x1xf32> to vector<2x8x32xf32>
    %255 = arith.mulf %244, %254 : vector<2x8x32xf32>
    %256 = vector.shape_cast %236 : vector<1x32xf32> to vector<1x1x32xf32>
    %257 = vector.broadcast %256 : vector<1x1x32xf32> to vector<2x8x32xf32>
    %258 = arith.mulf %257, %255 : vector<2x8x32xf32>
    %259 = vector.shape_cast %238 : vector<1x32xf32> to vector<1x1x32xf32>
    %260 = vector.broadcast %259 : vector<1x1x32xf32> to vector<2x8x32xf32>
    %261 = arith.addf %258, %260 : vector<2x8x32xf32>
    %c1_118 = arith.constant 1 : index
    %c0_119 = arith.constant 0 : index
    %c0_120 = arith.constant 0 : index
    %262 = vector.load %arg13[%c1_118, %c0_119, %c0_120] : memref<2x32x64xf32, #tpu.memory_space<vmem>>, vector<1x32x64xf32>
    %263 = vector.shape_cast %262 : vector<1x32x64xf32> to vector<32x64xf32>
    %264 = vector.shape_cast %263 : vector<32x64xf32> to vector<1x32x64xf32>
    %265 = vector.shape_cast %264 : vector<1x32x64xf32> to vector<1x32x64xf32>
    %266 = vector.broadcast %265 : vector<1x32x64xf32> to vector<2x32x64xf32>
    %c1_121 = arith.constant 1 : index
    %c0_122 = arith.constant 0 : index
    %c0_123 = arith.constant 0 : index
    %267 = vector.load %arg15[%c1_121, %c0_122, %c0_123] : memref<2x64x32xf32, #tpu.memory_space<vmem>>, vector<1x64x32xf32>
    %268 = vector.shape_cast %267 : vector<1x64x32xf32> to vector<64x32xf32>
    %269 = vector.shape_cast %268 : vector<64x32xf32> to vector<1x64x32xf32>
    %270 = vector.shape_cast %269 : vector<1x64x32xf32> to vector<1x64x32xf32>
    %271 = vector.broadcast %270 : vector<1x64x32xf32> to vector<2x64x32xf32>
    "tpu.trace_start"() <{level = 10 : i32, message = "bnd,bdf->bnf"}> : () -> ()
    %cst_124 = arith.constant dense<0.000000e+00> : vector<2x8x64xf32>
    %272 = tpu.matmul %261, %266, %cst_124 {dimension_numbers = #tpu.dot_dimension_numbers<[2], [1], [1], [2], [0, 0, 0, 1, 1, 2], [0], [0]>} : vector<2x8x32xf32>, vector<2x32x64xf32>, vector<2x8x64xf32> -> vector<2x8x64xf32>
    "tpu.trace_stop"() : () -> ()
    %c1_125 = arith.constant 1 : index
    %c0_126 = arith.constant 0 : index
    %c0_127 = arith.constant 0 : index
    %273 = vector.load %arg14[%c1_125, %c0_126, %c0_127] : memref<2x1x64xf32, #tpu.memory_space<vmem>>, vector<1x1x64xf32>
    %274 = vector.shape_cast %273 : vector<1x1x64xf32> to vector<1x64xf32>
    %275 = vector.shape_cast %274 : vector<1x64xf32> to vector<1x1x64xf32>
    %276 = vector.broadcast %275 : vector<1x1x64xf32> to vector<2x8x64xf32>
    %277 = arith.addf %272, %276 : vector<2x8x64xf32>
    %cst_128 = arith.constant 0.000000e+00 : f32
    %278 = vector.broadcast %cst_128 : f32 to vector<2x8x64xf32>
    %279 = arith.maximumf %277, %278 : vector<2x8x64xf32>
    "tpu.trace_start"() <{level = 10 : i32, message = "bnf,bfd->bnd"}> : () -> ()
    %cst_129 = arith.constant dense<0.000000e+00> : vector<2x8x32xf32>
    %280 = tpu.matmul %279, %271, %cst_129 {dimension_numbers = #tpu.dot_dimension_numbers<[2], [1], [1], [2], [0, 0, 0, 1, 1, 2], [0], [0]>} : vector<2x8x64xf32>, vector<2x64x32xf32>, vector<2x8x32xf32> -> vector<2x8x32xf32>
    "tpu.trace_stop"() : () -> ()
    %281 = arith.addf %234, %280 : vector<2x8x32xf32>
    %c1_130 = arith.constant 1 : index
    %c0_131 = arith.constant 0 : index
    %c0_132 = arith.constant 0 : index
    %282 = vector.load %arg16[%c1_130, %c0_131, %c0_132] : memref<2x1x32xf32, #tpu.memory_space<vmem>>, vector<1x1x32xf32>
    %283 = vector.shape_cast %282 : vector<1x1x32xf32> to vector<1x32xf32>
    %284 = vector.shape_cast %283 : vector<1x32xf32> to vector<1x1x32xf32>
    %285 = vector.broadcast %284 : vector<1x1x32xf32> to vector<2x8x32xf32>
    %286 = arith.addf %281, %285 : vector<2x8x32xf32>
    %c0_133 = arith.constant 0 : index
    %c0_134 = arith.constant 0 : index
    %287 = vector.load %arg17[%c0_133, %c0_134] : memref<1x32xf32, #tpu.memory_space<vmem>>, vector<1x32xf32>
    %c0_135 = arith.constant 0 : index
    %c0_136 = arith.constant 0 : index
    %288 = vector.load %arg18[%c0_135, %c0_136] : memref<1x32xf32, #tpu.memory_space<vmem>>, vector<1x32xf32>
    %cst_137 = arith.constant dense<0.000000e+00> : vector<2x8xf32>
    %289 = vector.multi_reduction <add>, %286, %cst_137 [2] : vector<2x8x32xf32> to vector<2x8xf32>
    %290 = vector.shape_cast %289 : vector<2x8xf32> to vector<2x8x1xf32>
    %cst_138 = arith.constant 3.200000e+01 : f32
    %291 = vector.broadcast %cst_138 : f32 to vector<2x8x1xf32>
    %292 = arith.divf %290, %291 : vector<2x8x1xf32>
    %293 = vector.broadcast %292 : vector<2x8x1xf32> to vector<2x8x32xf32>
    %294 = arith.subf %286, %293 : vector<2x8x32xf32>
    %295 = arith.mulf %294, %294 : vector<2x8x32xf32>
    %cst_139 = arith.constant dense<0.000000e+00> : vector<2x8xf32>
    %296 = vector.multi_reduction <add>, %295, %cst_139 [2] : vector<2x8x32xf32> to vector<2x8xf32>
    %297 = vector.shape_cast %296 : vector<2x8xf32> to vector<2x8x1xf32>
    %cst_140 = arith.constant 0.0322580636 : f32
    %298 = vector.broadcast %cst_140 : f32 to vector<2x8x1xf32>
    %299 = arith.mulf %297, %298 : vector<2x8x1xf32>
    %300 = math.sqrt %299 : vector<2x8x1xf32>
    %cst_141 = arith.constant 9.99999997E-7 : f32
    %301 = vector.broadcast %cst_141 : f32 to vector<2x8x1xf32>
    %302 = arith.addf %300, %301 : vector<2x8x1xf32>
    %303 = tpu.reciprocal %302 {approx = true} : vector<2x8x1xf32> -> vector<2x8x1xf32>
    %304 = vector.broadcast %303 : vector<2x8x1xf32> to vector<2x8x32xf32>
    %305 = arith.mulf %294, %304 : vector<2x8x32xf32>
    %306 = vector.shape_cast %287 : vector<1x32xf32> to vector<1x1x32xf32>
    %307 = vector.broadcast %306 : vector<1x1x32xf32> to vector<2x8x32xf32>
    %308 = arith.mulf %307, %305 : vector<2x8x32xf32>
    %309 = vector.shape_cast %288 : vector<1x32xf32> to vector<1x1x32xf32>
    %310 = vector.broadcast %309 : vector<1x1x32xf32> to vector<2x8x32xf32>
    %311 = arith.addf %308, %310 : vector<2x8x32xf32>
    %c0_142 = arith.constant 0 : index
    %c0_143 = arith.constant 0 : index
    %c0_144 = arith.constant 0 : index
    %312 = vector.load %arg19[%c0_142, %c0_143, %c0_144] : memref<2x8x32xf32, #tpu.memory_space<vmem>>, vector<2x8x32xf32>
    tpu.vector_store %arg19[%c0_142, %c0_143, %c0_144], %311 {strides = array<i32>} : memref<2x8x32xf32, #tpu.memory_space<vmem>>, vector<2x8x32xf32>,
    %c0_145 = arith.constant 0 : index
    %c0_146 = arith.constant 0 : index
    %c0_147 = arith.constant 0 : index
    %313 = vector.load %arg20[%c0_145, %c0_146, %c0_147] : memref<2x8x8xf32, #tpu.memory_space<vmem>>, vector<2x8x8xf32>
    tpu.vector_store %arg20[%c0_145, %c0_146, %c0_147], %208 {strides = array<i32>} : memref<2x8x8xf32, #tpu.memory_space<vmem>>, vector<2x8x8xf32>,
    return
  }
  func.func @transform_0(%arg0: i32) -> (i32, i32, i32) {
    %c0_i32 = arith.constant 0 : i32
    %c0_i32_0 = arith.constant 0 : i32
    %c0_i32_1 = arith.constant 0 : i32
    return %arg0, %c0_i32, %c0_i32_0 : i32, i32, i32
  }
  func.func @transform_1(%arg0: i32) -> (i32, i32, i32) {
    %c0_i32 = arith.constant 0 : i32
    %c0_i32_0 = arith.constant 0 : i32
    %c0_i32_1 = arith.constant 0 : i32
    return %arg0, %c0_i32, %c0_i32_0 : i32, i32, i32
  }
  func.func @transform_2(%arg0: i32) -> (i32, i32) {
    %c0_i32 = arith.constant 0 : i32
    %c0_i32_0 = arith.constant 0 : i32
    %c0_i32_1 = arith.constant 0 : i32
    return %c0_i32, %c0_i32_0 : i32, i32
  }
  func.func @transform_3(%arg0: i32) -> (i32, i32) {
    %c0_i32 = arith.constant 0 : i32
    %c0_i32_0 = arith.constant 0 : i32
    %c0_i32_1 = arith.constant 0 : i32
    return %c0_i32, %c0_i32_0 : i32, i32
  }
  func.func @transform_4(%arg0: i32) -> (i32, i32, i32) {
    %c0_i32 = arith.constant 0 : i32
    %c0_i32_0 = arith.constant 0 : i32
    %c0_i32_1 = arith.constant 0 : i32
    %c0_i32_2 = arith.constant 0 : i32
    return %c0_i32, %c0_i32_0, %c0_i32_1 : i32, i32, i32
  }
  func.func @transform_5(%arg0: i32) -> (i32, i32, i32) {
    %c0_i32 = arith.constant 0 : i32
    %c0_i32_0 = arith.constant 0 : i32
    %c0_i32_1 = arith.constant 0 : i32
    %c0_i32_2 = arith.constant 0 : i32
    return %c0_i32, %c0_i32_0, %c0_i32_1 : i32, i32, i32
  }
  func.func @transform_6(%arg0: i32) -> (i32, i32, i32, i32) {
    %c0_i32 = arith.constant 0 : i32
    %c0_i32_0 = arith.constant 0 : i32
    %c0_i32_1 = arith.constant 0 : i32
    %c0_i32_2 = arith.constant 0 : i32
    %c0_i32_3 = arith.constant 0 : i32
    return %c0_i32, %c0_i32_0, %c0_i32_1, %c0_i32_2 : i32, i32, i32, i32
  }
  func.func @transform_7(%arg0: i32) -> (i32, i32, i32, i32) {
    %c0_i32 = arith.constant 0 : i32
    %c0_i32_0 = arith.constant 0 : i32
    %c0_i32_1 = arith.constant 0 : i32
    %c0_i32_2 = arith.constant 0 : i32
    %c0_i32_3 = arith.constant 0 : i32
    return %c0_i32, %c0_i32_0, %c0_i32_1, %c0_i32_2 : i32, i32, i32, i32
  }
  func.func @transform_8(%arg0: i32) -> (i32, i32, i32, i32) {
    %c0_i32 = arith.constant 0 : i32
    %c0_i32_0 = arith.constant 0 : i32
    %c0_i32_1 = arith.constant 0 : i32
    %c0_i32_2 = arith.constant 0 : i32
    %c0_i32_3 = arith.constant 0 : i32
    return %c0_i32, %c0_i32_0, %c0_i32_1, %c0_i32_2 : i32, i32, i32, i32
  }
  func.func @transform_9(%arg0: i32) -> (i32, i32, i32) {
    %c0_i32 = arith.constant 0 : i32
    %c0_i32_0 = arith.constant 0 : i32
    %c0_i32_1 = arith.constant 0 : i32
    %c0_i32_2 = arith.constant 0 : i32
    return %c0_i32, %c0_i32_0, %c0_i32_1 : i32, i32, i32
  }
  func.func @transform_10(%arg0: i32) -> (i32, i32, i32) {
    %c0_i32 = arith.constant 0 : i32
    %c0_i32_0 = arith.constant 0 : i32
    %c0_i32_1 = arith.constant 0 : i32
    %c0_i32_2 = arith.constant 0 : i32
    return %c0_i32, %c0_i32_0, %c0_i32_1 : i32, i32, i32
  }
  func.func @transform_11(%arg0: i32) -> (i32, i32, i32) {
    %c0_i32 = arith.constant 0 : i32
    %c0_i32_0 = arith.constant 0 : i32
    %c0_i32_1 = arith.constant 0 : i32
    %c0_i32_2 = arith.constant 0 : i32
    return %c0_i32, %c0_i32_0, %c0_i32_1 : i32, i32, i32
  }
  func.func @transform_12(%arg0: i32) -> (i32, i32, i32) {
    %c0_i32 = arith.constant 0 : i32
    %c0_i32_0 = arith.constant 0 : i32
    %c0_i32_1 = arith.constant 0 : i32
    %c0_i32_2 = arith.constant 0 : i32
    return %c0_i32, %c0_i32_0, %c0_i32_1 : i32, i32, i32
  }
  func.func @transform_13(%arg0: i32) -> (i32, i32, i32) {
    %c0_i32 = arith.constant 0 : i32
    %c0_i32_0 = arith.constant 0 : i32
    %c0_i32_1 = arith.constant 0 : i32
    %c0_i32_2 = arith.constant 0 : i32
    return %c0_i32, %c0_i32_0, %c0_i32_1 : i32, i32, i32
  }
  func.func @transform_14(%arg0: i32) -> (i32, i32, i32) {
    %c0_i32 = arith.constant 0 : i32
    %c0_i32_0 = arith.constant 0 : i32
    %c0_i32_1 = arith.constant 0 : i32
    %c0_i32_2 = arith.constant 0 : i32
    return %c0_i32, %c0_i32_0, %c0_i32_1 : i32, i32, i32
  }
  func.func @transform_15(%arg0: i32) -> (i32, i32, i32) {
    %c0_i32 = arith.constant 0 : i32
    %c0_i32_0 = arith.constant 0 : i32
    %c0_i32_1 = arith.constant 0 : i32
    %c0_i32_2 = arith.constant 0 : i32
    return %c0_i32, %c0_i32_0, %c0_i32_1 : i32, i32, i32
  }
  func.func @transform_16(%arg0: i32) -> (i32, i32) {
    %c0_i32 = arith.constant 0 : i32
    %c0_i32_0 = arith.constant 0 : i32
    %c0_i32_1 = arith.constant 0 : i32
    return %c0_i32, %c0_i32_0 : i32, i32
  }
  func.func @transform_17(%arg0: i32) -> (i32, i32) {
    %c0_i32 = arith.constant 0 : i32
    %c0_i32_0 = arith.constant 0 : i32
    %c0_i32_1 = arith.constant 0 : i32
    return %c0_i32, %c0_i32_0 : i32, i32
  }
  func.func @transform_18(%arg0: i32) -> (i32, i32, i32) {
    %c0_i32 = arith.constant 0 : i32
    %c0_i32_0 = arith.constant 0 : i32
    %c0_i32_1 = arith.constant 0 : i32
    return %arg0, %c0_i32, %c0_i32_0 : i32, i32, i32
  }
  func.func @transform_19(%arg0: i32) -> (i32, i32, i32) {
    %c0_i32 = arith.constant 0 : i32
    %c0_i32_0 = arith.constant 0 : i32
    %c0_i32_1 = arith.constant 0 : i32
    return %arg0, %c0_i32, %c0_i32_0 : i32, i32, i32
  }
}

</mosaic_0001>

<bundles_post_ra>
// kernel: tpu_custom_call.1
= control target key start
LH: loop header
LB: loop body
LE: loop exit
PB: predicated region body
PF: predicated region fallthrough
CT: control target
= control target key end

     0   :  { %s9664_s0 = inlined_call_operand.vmem [shape: f32[4,8,3], index: 0, kind: input, shape index: {}]   ;;  %s9665_s1 = inlined_call_operand.vmem [shape: f32[4,8,32], index: 1, kind: input, shape index: {}]   ;;  %s9666_s2 = inlined_call_operand.vmem [shape: f32[3,32], index: 2, kind: input, shape index: {}]   ;;  %s9667_s3 = inlined_call_operand.vmem [shape: f32[1,32], index: 3, kind: input, shape index: {}]   ;;  %s9668_s4 = inlined_call_operand.vmem [shape: f32[2,1,32], index: 4, kind: input, shape index: {}]   ;;  %s9669_s5 = inlined_call_operand.vmem [shape: f32[2,1,32], index: 5, kind: input, shape index: {}]   ;;  %s9670_s6 = inlined_call_operand.vmem [shape: f32[2,4,32,24], index: 6, kind: input, shape index: {}]   ;;  %s9671_s7 = inlined_call_operand.vmem [shape: f32[2,4,1,24], index: 7, kind: input, shape index: {}]   ;;  %s9672_s8 = inlined_call_operand.vmem [shape: f32[2,4,8,32], index: 8, kind: input, shape index: {}]   ;;  %s9673_s9 = inlined_call_operand.vmem [shape: f32[2,1,32], index: 9, kind: input, shape index: {}]   ;;  %s9674_s10 = inlined_call_operand.vmem [shape: f32[2,1,32], index: 10, kind: input, shape index: {}]   ;;  %s9675_s11 = inlined_call_operand.vmem [shape: f32[2,1,32], index: 11, kind: input, shape index: {}]   ;;  %s9676_s12 = inlined_call_operand.vmem [shape: f32[2,32,64], index: 12, kind: input, shape index: {}]   ;;  %s9677_s13 = inlined_call_operand.vmem [shape: f32[2,1,64], index: 13, kind: input, shape index: {}]   ;;  %s9678_s14 = inlined_call_operand.vmem [shape: f32[2,64,32], index: 14, kind: input, shape index: {}]   ;;  %s9679_s15 = inlined_call_operand.vmem [shape: f32[2,1,32], index: 15, kind: input, shape index: {}]   ;;  %s9680_s16 = inlined_call_operand.vmem [shape: f32[1,32], index: 16, kind: input, shape index: {}]   ;;  %s9681_s17 = inlined_call_operand.vmem [shape: f32[1,32], index: 17, kind: input, shape index: {}]   ;;  %s9682_s18 = inlined_call_operand.hbm [shape: f32[4,8,32], index: 18, kind: output, shape index: {0}]   ;;  %s9683_s19 = inlined_call_operand.hbm [shape: f32[4,8,8], index: 19, kind: output, shape index: {1}]  }
   0x1   :  { %9692 = sst [smem:[#allocation10_spill]] %s9664_s0 }
   0x2   :  { %9693 = sst [smem:[#allocation11_spill]] %s9665_s1 }
   0x3   :  { %9694 = sst [smem:[#allocation12_spill]] %s9666_s2 }
   0x4   :  { %9695 = sst [smem:[#allocation13_spill]] %s9667_s3 }
   0x5   :  { %9696 = sst [smem:[#allocation14_spill]] %s9668_s4 }
   0x6   :  { %9697 = sst [smem:[#allocation15_spill]] %s9669_s5 }
   0x7   :  { %9698 = sst [smem:[#allocation16_spill]] %s9670_s6 }
   0x8   :  { %9699 = sst [smem:[#allocation17_spill]] %s9671_s7 }
   0x9   :  { %25 = vsyncpa [#allocation3], 0 }
   0xa   :  { %27 = vsyncpa [#allocation3 + $0x1], 0 }
   0xb   :  { %28 = vsyncpa [#allocation5], 0 }
   0xc   :  { %30 = vsyncpa [#allocation5 + $0x1], 0  ;;  %s8430_s0 = smov 0   ;;  %s8432_s30 = smov 0  }
   0xd   :  { %s8434_s20 = smov 0   ;;  %s8436_s21 = smov 0  }
   0xe LB: > { %9700 = sst [smem:[#allocation8_spill]] %s8316_s20  ;;  %s8451_s1 = sadd.s32 4294967295, %s8320_s21   ;;  %s8320_s21 = sphi %s8436_s21, %s9722_s21   ;;  %s8316_s20 = sphi %s8434_s20, %s9719_s20   ;;  %s8312_s30 = sphi %s8432_s30, %s9721_s30   ;;  %s8308_s0 = sphi %s8430_s0, %s9720_s0  }
   0xf   : > { %s7074_s22 = sadd.s32 4294967294, %s8320_s21   ;;  %s8455_s2 = sadd.s32 1, %s8320_s21  }
  0x10   : > { %s431_s23 = sadd.s32 1, %s8316_s20  ;;  %s428_s24 = ssub.s32 %s8320_s21, %s8455_s2 }
  0x11   : > { %p441_p0 = scmp.ne.s32.totalorder %s8316_s20, %s8312_s30  ;;  %p429_p1 = scmp.eq.s32.totalorder %s428_s24, 0 }
  0x12   : > { %p442_p2 = scmp.eq.s32.totalorder %s8451_s1, 1  ;;  %p447_p3 = scmp.ne.s32.totalorder %s8312_s30, %s8308_s0 }
  0x13   : > { %p448_p4 = scmp.eq.s32.totalorder %s7074_s22, 1  ;;  %p7077_p7 = scmp.ge.s32.totalorder %s8320_s21, 1 }
  0x14   : > { %s8466_s25 = scalar_select %p429_p1, %s8316_s20, %s431_s23  }
  0x15   : > { %p8468_p5 = por %p442_p2, %p441_p0  ;;  %p8472_p6 = por %p448_p4, %p447_p3 }
  0x16   : > { %9701 = sst [smem:[#allocation9_spill]] %s8466_s25  ;;  %p558_p8 = scmp.lt.s32.totalorder %s8320_s21, 3 }
  0x18   : > { %p559_p9 = pnand %p7077_p7, %p558_p8 }
  0x19   : > { %s9704_s29 = sld [smem:[#allocation12_spill]] (!%p559_p9)  ;;  %s7080_s22 = sshll.u32 (!%p559_p9), %s8451_s1, 1 }
  0x1a   : > { %562 = sbr.rel (%p559_p9) target bundleno = 5195 (0x144b), region = 92  ;;  %p625_p10 = scmp.lt.s32.totalorder (!%p559_p9), %s7080_s22, 3 }
  0x1b   : > { %s9705_s28 = sld [smem:[#allocation10_spill]] (!%p559_p9)  ;;  %s9713_s24 = smov (!%p559_p9), 112  }
  0x1c   : > { %s9706_s27 = sld [smem:[#allocation11_spill]] (!%p559_p9) }
  0x1d   : > { %s9707_s20 = sld [smem:[#allocation13_spill]] (!%p559_p9) }
  0x1e   : > { %s9708_s6 = sld [smem:[#allocation16_spill]] (!%p559_p9) }
  0x1f   : > { %v662_v0 = vld [vmem:[%s9704_s29] sm:$0x7]  ;;  %vm666_vm0 = vcmask 1042432   ;;  %v8322_v1 = vmov 0.0   ;;  %vm8323_vm1 = vmmov 0   ;;  %s9724_s22 = smov (!%p625_p10, %s7080_s22), 3 }
  0x20   : > { %7498 = vmatprep.subr.mxu0 %v8322_v1  ;;  %7500 = vmatprep.mubr.msk.f32.mxu0 %vm8323_vm1, %v8322_v1  ;;  %s7081_s23 = sshll.u32 %s9724_s22, 3  ;;  %vm642_vm2 = vcmask 23552   ;;  %vm826_vm3 = vcmask 261120   ;;  %s9709_s4 = sld [smem:[#allocation14_spill]]  ;;  %vm1497_vm8 = vcmask 64512   ;;  %vm3653_vm13 = vcmask 523264  }
  0x21   : > { %7499 = vmatpush3.msk.msra.mxu0 %vm666_vm0, %v662_v0  ;;  %7503 = vmatprep.subr.mxu1 %v8322_v1  ;;  %s628_s29 = scalar_lea.vmem %s9705_s28, %s7081_s23  ;;  %s9710_s5 = sld [smem:[#allocation15_spill]] }
  0x22   : > { %7504 = vmatpush3.msk.msra.mxu1 %vm666_vm0, %v662_v0  ;;  %7505 = vmatprep.mubr.msk.f32.mxu1 %vm8323_vm1, %v8322_v1  ;;  %v638_v2 = vld [vmem:[%s628_s29] sm:$0xff]  ;;  %v639_v3 = vld [vmem:[%s628_s29 + $0x8] sm:$0xff]  ;;  %s634_s28 = scalar_lea.vmem %s9706_s27, %s7081_s23  ;;  %s9711_s7 = sld [smem:[#allocation17_spill]] }
  0x23   : > { %7508 = vmatprep.subr.mxu0 %v8322_v1  ;;  %7519 = vmatprep.subr.mxu1 %v8322_v1  ;;  %v643_v4 = vsel %vm642_vm2, %v638_v2, 0.0  ;;  %v650_v5 = vsel %vm642_vm2, %v639_v3, 0.0  ;;  %v640_v22 = vld [vmem:[%s634_s28] sm:$0xff]  ;;  %v641_v23 = vld [vmem:[%s634_s28 + $0x8] sm:$0xff]  ;;  %s9685_s27 = smov 112   ;;  %s9303_s23 = sand.u32 1, %s8312_s30  }
  0x24   : > { %v644_v6 = vrot.slane %v643_v4, 4  ;;  %v651_v7 = vrot.slane %v650_v5, 4  ;;  %v7088_v25 = vld [vmem:[%s9707_s20] ss:$0 sm:$0xff]  ;;  %v8529_v45 = vld [vmem:[%s9708_s6 + $0x18] sm:$0xff]  ;;  %v8539_v47 = vld [vmem:[%s9708_s6 + $0x10] sm:$0xff] }
  0x25   : > { %v8534_v46 = vld [vmem:[%s9708_s6 + $0x38] sm:$0xff]  ;;  %v8546_v48 = vld [vmem:[%s9708_s6 + $0x30] sm:$0xff]  ;;  %v8553_v49 = vld [vmem:[%s9708_s6 + $0x8] sm:$0xff]  ;;  %s9687_s20 = smov 120   ;;  %s9689_s22 = sshll.u32 %s9303_s23, 4 }
  0x26   : > { %v645_v8 = vadd.f32 %v644_v6, %v643_v4  ;;  %v652_v9 = vadd.f32 %v651_v7, %v650_v5  ;;  %v8558_v50 = vld [vmem:[%s9708_s6 + $0x28] sm:$0xff]  ;;  %v8567_v51 = vld [vmem:[%s9708_s6] sm:$0xff] }
  0x27   : > { %v8572_v52 = vld [vmem:[%s9708_s6 + $0x20] sm:$0xff] }
  0x28   : > { %v646_v10 = vrot.slane %v645_v8, 2  ;;  %v653_v11 = vrot.slane %v652_v9, 2  ;;  %v7089_v7 = vld [vmem:[%s9709_s4] ss:$0 sm:$0xff] }
  0x2a   : > { %v647_v12 = vadd.f32 %v646_v10, %v645_v8  ;;  %v654_v13 = vadd.f32 %v653_v11, %v652_v9  ;;  %v7090_v9 = vld [vmem:[%s9710_s5] ss:$0 sm:$0xff] }
  0x2c   : > { %v648_v14 = vrot.slane %v647_v12, 1  ;;  %v655_v15 = vrot.slane %v654_v13, 1 }
  0x2e   : > { %v649_v16 = vadd.f32 %v648_v14, %v647_v12  ;;  %v656_v17 = vadd.f32 %v655_v15, %v654_v13  ;;  %v895_v12 = vld [vmem:[%s9708_s6 + $0x58] sm:$0xff]  ;;  %v894_v14 = vld [vmem:[%s9708_s6 + $0x50] sm:$0xff] }
  0x2f   : > { %v899_v13 = vld [vmem:[%s9708_s6 + $0x78] sm:$0xff]  ;;  %v898_v15 = vld [vmem:[%s9708_s6 + $0x70] sm:$0xff] }
  0x30   : > { %v658_v18 = vmul.f32 0.125, %v649_v16  ;;  %v659_v19 = vmul.f32 0.125, %v656_v17  ;;  %v893_v16 = vld [vmem:[%s9708_s6 + $0x48] sm:$0xff] }
  0x31   : > { %v897_v17 = vld [vmem:[%s9708_s6 + $0x68] sm:$0xff] }
  0x32   : > { %v660_v20 = vsub.f32 %v638_v2, %v658_v18  ;;  %v661_v21 = vsub.f32 %v639_v3, %v659_v19  ;;  %v892_v18 = vld [vmem:[%s9708_s6 + $0x40] sm:$0xff] }
  0x33   : > { %v896_v19 = vld [vmem:[%s9708_s6 + $0x60] sm:$0xff] }
  0x34   : > { %7501 = vmatmul.mubr.msk.f32.vlgmr.msra.gmra.mxu0 %vm642_vm2, %v660_v20  ;;  %7506 = vmatmul.mubr.msk.f32.vlgmr.msra.gmra.mxu1 %vm642_vm2, %v661_v21 }
  0x35   : > { %7516 = vmatprep.mubr.msk.f32.mxu0 %vm8323_vm1, %v8322_v1  ;;  %7527 = vmatprep.mubr.msk.f32.mxu1 %vm8323_vm1, %v8322_v1 }
  0x36   : > { %7509 = vmatpush3.msra.mxu0 %v8529_v45  ;;  %7520 = vmatpush3.msra.mxu1 %v8534_v46 }
  0x37   : > { %7510 = vmatprep.subr.mxu0 %v8322_v1  ;;  %7521 = vmatprep.subr.mxu1 %v8322_v1 }
  0x38   : > { %7511 = vmatpush3.msra.mxu0 %v8539_v47  ;;  %7522 = vmatpush3.msra.mxu1 %v8546_v48 }
  0x39   : > { %7512 = vmatprep.subr.mxu0 %v8322_v1  ;;  %7523 = vmatprep.subr.mxu1 %v8322_v1 }
  0x3a   : > { %7513 = vmatpush3.msra.mxu0 %v8553_v49  ;;  %7524 = vmatpush3.msra.mxu1 %v8558_v50 }
  0x3b   : > { %7514 = vmatprep.subr.mxu0 %v8322_v1  ;;  %7525 = vmatprep.subr.mxu1 %v8322_v1 }
  0x3c   : > { %7515 = vmatpush3.msra.mxu0 %v8567_v51  ;;  %7526 = vmatpush3.msra.mxu1 %v8572_v52 }
  0x3d   : > { %7530 = vmatprep.subr.mxu0 %v8322_v1  ;;  %7541 = vmatprep.subr.mxu1 %v8322_v1 }
  0xf4   : > { %v736_v24 = vpop.f32.mrf.mxu0  ;;  %v809_v26 = vpop.f32.mrf.mxu1 }
  0xf5   : > { %v813_v27 = vadd.f32 %v736_v24, %v640_v22  ;;  %v814_v28 = vadd.f32 %v809_v26, %v641_v23  ;;  %v7091_v24 = vld [vmem:[%s9711_s7] ss:$0 sm:$0xff] }
  0xf6   : > { %v7502_v29 = vpop.f32.mrf.mxu0  ;;  %v7507_v30 = vpop.f32.mrf.mxu1 }
  0xf7   : > { %v8510_v31 = vadd.f32 %v7088_v25, %v813_v27  ;;  %v8512_v32 = vadd.f32 %v7088_v25, %v814_v28  ;;  %v7092_v25 = vld [vmem:[%s9711_s7 + $0x1] ss:$0 sm:$0xff] }
  0xf9   : > { %v827_v33 = vsel %vm826_vm3, %v8510_v31, 0.0  ;;  %v830_v34 = vsel %vm826_vm3, %v8512_v32, 0.0 }
  0xfa   : > { %828 = vadd.xlane.f32.xlu0 %v827_v33 }
  0xfe   : > { %831 = vadd.xlane.f32.xlu0 %v830_v34  ;;  %v7093_v34 = vld [vmem:[%s9711_s7 + $0x2] ss:$0 sm:$0xff] }
 0x183   : > { %v829_v35 = vpop.xlane.xlu0 %828 }
 0x184   : > { %v834_v36 = vmul.f32 0.03125, %v829_v35 }
 0x186   : > { %v836_v37 = vsub.f32 %v8510_v31, %v834_v36 }
 0x187   : > { %v832_v38 = vpop.xlane.xlu0 %831 }
 0x188   : > { %v835_v39 = vmul.f32 0.03125, %v832_v38  ;;  %v838_v40 = vmul.f32 %v836_v37, %v836_v37  ;;  %v7094_v38 = vld [vmem:[%s9711_s7 + $0x3] ss:$0 sm:$0xff] }
 0x18a   : > { %v8520_v41 = vsub.f32 %v8512_v32, %v835_v39  ;;  %v840_v42 = vsel %vm826_vm3, %v838_v40, 0.0 }
 0x18b   : > { %841 = vadd.xlane.f32.xlu1 %v840_v42 }
 0x18c   : > { %v839_v43 = vmul.f32 %v8520_v41, %v8520_v41 }
 0x18e   : > { %v843_v44 = vsel %vm826_vm3, %v839_v43, 0.0 }
 0x18f   : > { %844 = vadd.xlane.f32.xlu1 %v843_v44 }
 0x214   : > { %v842_v53 = vpop.xlane.xlu1 %841 }
 0x215   : > { %v846_v54 = vmul.f32 0.032258064, %v842_v53 }
 0x217   : > { %8094 = vrsqrt.f32 %v846_v54  ;;  %vm850_vm4 = vcmp.eq.f32.partialorder %v846_v54, inf  ;;  %v853_v59 = vand.u32 2147483648, %v846_v54  ;;  %vm852_vm5 = vcmp.eq.f32.partialorder %v846_v54, 0.0 }
 0x218   : > { %v845_v55 = vpop.xlane.xlu1 %844 }
 0x219   : > { %v847_v56 = vmul.f32 0.032258064, %v845_v55 }
 0x21b   : > { %8096 = vrsqrt.f32 %v847_v56  ;;  %vm857_vm6 = vcmp.eq.f32.partialorder %v847_v56, inf  ;;  %v860_v3 = vand.u32 2147483648, %v847_v56  ;;  %vm859_vm7 = vcmp.eq.f32.partialorder %v847_v56, 0.0 }
 0x224   : > { %v8095_v57 = vpop.eup %8094 }
 0x225   : > { %v849_v58 = vmul.f32 %v8095_v57, %v846_v54 }
 0x227   : > { %v851_v60 = vsel %vm850_vm4, %v846_v54, %v849_v58 }
 0x228   : > { %v8097_v61 = vpop.eup %8096  ;;  %v854_v62 = vsel %vm852_vm5, %v853_v59, %v851_v60 }
 0x229   : > { %v862_v63 = vadd.f32 1e-06, %v854_v62  ;;  %v856_v0 = vmul.f32 %v8097_v61, %v847_v56 }
 0x22b   : > { %8098 = vrcp.f32 %v862_v63  ;;  %v858_v2 = vsel %vm857_vm6, %v847_v56, %v856_v0 }
 0x22c   : > { %v861_v4 = vsel %vm859_vm7, %v860_v3, %v858_v2 }
 0x22d   : > { %v863_v5 = vadd.f32 1e-06, %v861_v4 }
 0x22f   : > { %8100 = vrcp.f32 %v863_v5 }
 0x238   : > { %v8099_v6 = vpop.eup %8098 }
 0x239   : > { %v866_v8 = vmul.f32 %v8099_v6, %v836_v37 }
 0x23b   : > { %v874_v10 = vmul.f32 %v7089_v7, %v866_v8 }
 0x23c   : > { %v8101_v20 = vpop.eup %8100 }
 0x23d   : > { %v882_v11 = vadd.f32 %v7090_v9, %v874_v10  ;;  %v867_v21 = vmul.f32 %v8101_v20, %v8520_v41 }
 0x23f   : > { %7517 = vmatmul.mubr.msk.f32.vlgmr.msra.gmra.mxu0 %vm826_vm3, %v882_v11  ;;  %7528 = vmatmul.mubr.msk.f32.vlgmr.msra.gmra.mxu1 %vm826_vm3, %v882_v11  ;;  %v875_v22 = vmul.f32 %v7089_v7, %v867_v21 }
 0x240   : > { %7531 = vmatpush3.msra.mxu0 %v895_v12  ;;  %7542 = vmatpush3.msra.mxu1 %v899_v13 }
 0x241   : > { %7532 = vmatprep.subr.mxu0 %v8322_v1  ;;  %7543 = vmatprep.subr.mxu1 %v8322_v1  ;;  %v883_v23 = vadd.f32 %v7090_v9, %v875_v22 }
 0x242   : > { %7533 = vmatpush3.msra.mxu0 %v894_v14  ;;  %7544 = vmatpush3.msra.mxu1 %v898_v15 }
 0x243   : > { %7534 = vmatprep.subr.mxu0 %v8322_v1  ;;  %7545 = vmatprep.subr.mxu1 %v8322_v1 }
 0x244   : > { %7535 = vmatpush3.msra.mxu0 %v893_v16  ;;  %7546 = vmatpush3.msra.mxu1 %v897_v17 }
 0x245   : > { %7536 = vmatprep.subr.mxu0 %v8322_v1  ;;  %7547 = vmatprep.subr.mxu1 %v8322_v1 }
 0x246   : > { %7537 = vmatpush3.msra.mxu0 %v892_v18  ;;  %7538 = vmatprep.mubr.msk.f32.mxu0 %vm8323_vm1, %v8322_v1 }
 0x247   : > { %7548 = vmatpush3.msra.mxu1 %v896_v19  ;;  %7549 = vmatprep.mubr.msk.f32.mxu1 %vm8323_vm1, %v8322_v1 }
 0x248   : > { %7539 = vmatmul.mubr.msk.f32.vlgmr.msra.gmra.mxu0 %vm826_vm3, %v882_v11  ;;  %7550 = vmatmul.mubr.msk.f32.vlgmr.msra.gmra.mxu1 %vm826_vm3, %v882_v11 }
 0x249   : > { %7552 = vmatprep.subr.mxu0 %v8322_v1  ;;  %7563 = vmatprep.subr.mxu1 %v8322_v1 }
 0x24a   : > { %7553 = vmatpush3.msra.mxu0 %v8529_v45  ;;  %7564 = vmatpush3.msra.mxu1 %v8534_v46 }
 0x24b   : > { %7554 = vmatprep.subr.mxu0 %v8322_v1  ;;  %7565 = vmatprep.subr.mxu1 %v8322_v1 }
 0x24c   : > { %7555 = vmatpush3.msra.mxu0 %v8539_v47  ;;  %7566 = vmatpush3.msra.mxu1 %v8546_v48 }
 0x24d   : > { %7556 = vmatprep.subr.mxu0 %v8322_v1  ;;  %7567 = vmatprep.subr.mxu1 %v8322_v1 }
 0x24e   : > { %7557 = vmatpush3.msra.mxu0 %v8553_v49  ;;  %7568 = vmatpush3.msra.mxu1 %v8558_v50 }
 0x24f   : > { %7558 = vmatprep.subr.mxu0 %v8322_v1  ;;  %7569 = vmatprep.subr.mxu1 %v8322_v1 }
 0x250   : > { %7559 = vmatpush3.msra.mxu0 %v8567_v51  ;;  %7560 = vmatprep.mubr.msk.f32.mxu0 %vm8323_vm1, %v8322_v1 }
 0x251   : > { %7570 = vmatpush3.msra.mxu1 %v8572_v52  ;;  %7571 = vmatprep.mubr.msk.f32.mxu1 %vm8323_vm1, %v8322_v1 }
 0x252   : > { %7561 = vmatmul.mubr.msk.f32.vlgmr.msra.gmra.mxu0 %vm826_vm3, %v883_v23  ;;  %7572 = vmatmul.mubr.msk.f32.vlgmr.msra.gmra.mxu1 %vm826_vm3, %v883_v23 }
 0x253   : > { %7574 = vmatprep.subr.mxu0 %v8322_v1  ;;  %7585 = vmatprep.subr.mxu1 %v8322_v1 }
 0x254   : > { %7575 = vmatpush3.msra.mxu0 %v895_v12  ;;  %7586 = vmatpush3.msra.mxu1 %v899_v13 }
 0x255   : > { %7576 = vmatprep.subr.mxu0 %v8322_v1  ;;  %7587 = vmatprep.subr.mxu1 %v8322_v1 }
 0x256   : > { %7577 = vmatpush3.msra.mxu0 %v894_v14  ;;  %7588 = vmatpush3.msra.mxu1 %v898_v15 }
 0x257   : > { %7578 = vmatprep.subr.mxu0 %v8322_v1  ;;  %7589 = vmatprep.subr.mxu1 %v8322_v1 }
 0x258   : > { %7579 = vmatpush3.msra.mxu0 %v893_v16  ;;  %7590 = vmatpush3.msra.mxu1 %v897_v17 }
 0x259   : > { %7580 = vmatprep.subr.mxu0 %v8322_v1  ;;  %7591 = vmatprep.subr.mxu1 %v8322_v1 }
 0x25a   : > { %7581 = vmatpush3.msra.mxu0 %v892_v18  ;;  %7582 = vmatprep.mubr.msk.f32.mxu0 %vm8323_vm1, %v8322_v1 }
 0x25b   : > { %7592 = vmatpush3.msra.mxu1 %v896_v19  ;;  %7593 = vmatprep.mubr.msk.f32.mxu1 %vm8323_vm1, %v8322_v1 }
 0x25c   : > { %7583 = vmatmul.mubr.msk.f32.vlgmr.msra.gmra.mxu0 %vm826_vm3, %v883_v23  ;;  %7594 = vmatmul.mubr.msk.f32.vlgmr.msra.gmra.mxu1 %vm826_vm3, %v883_v23 }
 0x25d   : > { %7596 = vmatprep.subr.mxu0 %v8322_v1  ;;  %7601 = vmatprep.subr.mxu1 %v8322_v1 }
 0x25e   : > { %7598 = vmatprep.mubr.msk.f32.mxu0 %vm8323_vm1, %v8322_v1  ;;  %7603 = vmatprep.mubr.msk.f32.mxu1 %vm8323_vm1, %v8322_v1 }
 0x2ff   : > { %v997_v26 = vpop.f32.mrf.mxu0  ;;  %v1067_v27 = vpop.f32.mrf.mxu1 }
 0x300   : > { %v8675_v28 = vadd.f32 %v7091_v24, %v997_v26  ;;  %v8677_v29 = vadd.f32 %v7092_v25, %v1067_v27 }
 0x301   : > { %v7518_v30 = vpop.f32.mrf.mxu0  ;;  %v7529_v33 = vpop.f32.mrf.mxu1 }
 0x302   : > { %1573 = vrot.lane.b32.xlu1 %v8677_v29, %s9687_s20  ;;  %1495 = vrot.lane.b32.xlu0 %v8675_v28, %s9687_s20 }
 0x308   : > { %v1137_v35 = vpop.f32.mrf.mxu0  ;;  %v1207_v36 = vpop.f32.mrf.mxu1 }
 0x309   : > { %v8686_v37 = vadd.f32 %v7093_v34, %v1137_v35  ;;  %v8693_v41 = vadd.f32 %v7094_v38, %v1207_v36 }
 0x30a   : > { %v7540_v39 = vpop.f32.mrf.mxu0  ;;  %v7551_v40 = vpop.f32.mrf.mxu1 }
 0x30b   : > { %1650 = vrot.lane.b32.xlu1 %v8686_v37, %s9687_s20 }
 0x30f   : > { %1727 = vrot.lane.b32.xlu1 %v8693_v41, %s9687_s20 }
 0x312   : > { %v1280_v42 = vpop.f32.mrf.mxu0  ;;  %v1350_v43 = vpop.f32.mrf.mxu1 }
 0x313   : > { %v8697_v44 = vadd.f32 %v7091_v24, %v1280_v42  ;;  %v8699_v45 = vadd.f32 %v7092_v25, %v1350_v43 }
 0x314   : > { %v7562_v46 = vpop.f32.mrf.mxu0  ;;  %v7573_v47 = vpop.f32.mrf.mxu1 }
 0x315   : > { %1881 = vrot.lane.b32.xlu1 %v8699_v45, %s9687_s20  ;;  %1804 = vrot.lane.b32.xlu0 %v8697_v44, %s9687_s20 }
 0x31c   : > { %v1420_v48 = vpop.f32.mrf.mxu0  ;;  %v1490_v49 = vpop.f32.mrf.mxu1 }
 0x31d   : > { %v8705_v50 = vadd.f32 %v7093_v34, %v1420_v48  ;;  %v8707_v51 = vadd.f32 %v7094_v38, %v1490_v49 }
 0x31e   : > { %v7584_v52 = vpop.f32.mrf.mxu0  ;;  %v7595_v53 = vpop.f32.mrf.mxu1 }
 0x31f   : > { %2035 = vrot.lane.b32.xlu1 %v8707_v51, %s9687_s20  ;;  %1958 = vrot.lane.b32.xlu0 %v8705_v50, %s9687_s20  ;;  %s9712_s20 = smov 120  }
 0x374   : > { %v1574_v54 = vpop.permute.xlu1 %1573  ;;  %v1496_v55 = vpop.permute.xlu0 %1495 }
 0x375   : > { %7597 = vmatpush3.xpose.msk.msra.mxu0 %vm1497_vm8, %v1496_v55  ;;  %7602 = vmatpush3.xpose.msk.msra.mxu1 %vm1497_vm8, %v1574_v54 }
 0x376   : > { %7606 = vmatprep.subr.mxu0 %v8322_v1  ;;  %7611 = vmatprep.subr.mxu1 %v8322_v1 }
 0x378   : > { %7599 = vmatmul.mubr.msk.f32.vlgmr.msra.gmra.mxu0 %vm1497_vm8, %v8675_v28  ;;  %7604 = vmatmul.mubr.msk.f32.vlgmr.msra.gmra.mxu1 %vm1497_vm8, %v8677_v29 }
 0x379   : > { %7608 = vmatprep.mubr.msk.f32.mxu0 %vm8323_vm1, %v8322_v1  ;;  %7613 = vmatprep.mubr.msk.f32.mxu1 %vm8323_vm1, %v8322_v1 }
 0x37d   : > { %v1651_v56 = vpop.permute.xlu1 %1650 }
 0x37e   : > { %7607 = vmatpush3.xpose.msk.msra.mxu0 %vm1497_vm8, %v1651_v56 }
 0x37f   : > { %7616 = vmatprep.subr.mxu0 %v8322_v1 }
 0x381   : > { %7609 = vmatmul.mubr.msk.f32.vlgmr.msra.gmra.mxu0 %vm1497_vm8, %v8686_v37  ;;  %v1728_v57 = vpop.permute.xlu1 %1727 }
 0x382   : > { %7612 = vmatpush3.xpose.msk.msra.mxu1 %vm1497_vm8, %v1728_v57  ;;  %7618 = vmatprep.mubr.msk.f32.mxu0 %vm8323_vm1, %v8322_v1 }
 0x383   : > { %7621 = vmatprep.subr.mxu1 %v8322_v1 }
 0x385   : > { %7614 = vmatmul.mubr.msk.f32.vlgmr.msra.gmra.mxu1 %vm1497_vm8, %v8693_v41 }
 0x386   : > { %7623 = vmatprep.mubr.msk.f32.mxu1 %vm8323_vm1, %v8322_v1 }
 0x387   : > { %v1882_v58 = vpop.permute.xlu1 %1881  ;;  %v1805_v59 = vpop.permute.xlu0 %1804 }
 0x388   : > { %7617 = vmatpush3.xpose.msk.msra.mxu0 %vm1497_vm8, %v1805_v59  ;;  %7622 = vmatpush3.xpose.msk.msra.mxu1 %vm1497_vm8, %v1882_v58 }
 0x389   : > { %7631 = vmatprep.subr.mxu1 %v8322_v1  ;;  %7626 = vmatprep.subr.mxu0 %v8322_v1 }
 0x38b   : > { %7619 = vmatmul.mubr.msk.f32.vlgmr.msra.gmra.mxu0 %vm1497_vm8, %v8697_v44  ;;  %7624 = vmatmul.mubr.msk.f32.vlgmr.msra.gmra.mxu1 %vm1497_vm8, %v8699_v45 }
 0x38c   : > { %7628 = vmatprep.mubr.msk.f32.mxu0 %vm8323_vm1, %v8322_v1  ;;  %7633 = vmatprep.mubr.msk.f32.mxu1 %vm8323_vm1, %v8322_v1 }
 0x391   : > { %v2036_v60 = vpop.permute.xlu1 %2035  ;;  %v1959_v61 = vpop.permute.xlu0 %1958 }
 0x392   : > { %7627 = vmatpush3.xpose.msk.msra.mxu0 %vm1497_vm8, %v1959_v61  ;;  %7632 = vmatpush3.xpose.msk.msra.mxu1 %vm1497_vm8, %v2036_v60 }
 0x393   : > { %7641 = vmatprep.subr.mxu1 %v8322_v1  ;;  %7636 = vmatprep.subr.mxu0 %v8322_v1 }
 0x395   : > { %7629 = vmatmul.mubr.msk.f32.vlgmr.msra.gmra.mxu0 %vm1497_vm8, %v8705_v50  ;;  %7634 = vmatmul.mubr.msk.f32.vlgmr.msra.gmra.mxu1 %vm1497_vm8, %v8707_v51 }
 0x396   : > { %7638 = vmatprep.mubr.msk.f32.mxu0 %vm8323_vm1, %v8322_v1  ;;  %7643 = vmatprep.mubr.msk.f32.mxu1 %vm8323_vm1, %v8322_v1 }
 0x438   : > { %v1568_v62 = vpop.f32.mrf.mxu0  ;;  %v1645_v63 = vpop.f32.mrf.mxu1 }
 0x439   : > { %v2111_v0 = vmul.f32 0.35355338, %v1568_v62  ;;  %v2112_v2 = vmul.f32 0.35355338, %v1645_v63 }
 0x43a   : > { %v7600_v3 = vpop.f32.mrf.mxu0  ;;  %v7605_v4 = vpop.f32.mrf.mxu1 }
 0x43b   : > { %v2122_v5 = vsel %vm1497_vm8, %v2112_v2, -inf  ;;  %v2119_v6 = vsel %vm1497_vm8, %v2111_v0, -inf }
 0x43c   : > { %2123 = vmax.xlane.f32.xlu1 %v2122_v5  ;;  %2120 = vmax.xlane.f32.xlu0 %v2119_v6 }
 0x441   : > { %v1722_v7 = vpop.f32.mrf.mxu0 }
 0x442   : > { %v2113_v8 = vmul.f32 0.35355338, %v1722_v7 }
 0x443   : > { %v7610_v9 = vpop.f32.mrf.mxu0 }
 0x444   : > { %v2125_v10 = vsel %vm1497_vm8, %v2113_v8, -inf }
 0x445   : > { %v1799_v11 = vpop.f32.mrf.mxu1  ;;  %2126 = vmax.xlane.f32.xlu0 %v2125_v10 }
 0x446   : > { %v8764_v12 = vmul.f32 0.35355338, %v1799_v11 }
 0x447   : > { %v7615_v13 = vpop.f32.mrf.mxu1 }
 0x448   : > { %v2128_v14 = vsel %vm1497_vm8, %v8764_v12, -inf }
 0x449   : > { %2129 = vmax.xlane.f32.xlu0 %v2128_v14 }
 0x44b   : > { %v1953_v15 = vpop.f32.mrf.mxu1  ;;  %v1876_v16 = vpop.f32.mrf.mxu0 }
 0x44c   : > { %v2116_v17 = vmul.f32 0.35355338, %v1953_v15  ;;  %v2115_v18 = vmul.f32 0.35355338, %v1876_v16 }
 0x44d   : > { %v7620_v19 = vpop.f32.mrf.mxu0  ;;  %v7625_v20 = vpop.f32.mrf.mxu1 }
 0x44e   : > { %v2134_v21 = vsel %vm1497_vm8, %v2116_v17, -inf  ;;  %v2131_v22 = vsel %vm1497_vm8, %v2115_v18, -inf }
 0x44f   : > { %2135 = vmax.xlane.f32.xlu1 %v2134_v21  ;;  %2132 = vmax.xlane.f32.xlu0 %v2131_v22 }
 0x455   : > { %v2030_v23 = vpop.f32.mrf.mxu0  ;;  %v2107_v24 = vpop.f32.mrf.mxu1 }
 0x456   : > { %v2117_v25 = vmul.f32 0.35355338, %v2030_v23  ;;  %v2118_v33 = vmul.f32 0.35355338, %v2107_v24 }
 0x457   : > { %v7630_v26 = vpop.f32.mrf.mxu0  ;;  %v7635_v27 = vpop.f32.mrf.mxu1 }
 0x458   : > { %v2137_v30 = vsel %vm1497_vm8, %v2117_v25, -inf  ;;  %v2140_v34 = vsel %vm1497_vm8, %v2118_v33, -inf }
 0x459   : > { %2138 = vmax.xlane.f32.xlu0 %v2137_v30 }
 0x460   : > { %2283 = vrot.lane.b32.xlu1 %v8677_v29, %s9685_s27 }
 0x464   : > { %2359 = vrot.lane.b32.xlu1 %v8686_v37, %s9685_s27 }
 0x46f   : > { %2207 = vrot.lane.b32.xlu0 %v8675_v28, %s9685_s27 }
 0x488   : > { %2141 = vmax.xlane.f32.xlu1 %v2140_v34 }
 0x499   : > { %2435 = vrot.lane.b32.xlu1 %v8693_v41, %s9685_s27 }
 0x4c5   : > { %v2124_v35 = vpop.xlane.xlu1 %2123  ;;  %v2121_v36 = vpop.xlane.xlu0 %2120 }
 0x4c6   : > { %v2144_v38 = vsub.f32 %v2112_v2, %v2124_v35  ;;  %v2143_v39 = vsub.f32 %v2111_v0, %v2121_v36 }
 0x4c8   : > { %v2153_v40 = vmul.f32 1.442695, %v2144_v38  ;;  %v2151_v42 = vmul.f32 1.442695, %v2143_v39 }
 0x4ca   : > { %8102 = vpow2.f32 %v2153_v40 }
 0x4cb   : > { %8104 = vpow2.f32 %v2151_v42 }
 0x4ce   : > { %v2127_v29 = vpop.xlane.xlu0 %2126 }
 0x4cf   : > { %v2145_v37 = vsub.f32 %v2113_v8, %v2127_v29 }
 0x4d1   : > { %v2155_v43 = vmul.f32 1.442695, %v2145_v37 }
 0x4d2   : > { %v2130_v47 = vpop.xlane.xlu0 %2129 }
 0x4d3   : > { %8106 = vpow2.f32 %v2155_v43  ;;  %v2146_v58 = vsub.f32 %v8764_v12, %v2130_v47 }
 0x4d5   : > { %v2157_v59 = vmul.f32 1.442695, %v2146_v58 }
 0x4d7   : > { %v8780_v28 = vpop.eup %8102  ;;  %8108 = vpow2.f32 %v2157_v59 }
 0x4d8   : > { %v8782_v46 = vpop.eup %8104  ;;  %v2136_v48 = vpop.xlane.xlu1 %2135  ;;  %v2170_v41 = vsel %vm1497_vm8, %v8780_v28, 0.0 }
 0x4d9   : > { %2171 = vadd.xlane.f32.xlu1 %v2170_v41  ;;  %v2167_v49 = vsel %vm1497_vm8, %v8782_v46, 0.0  ;;  %v2133_v53 = vpop.xlane.xlu0 %2132  ;;  %v2148_v60 = vsub.f32 %v2116_v17, %v2136_v48  ;;  %v2816_v48 = vld [vmem:[%s9672_s8 + $0x8] sm:$0xff]  ;;  %v2818_v41 = vld [vmem:[%s9672_s8 + $0x18] sm:$0xff] }
 0x4da   : > { %2168 = vadd.xlane.f32.xlu0 %v2167_v49  ;;  %v2147_v62 = vsub.f32 %v2115_v18, %v2133_v53 }
 0x4db   : > { %v2161_v61 = vmul.f32 1.442695, %v2148_v60 }
 0x4dc   : > { %v2284_v52 = vpop.permute.xlu1 %2283  ;;  %v2159_v63 = vmul.f32 1.442695, %v2147_v62 }
 0x4dd   : > { %7642 = vmatpush3.msra.mxu1 %v2284_v52  ;;  %8110 = vpow2.f32 %v2161_v61  ;;  %v2817_v52 = vld [vmem:[%s9672_s8 + $0x10] sm:$0xff] }
 0x4de   : > { %7651 = vmatprep.subr.mxu1 %v8322_v1  ;;  %8112 = vpow2.f32 %v2159_v63 }
 0x4e0   : > { %v8789_v54 = vpop.eup %8106  ;;  %v2360_v4 = vpop.permute.xlu1 %2359 }
 0x4e1   : > { %v2173_v55 = vsel %vm1497_vm8, %v8789_v54, 0.0 }
 0x4e2   : > { %v2139_v56 = vpop.xlane.xlu0 %2138  ;;  %2174 = vadd.xlane.f32.xlu0 %v2173_v55 }
 0x4e3   : > { %v2149_v0 = vsub.f32 %v2117_v25, %v2139_v56 }
 0x4e4   : > { %v8109_v3 = vpop.eup %8108 }
 0x4e5   : > { %v2163_v2 = vmul.f32 1.442695, %v2149_v0 }
 0x4e6   : > { %v2208_v57 = vpop.permute.xlu0 %2207 }
 0x4e7   : > { %7637 = vmatpush3.msra.mxu0 %v2208_v57  ;;  %8114 = vpow2.f32 %v2163_v2 }
 0x4e8   : > { %7646 = vmatprep.subr.mxu0 %v8322_v1 }
 0x4ea   : > { %2587 = vrot.lane.b32.xlu1 %v8699_v45, %s9685_s27  ;;  %v2176_v45 = vsel %vm1497_vm8, %v8109_v3, 0.0  ;;  %v8111_v5 = vpop.eup %8110 }
 0x4eb   : > { %v8113_v8 = vpop.eup %8112 }
 0x4ec   : > { %v2179_v10 = vsel %vm1497_vm8, %v8113_v8, 0.0 }
 0x4f4   : > { %v8802_v11 = vpop.eup %8114 }
 0x4f5   : > { %v2185_v12 = vsel %vm1497_vm8, %v8802_v11, 0.0 }
 0x4f8   : > { %2511 = vrot.lane.b32.xlu0 %v8697_v44, %s9685_s27  ;;  %v2182_v44 = vsel %vm1497_vm8, %v8111_v5, 0.0 }
 0x50e   : > { %2177 = vadd.xlane.f32.xlu1 %v2176_v45 }
 0x511   : > { %v2142_v6 = vpop.xlane.xlu1 %2141 }
 0x512   : > { %v2150_v7 = vsub.f32 %v2118_v33, %v2142_v6  ;;  %2183 = vadd.xlane.f32.xlu1 %v2182_v44 }
 0x514   : > { %v2165_v9 = vmul.f32 1.442695, %v2150_v7 }
 0x515   : > { %v2436_v15 = vpop.permute.xlu1 %2435 }
 0x516   : > { %8116 = vpow2.f32 %v2165_v9 }
 0x517   : > { %2180 = vadd.xlane.f32.xlu0 %v2179_v10 }
 0x51b   : > { %2186 = vadd.xlane.f32.xlu0 %v2185_v12 }
 0x523   : > { %v8806_v13 = vpop.eup %8116 }
 0x524   : > { %v2188_v14 = vsel %vm1497_vm8, %v8806_v13, 0.0 }
 0x525   : > { %2189 = vadd.xlane.f32.xlu1 %v2188_v14 }
 0x531   : > { %2663 = vrot.lane.b32.xlu0 %v8705_v50, %s9685_s27 }
 0x536   : > { %2739 = vrot.lane.b32.xlu1 %v8707_v51, %s9685_s27 }
 0x562   : > { %v2172_v16 = vpop.xlane.xlu1 %2171 }
 0x563   : > { %8118 = vrcp.f32 %v2172_v16  ;;  %v2169_v17 = vpop.xlane.xlu0 %2168  ;;  %v7135_v16 = vld [vmem:[%s9673_s9] ss:$0 sm:$0xff] }
 0x564   : > { %8120 = vrcp.f32 %v2169_v17 }
 0x566   : > { %v2588_v24 = vpop.permute.xlu1 %2587 }
 0x56b   : > { %v2175_v18 = vpop.xlane.xlu0 %2174 }
 0x56c   : > { %8122 = vrcp.f32 %v2175_v18 }
 0x56f   : > { %v2512_v23 = vpop.permute.xlu0 %2511 }
 0x570   : > { %v8119_v19 = vpop.eup %8118 }
 0x571   : > { %v8121_v20 = vpop.eup %8120  ;;  %v2200_v21 = vmul.f32 %v8119_v19, %v8780_v28  ;;  %v2815_v28 = vld [vmem:[%s9672_s8] sm:$0xff] }
 0x572   : > { %v2199_v22 = vmul.f32 %v8121_v20, %v8782_v46 }
 0x573   : > { %7644 = vmatmul.mubr.msk.f32.vlgmr.msra.gmra.mxu1 %vm1497_vm8, %v2200_v21 }
 0x574   : > { %7639 = vmatmul.mubr.msk.f32.vlgmr.msra.gmra.mxu0 %vm1497_vm8, %v2199_v22  ;;  %7652 = vmatpush3.msra.mxu1 %v2436_v15 }
 0x575   : > { %7647 = vmatpush3.msra.mxu0 %v2360_v4  ;;  %7648 = vmatprep.mubr.msk.f32.mxu0 %vm8323_vm1, %v8322_v1 }
 0x576   : > { %7656 = vmatprep.subr.mxu0 %v8322_v1  ;;  %7653 = vmatprep.mubr.msk.f32.mxu1 %vm8323_vm1, %v8322_v1 }
 0x577   : > { %7661 = vmatprep.subr.mxu1 %v8322_v1 }
 0x579   : > { %v8123_v50 = vpop.eup %8122 }
 0x57a   : > { %v2201_v51 = vmul.f32 %v8123_v50, %v8789_v54 }
 0x57c   : > { %7649 = vmatmul.mubr.msk.f32.vlgmr.msra.gmra.mxu0 %vm1497_vm8, %v2201_v51 }
 0x57d   : > { %7657 = vmatpush3.msra.mxu0 %v2512_v23  ;;  %7658 = vmatprep.mubr.msk.f32.mxu0 %vm8323_vm1, %v8322_v1 }
 0x57e   : > { %7666 = vmatprep.subr.mxu0 %v8322_v1 }
 0x597   : > { %v2178_v25 = vpop.xlane.xlu1 %2177 }
 0x598   : > { %8124 = vrcp.f32 %v2178_v25 }
 0x59b   : > { %v2184_v26 = vpop.xlane.xlu1 %2183 }
 0x59c   : > { %8126 = vrcp.f32 %v2184_v26 }
 0x5a0   : > { %v2181_v27 = vpop.xlane.xlu0 %2180 }
 0x5a1   : > { %8128 = vrcp.f32 %v2181_v27 }
 0x5a4   : > { %v2187_v30 = vpop.xlane.xlu0 %2186 }
 0x5a5   : > { %v8125_v33 = vpop.eup %8124  ;;  %8130 = vrcp.f32 %v2187_v30 }
 0x5a6   : > { %v2202_v34 = vmul.f32 %v8125_v33, %v8109_v3 }
 0x5a8   : > { %7654 = vmatmul.mubr.msk.f32.vlgmr.msra.gmra.mxu1 %vm1497_vm8, %v2202_v34  ;;  %v2664_v42 = vpop.permute.xlu0 %2663 }
 0x5a9   : > { %v8127_v35 = vpop.eup %8126  ;;  %7662 = vmatpush3.msra.mxu1 %v2588_v24  ;;  %7663 = vmatprep.mubr.msk.f32.mxu1 %vm8323_vm1, %v8322_v1 }
 0x5aa   : > { %v2204_v36 = vmul.f32 %v8127_v35, %v8111_v5  ;;  %7671 = vmatprep.subr.mxu1 %v8322_v1 }
 0x5ac   : > { %7664 = vmatmul.mubr.msk.f32.vlgmr.msra.gmra.mxu1 %vm1497_vm8, %v2204_v36 }
 0x5ad   : > { %7673 = vmatprep.mubr.msk.f32.mxu1 %vm8323_vm1, %v8322_v1 }
 0x5ae   : > { %v8129_v38 = vpop.eup %8128  ;;  %v2190_v39 = vpop.xlane.xlu1 %2189 }
 0x5af   : > { %8132 = vrcp.f32 %v2190_v39  ;;  %v2203_v40 = vmul.f32 %v8129_v38, %v8113_v8 }
 0x5b1   : > { %7659 = vmatmul.mubr.msk.f32.vlgmr.msra.gmra.mxu0 %vm1497_vm8, %v2203_v40 }
 0x5b2   : > { %v8131_v29 = vpop.eup %8130  ;;  %v2740_v37 = vpop.permute.xlu1 %2739  ;;  %7667 = vmatpush3.msra.mxu0 %v2664_v42  ;;  %7668 = vmatprep.mubr.msk.f32.mxu0 %vm8323_vm1, %v8322_v1 }
 0x5b3   : > { %7672 = vmatpush3.msra.mxu1 %v2740_v37  ;;  %v2205_v43 = vmul.f32 %v8131_v29, %v8802_v11  ;;  %7676 = vmatprep.subr.mxu0 %v8322_v1 }
 0x5b4   : > { %7681 = vmatprep.subr.mxu1 %v8322_v1 }
 0x5b5   : > { %7669 = vmatmul.mubr.msk.f32.vlgmr.msra.gmra.mxu0 %vm1497_vm8, %v2205_v43 }
 0x5b6   : > { %7677 = vmatpush3.msra.mxu0 %v2815_v28  ;;  %7678 = vmatprep.mubr.msk.f32.mxu0 %vm8323_vm1, %v8322_v1 }
 0x5b7   : > { %7686 = vmatprep.subr.mxu0 %v8322_v1 }
 0x5bc   : > { %v8133_v46 = vpop.eup %8132 }
 0x5bd   : > { %v2206_v47 = vmul.f32 %v8133_v46, %v8806_v13 }
 0x5bf   : > { %7674 = vmatmul.mubr.msk.f32.vlgmr.msra.gmra.mxu1 %vm1497_vm8, %v2206_v47 }
 0x5c0   : > { %7682 = vmatpush3.msra.mxu1 %v2816_v48  ;;  %7683 = vmatprep.mubr.msk.f32.mxu1 %vm8323_vm1, %v8322_v1 }
 0x5c1   : > { %7691 = vmatprep.subr.mxu1 %v8322_v1 }
 0x633   : > { %v2355_v49 = vpop.f32.mrf.mxu1 }
 0x634   : > { %v2279_v53 = vpop.f32.mrf.mxu0  ;;  %7684 = vmatmul.mubr.msk.f32.vlgmr.msra.gmra.mxu1 %vm1497_vm8, %v2355_v49 }
 0x635   : > { %7679 = vmatmul.mubr.msk.f32.vlgmr.msra.gmra.mxu0 %vm1497_vm8, %v2279_v53  ;;  %v7645_v54 = vpop.f32.mrf.mxu1  ;;  %7692 = vmatpush3.msra.mxu1 %v2818_v41  ;;  %v3488_v53 = vld [vmem:[%s9676_s12 + $0x10] sm:$0xff] }
 0x636   : > { %v7640_v55 = vpop.f32.mrf.mxu0  ;;  %7687 = vmatpush3.msra.mxu0 %v2817_v52  ;;  %7688 = vmatprep.mubr.msk.f32.mxu0 %vm8323_vm1, %v8322_v1  ;;  %v3487_v54 = vld [vmem:[%s9676_s12 + $0x8] sm:$0xff] }
 0x637   : > { %7693 = vmatprep.mubr.msk.f32.mxu1 %vm8323_vm1, %v8322_v1  ;;  %7701 = vmatprep.subr.mxu1 %v8322_v1  ;;  %v3486_v55 = vld [vmem:[%s9676_s12] sm:$0xff] }
 0x638   : > { %7696 = vmatprep.subr.mxu0 %v8322_v1 }
 0x63c   : > { %v2431_v56 = vpop.f32.mrf.mxu0 }
 0x63d   : > { %7689 = vmatmul.mubr.msk.f32.vlgmr.msra.gmra.mxu0 %vm1497_vm8, %v2431_v56 }
 0x63e   : > { %v7650_v57 = vpop.f32.mrf.mxu0  ;;  %7697 = vmatpush3.msra.mxu0 %v2815_v28  ;;  %7698 = vmatprep.mubr.msk.f32.mxu0 %vm8323_vm1, %v8322_v1 }
 0x63f   : > { %7706 = vmatprep.subr.mxu0 %v8322_v1 }
 0x668   : > { %v2507_v58 = vpop.f32.mrf.mxu1 }
 0x669   : > { %7694 = vmatmul.mubr.msk.f32.vlgmr.msra.gmra.mxu1 %vm1497_vm8, %v2507_v58 }
 0x66a   : > { %v7655_v59 = vpop.f32.mrf.mxu1  ;;  %7702 = vmatpush3.msra.mxu1 %v2816_v48  ;;  %7703 = vmatprep.mubr.msk.f32.mxu1 %vm8323_vm1, %v8322_v1 }
 0x66b   : > { %7711 = vmatprep.subr.mxu1 %v8322_v1 }
 0x66c   : > { %v2659_v60 = vpop.f32.mrf.mxu1 }
 0x66d   : > { %7704 = vmatmul.mubr.msk.f32.vlgmr.msra.gmra.mxu1 %vm1497_vm8, %v2659_v60 }
 0x66e   : > { %v7665_v61 = vpop.f32.mrf.mxu1  ;;  %7712 = vmatpush3.msra.mxu1 %v2818_v41  ;;  %7713 = vmatprep.mubr.msk.f32.mxu1 %vm8323_vm1, %v8322_v1 }
 0x66f   : > { %7727 = vmatprep.subr.mxu1 %v8322_v1 }
 0x671   : > { %v2583_v62 = vpop.f32.mrf.mxu0 }
 0x672   : > { %7699 = vmatmul.mubr.msk.f32.vlgmr.msra.gmra.mxu0 %vm1497_vm8, %v2583_v62 }
 0x673   : > { %v7660_v63 = vpop.f32.mrf.mxu0  ;;  %7707 = vmatpush3.msra.mxu0 %v2817_v52  ;;  %7708 = vmatprep.mubr.msk.f32.mxu0 %vm8323_vm1, %v8322_v1  ;;  %v3489_v52 = vld [vmem:[%s9676_s12 + $0x18] sm:$0xff] }
 0x674   : > { %7716 = vmatprep.subr.mxu0 %v8322_v1 }
 0x675   : > { %v2735_v0 = vpop.f32.mrf.mxu0 }
 0x676   : > { %7709 = vmatmul.mubr.msk.f32.vlgmr.msra.gmra.mxu0 %vm1497_vm8, %v2735_v0 }
 0x677   : > { %v7670_v2 = vpop.f32.mrf.mxu0  ;;  %7724 = vmatprep.mubr.msk.f32.mxu0 %vm8323_vm1, %v8322_v1  ;;  %7717 = vmatpush3.msra.mxu0 %v3489_v52 }
 0x678   : > { %7718 = vmatprep.subr.mxu0 %v8322_v1 }
 0x679   : > { %7719 = vmatpush3.msra.mxu0 %v3488_v53 }
 0x67a   : > { %7720 = vmatprep.subr.mxu0 %v8322_v1 }
 0x67b   : > { %7721 = vmatpush3.msra.mxu0 %v3487_v54 }
 0x67c   : > { %7722 = vmatprep.subr.mxu0 %v8322_v1 }
 0x67d   : > { %7723 = vmatpush3.msra.mxu0 %v3486_v55 }
 0x67e   : > { %7738 = vmatprep.subr.mxu0 %v8322_v1 }
 0x67f   : > { %v2811_v3 = vpop.f32.mrf.mxu1 }
 0x680   : > { %7714 = vmatmul.mubr.msk.f32.vlgmr.msra.gmra.mxu1 %vm1497_vm8, %v2811_v3 }
 0x681   : > { %v7675_v4 = vpop.f32.mrf.mxu1  ;;  %7735 = vmatprep.mubr.msk.f32.mxu1 %vm8323_vm1, %v8322_v1  ;;  %7728 = vmatpush3.msra.mxu1 %v3489_v52 }
 0x682   : > { %7729 = vmatprep.subr.mxu1 %v8322_v1  ;;  %v7136_v4 = vld [vmem:[%s9674_s10] ss:$0 sm:$0xff] }
 0x683   : > { %7730 = vmatpush3.msra.mxu1 %v3488_v53 }
 0x684   : > { %7731 = vmatprep.subr.mxu1 %v8322_v1 }
 0x685   : > { %7732 = vmatpush3.msra.mxu1 %v3487_v54 }
 0x686   : > { %7733 = vmatprep.subr.mxu1 %v8322_v1 }
 0x687   : > { %7734 = vmatpush3.msra.mxu1 %v3486_v55 }
 0x688   : > { %7757 = vmatprep.subr.mxu1 %v8322_v1 }
 0x6f4   : > { %v2961_v45 = vpop.f32.mrf.mxu1 }
 0x6f5   : > { %v2888_v5 = vpop.f32.mrf.mxu0  ;;  %v3404_v10 = vsel %vm826_vm3, %v2961_v45, 0.0 }
 0x6f6   : > { %v7685_v6 = vpop.f32.mrf.mxu1  ;;  %v3403_v9 = vsel %vm826_vm3, %v2888_v5, 0.0  ;;  %v7137_v5 = vld [vmem:[%s9675_s11] ss:$0 sm:$0xff] }
 0x6f7   : > { %v7680_v44 = vpop.f32.mrf.mxu0  ;;  %v3405_v12 = vadd.f32 %v3404_v10, %v3403_v9  ;;  %v3497_v10 = vld [vmem:[%s9678_s14 + $0x38] sm:$0xff] }
 0x6fd   : > { %v3034_v7 = vpop.f32.mrf.mxu0 }
 0x6fe   : > { %v3406_v11 = vsel %vm826_vm3, %v3034_v7, 0.0 }
 0x6ff   : > { %v7690_v8 = vpop.f32.mrf.mxu0  ;;  %v3407_v13 = vadd.f32 %v3406_v11, %v3405_v12 }
 0x729   : > { %v3107_v14 = vpop.f32.mrf.mxu1 }
 0x72a   : > { %v3408_v15 = vsel %vm826_vm3, %v3107_v14, 0.0 }
 0x72b   : > { %v3409_v17 = vadd.f32 %v3408_v15, %v3407_v13  ;;  %v7695_v18 = vpop.f32.mrf.mxu1  ;;  %v3496_v13 = vld [vmem:[%s9678_s14 + $0x30] sm:$0xff]  ;;  %v3495_v15 = vld [vmem:[%s9678_s14 + $0x28] sm:$0xff] }
 0x72d   : > { %v3424_v19 = vadd.f32 %v7135_v16, %v3409_v17  ;;  %v3253_v20 = vpop.f32.mrf.mxu1  ;;  %v3493_v17 = vld [vmem:[%s9678_s14 + $0x18] sm:$0xff] }
 0x72e   : > { %v3411_v27 = vsel %vm826_vm3, %v3253_v20, 0.0 }
 0x72f   : > { %v7705_v21 = vpop.f32.mrf.mxu1  ;;  %v8901_v22 = vadd.f32 %v3424_v19, %v8510_v31 }
 0x731   : > { %v3430_v50 = vsel %vm826_vm3, %v8901_v22, 0.0 }
 0x732   : > { %v3180_v51 = vpop.f32.mrf.mxu0  ;;  %3431 = vadd.xlane.f32.xlu0 %v3430_v50  ;;  %v3492_v50 = vld [vmem:[%s9678_s14 + $0x10] sm:$0xff] }
 0x733   : > { %v3410_v26 = vsel %vm826_vm3, %v3180_v51, 0.0  ;;  %v3491_v51 = vld [vmem:[%s9678_s14 + $0x8] sm:$0xff] }
 0x734   : > { %v7700_v23 = vpop.f32.mrf.mxu0  ;;  %v3412_v33 = vadd.f32 %v3411_v27, %v3410_v26 }
 0x735   : > { %v3490_v23 = vld [vmem:[%s9678_s14] sm:$0xff] }
 0x736   : > { %v3326_v24 = vpop.f32.mrf.mxu0 }
 0x737   : > { %v3413_v30 = vsel %vm826_vm3, %v3326_v24, 0.0  ;;  %v7138_v24 = vld [vmem:[%s9677_s13] ss:$0 sm:$0xff] }
 0x738   : > { %v7710_v25 = vpop.f32.mrf.mxu0  ;;  %v3414_v34 = vadd.f32 %v3413_v30, %v3412_v33 }
 0x740   : > { %v3399_v35 = vpop.f32.mrf.mxu1 }
 0x741   : > { %v3415_v31 = vsel %vm826_vm3, %v3399_v35, 0.0 }
 0x742   : > { %v3416_v36 = vadd.f32 %v3415_v31, %v3414_v34  ;;  %v7715_v38 = vpop.f32.mrf.mxu1 }
 0x743   : > { %v7143_v38 = vld [vmem:[%s9679_s15] ss:$0 sm:$0xff] }
 0x744   : > { %v3425_v39 = vadd.f32 %v7135_v16, %v3416_v36  ;;  %v3494_v16 = vld [vmem:[%s9678_s14 + $0x20] sm:$0xff] }
 0x746   : > { %v8910_v40 = vadd.f32 %v3425_v39, %v8512_v32 }
 0x748   : > { %v3433_v42 = vsel %vm826_vm3, %v8910_v40, 0.0 }
 0x749   : > { %3434 = vadd.xlane.f32.xlu1 %v3433_v42 }
 0x7bb   : > { %v3432_v29 = vpop.xlane.xlu0 %3431 }
 0x7bc   : > { %v3436_v37 = vmul.f32 0.03125, %v3432_v29 }
 0x7be   : > { %v3438_v43 = vsub.f32 %v8901_v22, %v3436_v37 }
 0x7c0   : > { %v3440_v28 = vmul.f32 %v3438_v43, %v3438_v43 }
 0x7c2   : > { %v3442_v46 = vsel %vm826_vm3, %v3440_v28, 0.0 }
 0x7c3   : > { %3443 = vadd.xlane.f32.xlu0 %v3442_v46 }
 0x7d2   : > { %v3435_v47 = vpop.xlane.xlu1 %3434 }
 0x7d3   : > { %v3437_v48 = vmul.f32 0.03125, %v3435_v47 }
 0x7d5   : > { %v8917_v41 = vsub.f32 %v8910_v40, %v3437_v48 }
 0x7d7   : > { %v3441_v32 = vmul.f32 %v8917_v41, %v8917_v41 }
 0x7d9   : > { %v3445_v49 = vsel %vm826_vm3, %v3441_v32, 0.0 }
 0x7da   : > { %3446 = vadd.xlane.f32.xlu0 %v3445_v49 }
 0x84c   : > { %v3444_v56 = vpop.xlane.xlu0 %3443 }
 0x84d   : > { %v3448_v57 = vmul.f32 0.032258064, %v3444_v56 }
 0x84f   : > { %8134 = vrsqrt.f32 %v3448_v57  ;;  %vm3452_vm9 = vcmp.eq.f32.partialorder %v3448_v57, inf  ;;  %v3455_v60 = vand.u32 2147483648, %v3448_v57  ;;  %vm3454_vm10 = vcmp.eq.f32.partialorder %v3448_v57, 0.0 }
 0x85c   : > { %v8135_v58 = vpop.eup %8134 }
 0x85d   : > { %v3451_v59 = vmul.f32 %v8135_v58, %v3448_v57  ;;  %v9033_v58 = vld [vmem:[%s9708_s6 + $0xb8] sm:$0xff] }
 0x85f   : > { %v3453_v61 = vsel %vm3452_vm9, %v3448_v57, %v3451_v59  ;;  %v9028_v57 = vld [vmem:[%s9708_s6 + $0x98] sm:$0xff]  ;;  %v9042_v59 = vld [vmem:[%s9708_s6 + $0x90] sm:$0xff] }
 0x860   : > { %v3456_v62 = vsel %vm3454_vm10, %v3455_v60, %v3453_v61  ;;  %v9047_v60 = vld [vmem:[%s9708_s6 + $0xb0] sm:$0xff]  ;;  %v9056_v61 = vld [vmem:[%s9708_s6 + $0x88] sm:$0xff] }
 0x861   : > { %v3464_v63 = vadd.f32 1e-06, %v3456_v62  ;;  %v9061_v62 = vld [vmem:[%s9708_s6 + $0xa8] sm:$0xff] }
 0x863   : > { %8136 = vrcp.f32 %v3464_v63  ;;  %v3447_v0 = vpop.xlane.xlu0 %3446  ;;  %v9070_v63 = vld [vmem:[%s9708_s6 + $0x80] sm:$0xff] }
 0x864   : > { %v3449_v2 = vmul.f32 0.032258064, %v3447_v0  ;;  %v9075_v0 = vld [vmem:[%s9708_s6 + $0xa0] sm:$0xff] }
 0x866   : > { %8138 = vrsqrt.f32 %v3449_v2  ;;  %vm3459_vm11 = vcmp.eq.f32.partialorder %v3449_v2, inf  ;;  %v3462_v8 = vand.u32 2147483648, %v3449_v2  ;;  %vm3461_vm12 = vcmp.eq.f32.partialorder %v3449_v2, 0.0 }
 0x870   : > { %v8137_v3 = vpop.eup %8136 }
 0x871   : > { %v3468_v45 = vmul.f32 %v8137_v3, %v3438_v43 }
 0x873   : > { %v8139_v6 = vpop.eup %8138  ;;  %v3476_v44 = vmul.f32 %v7136_v4, %v3468_v45 }
 0x874   : > { %v3458_v7 = vmul.f32 %v8139_v6, %v3449_v2 }
 0x875   : > { %v3484_v9 = vadd.f32 %v7137_v5, %v3476_v44 }
 0x876   : > { %v3460_v11 = vsel %vm3459_vm11, %v3449_v2, %v3458_v7 }
 0x877   : > { %v3463_v12 = vsel %vm3461_vm12, %v3462_v8, %v3460_v11  ;;  %7725 = vmatmul.mubr.msk.f32.vlgmr.msra.gmra.mxu0 %vm826_vm3, %v3484_v9  ;;  %v9084_v11 = vld [vmem:[%s9709_s4 + $0x1] ss:$0 sm:$0xff] }
 0x878   : > { %v3465_v14 = vadd.f32 1e-06, %v3463_v12  ;;  %7739 = vmatpush3.msra.mxu0 %v3497_v10  ;;  %7754 = vmatprep.mubr.msk.f32.mxu0 %vm8323_vm1, %v8322_v1 }
 0x879   : > { %7740 = vmatprep.subr.mxu0 %v8322_v1 }
 0x87a   : > { %8140 = vrcp.f32 %v3465_v14  ;;  %7741 = vmatpush3.msra.mxu0 %v3496_v13 }
 0x87b   : > { %7742 = vmatprep.subr.mxu0 %v8322_v1 }
 0x87c   : > { %7743 = vmatpush3.msra.mxu0 %v3495_v15 }
 0x87d   : > { %7744 = vmatprep.subr.mxu0 %v8322_v1 }
 0x87e   : > { %7745 = vmatpush3.msra.mxu0 %v3494_v16 }
 0x87f   : > { %7746 = vmatprep.subr.mxu0 %v8322_v1 }
 0x880   : > { %7747 = vmatpush3.msra.mxu0 %v3493_v17 }
 0x881   : > { %7748 = vmatprep.subr.mxu0 %v8322_v1 }
 0x882   : > { %7749 = vmatpush3.msra.mxu0 %v3492_v50 }
 0x883   : > { %7750 = vmatprep.subr.mxu0 %v8322_v1 }
 0x884   : > { %7751 = vmatpush3.msra.mxu0 %v3491_v51 }
 0x885   : > { %7752 = vmatprep.subr.mxu0 %v8322_v1 }
 0x886   : > { %7753 = vmatpush3.msra.mxu0 %v3490_v23 }
 0x887   : > { %v8141_v18 = vpop.eup %8140  ;;  %7776 = vmatprep.subr.mxu0 %v8322_v1 }
 0x888   : > { %v3469_v19 = vmul.f32 %v8141_v18, %v8917_v41 }
 0x88a   : > { %v3477_v20 = vmul.f32 %v7136_v4, %v3469_v19  ;;  %v7159_v19 = vld [vmem:[%s9708_s6 + $0xd8] sm:$0xff] }
 0x88c   : > { %v3485_v21 = vadd.f32 %v7137_v5, %v3477_v20  ;;  %v7163_v20 = vld [vmem:[%s9708_s6 + $0xf8] sm:$0xff] }
 0x88e   : > { %7736 = vmatmul.mubr.msk.f32.vlgmr.msra.gmra.mxu1 %vm826_vm3, %v3485_v21 }
 0x88f   : > { %7758 = vmatpush3.msra.mxu1 %v3497_v10  ;;  %7773 = vmatprep.mubr.msk.f32.mxu1 %vm8323_vm1, %v8322_v1 }
 0x890   : > { %7759 = vmatprep.subr.mxu1 %v8322_v1 }
 0x891   : > { %7760 = vmatpush3.msra.mxu1 %v3496_v13  ;;  %v9089_v13 = vld [vmem:[%s9710_s5 + $0x1] ss:$0 sm:$0xff]  ;;  %s8326_s5 = smov [#allocation4]  }
 0x892   : > { %7761 = vmatprep.subr.mxu1 %v8322_v1 }
 0x893   : > { %7762 = vmatpush3.msra.mxu1 %v3495_v15 }
 0x894   : > { %7763 = vmatprep.subr.mxu1 %v8322_v1 }
 0x895   : > { %7764 = vmatpush3.msra.mxu1 %v3494_v16 }
 0x896   : > { %7765 = vmatprep.subr.mxu1 %v8322_v1 }
 0x897   : > { %7766 = vmatpush3.msra.mxu1 %v3493_v17 }
 0x898   : > { %7767 = vmatprep.subr.mxu1 %v8322_v1 }
 0x899   : > { %7768 = vmatpush3.msra.mxu1 %v3492_v50 }
 0x89a   : > { %7769 = vmatprep.subr.mxu1 %v8322_v1 }
 0x89b   : > { %7770 = vmatpush3.msra.mxu1 %v3491_v51  ;;  %v7158_v51 = vld [vmem:[%s9708_s6 + $0xd0] sm:$0xff] }
 0x89c   : > { %7771 = vmatprep.subr.mxu1 %v8322_v1 }
 0x89d   : > { %7772 = vmatpush3.msra.mxu1 %v3490_v23  ;;  %v7162_v23 = vld [vmem:[%s9708_s6 + $0xf0] sm:$0xff] }
 0x89e   : > { %7787 = vmatprep.subr.mxu1 %v8322_v1 }
 0x937   : > { %v3574_v25 = vpop.f32.mrf.mxu0 }
 0x938   : > { %v3575_v26 = vadd.f32 %v7138_v24, %v3574_v25  ;;  %v7157_v25 = vld [vmem:[%s9708_s6 + $0xc8] sm:$0xff] }
 0x939   : > { %v7726_v27 = vpop.f32.mrf.mxu0 }
 0x93a   : > { %v3651_v30 = vmax.f32 %v3575_v26, 0.0  ;;  %v7161_v26 = vld [vmem:[%s9708_s6 + $0xe8] sm:$0xff]  ;;  %v7156_v27 = vld [vmem:[%s9708_s6 + $0xc0] sm:$0xff] }
 0x93c   : > { %7755 = vmatmul.mubr.msk.f32.vlgmr.msra.gmra.mxu0 %vm3653_vm13, %v3651_v30  ;;  %v7160_v30 = vld [vmem:[%s9708_s6 + $0xe0] sm:$0xff]  ;;  %s8234_s6 = sshll.u32 %s8326_s5, 4  ;;  %s8235_s6 = int_to_ptr.vmem [resolvable:$false] %s8234_s6 }
 0x93d   : > { %7784 = vmatprep.mubr.msk.f32.mxu0 %vm8323_vm1, %v8322_v1  ;;  %7777 = vmatpush3.msra.mxu0 %v9028_v57 }
 0x93e   : > { %7778 = vmatprep.subr.mxu0 %v8322_v1 }
 0x93f   : > { %7779 = vmatpush3.msra.mxu0 %v9042_v59 }
 0x940   : > { %7780 = vmatprep.subr.mxu0 %v8322_v1 }
 0x941   : > { %7781 = vmatpush3.msra.mxu0 %v9056_v61 }
 0x942   : > { %7782 = vmatprep.subr.mxu0 %v8322_v1 }
 0x943   : > { %7783 = vmatpush3.msra.mxu0 %v9070_v63 }
 0x944   : > { %7798 = vmatprep.subr.mxu0 %v8322_v1 }
 0x94e   : > { %v3647_v33 = vpop.f32.mrf.mxu1 }
 0x94f   : > { %v3648_v34 = vadd.f32 %v7138_v24, %v3647_v33 }
 0x950   : > { %v7737_v35 = vpop.f32.mrf.mxu1 }
 0x951   : > { %v3652_v31 = vmax.f32 %v3648_v34, 0.0 }
 0x953   : > { %7774 = vmatmul.mubr.msk.f32.vlgmr.msra.gmra.mxu1 %vm3653_vm13, %v3652_v31 }
 0x954   : > { %7795 = vmatprep.mubr.msk.f32.mxu1 %vm8323_vm1, %v8322_v1  ;;  %7788 = vmatpush3.msra.mxu1 %v9033_v58 }
 0x955   : > { %7789 = vmatprep.subr.mxu1 %v8322_v1 }
 0x956   : > { %7790 = vmatpush3.msra.mxu1 %v9047_v60 }
 0x957   : > { %7791 = vmatprep.subr.mxu1 %v8322_v1 }
 0x958   : > { %7792 = vmatpush3.msra.mxu1 %v9061_v62 }
 0x959   : > { %7793 = vmatprep.subr.mxu1 %v8322_v1 }
 0x95a   : > { %7794 = vmatpush3.msra.mxu1 %v9075_v0 }
 0x95b   : > { %7809 = vmatprep.subr.mxu1 %v8322_v1 }
 0x9fc   : > { %v3723_v36 = vpop.f32.mrf.mxu0 }
 0x9fd   : > { %v3800_v39 = vadd.f32 %v3723_v36, %v8901_v22  ;;  %v7168_v36 = vld [vmem:[%s9711_s7 + $0x4] ss:$0 sm:$0xff] }
 0x9fe   : > { %v7756_v42 = vpop.f32.mrf.mxu0 }
 0x9ff   : > { %v9008_v29 = vadd.f32 %v7143_v38, %v3800_v39 }
 0xa01   : > { %v3815_v37 = vsel %vm826_vm3, %v9008_v29, 0.0 }
 0xa02   : > { %3816 = vadd.xlane.f32.xlu0 %v3815_v37 }
 0xa13   : > { %v3796_v43 = vpop.f32.mrf.mxu1 }
 0xa14   : > { %v3801_v28 = vadd.f32 %v3796_v43, %v8910_v40 }
 0xa15   : > { %v7775_v46 = vpop.f32.mrf.mxu1 }
 0xa16   : > { %v9013_v47 = vadd.f32 %v7143_v38, %v3801_v28  ;;  %v7169_v38 = vld [vmem:[%s9711_s7 + $0x5] ss:$0 sm:$0xff] }
 0xa18   : > { %v3818_v48 = vsel %vm826_vm3, %v9013_v47, 0.0 }
 0xa19   : > { %3819 = vadd.xlane.f32.xlu1 %v3818_v48  ;;  %v7170_v48 = vld [vmem:[%s9711_s7 + $0x6] ss:$0 sm:$0xff] }
 0xa8b   : > { %v3817_v41 = vpop.xlane.xlu0 %3816 }
 0xa8c   : > { %v3821_v32 = vmul.f32 0.03125, %v3817_v41 }
 0xa8e   : > { %v3823_v22 = vsub.f32 %v9008_v29, %v3821_v32 }
 0xa90   : > { %v3825_v49 = vmul.f32 %v3823_v22, %v3823_v22 }
 0xa92   : > { %v3827_v52 = vsel %vm826_vm3, %v3825_v49, 0.0  ;;  %v7171_v49 = vld [vmem:[%s9711_s7 + $0x7] ss:$0 sm:$0xff]  ;;  %s8236_s7 = scalar_lea.vmem %s8235_s6, 512 }
 0xa93   : > { %3828 = vadd.xlane.f32.xlu0 %v3827_v52 }
 0xaa2   : > { %v3820_v53 = vpop.xlane.xlu1 %3819 }
 0xaa3   : > { %v3822_v54 = vmul.f32 0.03125, %v3820_v53 }
 0xaa5   : > { %v9020_v55 = vsub.f32 %v9013_v47, %v3822_v54 }
 0xaa7   : > { %v3826_v40 = vmul.f32 %v9020_v55, %v9020_v55 }
 0xaa9   : > { %v3830_v56 = vsel %vm826_vm3, %v3826_v40, 0.0 }
 0xaaa   : > { %3831 = vadd.xlane.f32.xlu1 %v3830_v56 }
 0xb1c   : > { %v3829_v2 = vpop.xlane.xlu0 %3828 }
 0xb1d   : > { %v3833_v3 = vmul.f32 0.032258064, %v3829_v2 }
 0xb1f   : > { %8142 = vrsqrt.f32 %v3833_v3  ;;  %vm3837_vm14 = vcmp.eq.f32.partialorder %v3833_v3, inf  ;;  %v3840_v5 = vand.u32 2147483648, %v3833_v3  ;;  %vm3839_vm15 = vcmp.eq.f32.partialorder %v3833_v3, 0.0 }
 0xb2c   : > { %v8143_v4 = vpop.eup %8142 }
 0xb2d   : > { %v3836_v45 = vmul.f32 %v8143_v4, %v3833_v3 }
 0xb2f   : > { %v3838_v6 = vsel %vm3837_vm14, %v3833_v3, %v3836_v45 }
 0xb30   : > { %v3841_v44 = vsel %vm3839_vm15, %v3840_v5, %v3838_v6 }
 0xb31   : > { %v3849_v7 = vadd.f32 1e-06, %v3841_v44 }
 0xb33   : > { %8144 = vrcp.f32 %v3849_v7  ;;  %v3832_v8 = vpop.xlane.xlu1 %3831 }
 0xb34   : > { %v3834_v9 = vmul.f32 0.032258064, %v3832_v8 }
 0xb36   : > { %8146 = vrsqrt.f32 %v3834_v9  ;;  %vm3844_vm0 = vcmp.eq.f32.partialorder %v3834_v9, inf  ;;  %v3847_v17 = vand.u32 2147483648, %v3834_v9  ;;  %vm3846_vm2 = vcmp.eq.f32.partialorder %v3834_v9, 0.0 }
 0xb40   : > { %v8145_v10 = vpop.eup %8144 }
 0xb41   : > { %v3853_v12 = vmul.f32 %v8145_v10, %v3823_v22 }
 0xb43   : > { %v8147_v14 = vpop.eup %8146  ;;  %v3861_v15 = vmul.f32 %v9084_v11, %v3853_v12 }
 0xb44   : > { %v3843_v16 = vmul.f32 %v8147_v14, %v3834_v9 }
 0xb45   : > { %v3869_v18 = vadd.f32 %v9089_v13, %v3861_v15 }
 0xb46   : > { %v3845_v21 = vsel %vm3844_vm0, %v3834_v9, %v3843_v16 }
 0xb47   : > { %v3848_v50 = vsel %vm3846_vm2, %v3847_v17, %v3845_v21  ;;  %7785 = vmatmul.mubr.msk.f32.vlgmr.msra.gmra.mxu0 %vm826_vm3, %v3869_v18  ;;  %7796 = vmatmul.mubr.msk.f32.vlgmr.msra.gmra.mxu1 %vm826_vm3, %v3869_v18 }
 0xb48   : > { %v3850_v24 = vadd.f32 1e-06, %v3848_v50  ;;  %7799 = vmatpush3.msra.mxu0 %v7159_v19  ;;  %7810 = vmatpush3.msra.mxu1 %v7163_v20 }
 0xb49   : > { %7800 = vmatprep.subr.mxu0 %v8322_v1  ;;  %7811 = vmatprep.subr.mxu1 %v8322_v1 }
 0xb4a   : > { %8148 = vrcp.f32 %v3850_v24  ;;  %7801 = vmatpush3.msra.mxu0 %v7158_v51  ;;  %7812 = vmatpush3.msra.mxu1 %v7162_v23 }
 0xb4b   : > { %7802 = vmatprep.subr.mxu0 %v8322_v1  ;;  %7813 = vmatprep.subr.mxu1 %v8322_v1 }
 0xb4c   : > { %7803 = vmatpush3.msra.mxu0 %v7157_v25  ;;  %7814 = vmatpush3.msra.mxu1 %v7161_v26 }
 0xb4d   : > { %7804 = vmatprep.subr.mxu0 %v8322_v1  ;;  %7815 = vmatprep.subr.mxu1 %v8322_v1 }
 0xb4e   : > { %7805 = vmatpush3.msra.mxu0 %v7156_v27  ;;  %7806 = vmatprep.mubr.msk.f32.mxu0 %vm8323_vm1, %v8322_v1 }
 0xb4f   : > { %7816 = vmatpush3.msra.mxu1 %v7160_v30  ;;  %7817 = vmatprep.mubr.msk.f32.mxu1 %vm8323_vm1, %v8322_v1 }
 0xb50   : > { %7807 = vmatmul.mubr.msk.f32.vlgmr.msra.gmra.mxu0 %vm826_vm3, %v3869_v18  ;;  %7818 = vmatmul.mubr.msk.f32.vlgmr.msra.gmra.mxu1 %vm826_vm3, %v3869_v18 }
 0xb51   : > { %7820 = vmatprep.subr.mxu0 %v8322_v1  ;;  %7831 = vmatprep.subr.mxu1 %v8322_v1 }
 0xb52   : > { %7821 = vmatpush3.msra.mxu0 %v9028_v57  ;;  %7832 = vmatpush3.msra.mxu1 %v9033_v58 }
 0xb53   : > { %7822 = vmatprep.subr.mxu0 %v8322_v1  ;;  %7833 = vmatprep.subr.mxu1 %v8322_v1 }
 0xb54   : > { %7823 = vmatpush3.msra.mxu0 %v9042_v59  ;;  %7834 = vmatpush3.msra.mxu1 %v9047_v60 }
 0xb55   : > { %7824 = vmatprep.subr.mxu0 %v8322_v1  ;;  %7835 = vmatprep.subr.mxu1 %v8322_v1 }
 0xb56   : > { %7825 = vmatpush3.msra.mxu0 %v9056_v61  ;;  %7836 = vmatpush3.msra.mxu1 %v9061_v62 }
 0xb57   : > { %v8149_v33 = vpop.eup %8148  ;;  %7826 = vmatprep.subr.mxu0 %v8322_v1  ;;  %7837 = vmatprep.subr.mxu1 %v8322_v1 }
 0xb58   : > { %7827 = vmatpush3.msra.mxu0 %v9070_v63  ;;  %7838 = vmatpush3.msra.mxu1 %v9075_v0  ;;  %v3854_v34 = vmul.f32 %v8149_v33, %v9020_v55 }
 0xb59   : > { %7828 = vmatprep.mubr.msk.f32.mxu0 %vm8323_vm1, %v8322_v1  ;;  %7839 = vmatprep.mubr.msk.f32.mxu1 %vm8323_vm1, %v8322_v1 }
 0xb5a   : > { %7842 = vmatprep.subr.mxu0 %v8322_v1  ;;  %7853 = vmatprep.subr.mxu1 %v8322_v1  ;;  %v3862_v35 = vmul.f32 %v9084_v11, %v3854_v34 }
 0xb5c   : > { %v3870_v31 = vadd.f32 %v9089_v13, %v3862_v35 }
 0xb5e   : > { %7829 = vmatmul.mubr.msk.f32.vlgmr.msra.gmra.mxu0 %vm826_vm3, %v3870_v31  ;;  %7840 = vmatmul.mubr.msk.f32.vlgmr.msra.gmra.mxu1 %vm826_vm3, %v3870_v31 }
 0xb5f   : > { %7843 = vmatpush3.msra.mxu0 %v7159_v19  ;;  %7854 = vmatpush3.msra.mxu1 %v7163_v20 }
 0xb60   : > { %7844 = vmatprep.subr.mxu0 %v8322_v1  ;;  %7855 = vmatprep.subr.mxu1 %v8322_v1 }
 0xb61   : > { %7845 = vmatpush3.msra.mxu0 %v7158_v51  ;;  %7856 = vmatpush3.msra.mxu1 %v7162_v23 }
 0xb62   : > { %7846 = vmatprep.subr.mxu0 %v8322_v1  ;;  %7857 = vmatprep.subr.mxu1 %v8322_v1 }
 0xb63   : > { %7847 = vmatpush3.msra.mxu0 %v7157_v25  ;;  %7858 = vmatpush3.msra.mxu1 %v7161_v26 }
 0xb64   : > { %7848 = vmatprep.subr.mxu0 %v8322_v1  ;;  %7859 = vmatprep.subr.mxu1 %v8322_v1 }
 0xb65   : > { %7849 = vmatpush3.msra.mxu0 %v7156_v27  ;;  %7850 = vmatprep.mubr.msk.f32.mxu0 %vm8323_vm1, %v8322_v1 }
 0xb66   : > { %7860 = vmatpush3.msra.mxu1 %v7160_v30  ;;  %7861 = vmatprep.mubr.msk.f32.mxu1 %vm8323_vm1, %v8322_v1 }
 0xb67   : > { %7851 = vmatmul.mubr.msk.f32.vlgmr.msra.gmra.mxu0 %vm826_vm3, %v3870_v31  ;;  %7862 = vmatmul.mubr.msk.f32.vlgmr.msra.gmra.mxu1 %vm826_vm3, %v3870_v31 }
 0xb68   : > { %7869 = vmatprep.subr.mxu1 %v8322_v1  ;;  %7864 = vmatprep.subr.mxu0 %v8322_v1 }
 0xb69   : > { %7866 = vmatprep.mubr.msk.f32.mxu0 %vm8323_vm1, %v8322_v1  ;;  %7871 = vmatprep.mubr.msk.f32.mxu1 %vm8323_vm1, %v8322_v1 }
 0xc07   : > { %v3986_v39 = vpop.f32.mrf.mxu0  ;;  %v4056_v42 = vpop.f32.mrf.mxu1 }
 0xc08   : > { %v9182_v37 = vadd.f32 %v7168_v36, %v3986_v39  ;;  %v9184_v43 = vadd.f32 %v7169_v38, %v4056_v42 }
 0xc09   : > { %v7786_v28 = vpop.f32.mrf.mxu0  ;;  %v7797_v46 = vpop.f32.mrf.mxu1 }
 0xc0a   : > { %4561 = vrot.lane.b32.xlu1 %v9184_v43, %s9712_s20  ;;  %4484 = vrot.lane.b32.xlu0 %v9182_v37, %s9712_s20 }
 0xc10   : > { %v4126_v41 = vpop.f32.mrf.mxu0  ;;  %v4196_v32 = vpop.f32.mrf.mxu1 }
 0xc11   : > { %v9193_v22 = vadd.f32 %v7170_v48, %v4126_v41  ;;  %v9200_v54 = vadd.f32 %v7171_v49, %v4196_v32 }
 0xc12   : > { %v7808_v52 = vpop.f32.mrf.mxu0  ;;  %v7819_v53 = vpop.f32.mrf.mxu1 }
 0xc13   : > { %4638 = vrot.lane.b32.xlu1 %v9193_v22, %s9712_s20 }
 0xc17   : > { %4715 = vrot.lane.b32.xlu1 %v9200_v54, %s9712_s20 }
 0xc1e   : > { %v4269_v55 = vpop.f32.mrf.mxu0  ;;  %v4339_v40 = vpop.f32.mrf.mxu1 }
 0xc1f   : > { %v9204_v56 = vadd.f32 %v7168_v36, %v4269_v55  ;;  %v9206_v57 = vadd.f32 %v7169_v38, %v4339_v40 }
 0xc20   : > { %v7830_v58 = vpop.f32.mrf.mxu0  ;;  %v7841_v59 = vpop.f32.mrf.mxu1 }
 0xc21   : > { %4869 = vrot.lane.b32.xlu1 %v9206_v57, %s9712_s20  ;;  %4792 = vrot.lane.b32.xlu0 %v9204_v56, %s9712_s20 }
 0xc27   : > { %v4409_v60 = vpop.f32.mrf.mxu0  ;;  %v4479_v61 = vpop.f32.mrf.mxu1 }
 0xc28   : > { %v9212_v62 = vadd.f32 %v7170_v48, %v4409_v60  ;;  %v9214_v63 = vadd.f32 %v7171_v49, %v4479_v61 }
 0xc29   : > { %v7852_v0 = vpop.f32.mrf.mxu0  ;;  %v7863_v2 = vpop.f32.mrf.mxu1 }
 0xc2a   : > { %5023 = vrot.lane.b32.xlu1 %v9214_v63, %s9712_s20  ;;  %4946 = vrot.lane.b32.xlu0 %v9212_v62, %s9712_s20  ;;  %s9312_s20 = scalar_lea.vmem [#allocation4], %s9689_s22  ;;  %s9690_s22 = sshll.u32 %s8451_s1, 8 }
 0xc2b   : > { %s9572_s29 = scalar_lea.hbm %s9683_s19, %s9690_s22  ;;  %s6968_s25 = sshll.u32 %s9312_s20, 4  ;;  %s9575_s25 = int_to_ptr.vmem [resolvable:$true] %s6968_s25 }
 0xc2c   : > { %s8230_s4 = scalar_lea.vmem %s9575_s25, 256  ;;  %p8237_p0 = scmp.lt.s32.totalorder %s9575_s25, %s8235_s6 }
 0xc2d   : > { %p8231_p11 = scmp.ne.s32.totalorder %s9575_s25, %s8230_s4  ;;  %p8238_p1 = scmp.lt.s32.totalorder %s8236_s7, %s8230_s4 }
 0xc2f   : > { %p8232_p12 = pnand %p8231_p11, %p8468_p5  ;;  %p8239_p2 = por %p8238_p1, %p8237_p0 }
 0xc31   : > { %p8233_p13 = pneg %p8232_p12 }
 0xc33   : > { %p8240_p3 = pnand %p8239_p2, %p8233_p13 }
 0xc7c   : > { %v4562_v3 = vpop.permute.xlu1 %4561  ;;  %v4485_v4 = vpop.permute.xlu0 %4484 }
 0xc7d   : > { %7865 = vmatpush3.xpose.msk.msra.mxu0 %vm1497_vm8, %v4485_v4  ;;  %7870 = vmatpush3.xpose.msk.msra.mxu1 %vm1497_vm8, %v4562_v3 }
 0xc7e   : > { %7874 = vmatprep.subr.mxu0 %v8322_v1  ;;  %7879 = vmatprep.subr.mxu1 %v8322_v1 }
 0xc80   : > { %7867 = vmatmul.mubr.msk.f32.vlgmr.msra.gmra.mxu0 %vm1497_vm8, %v9182_v37  ;;  %7872 = vmatmul.mubr.msk.f32.vlgmr.msra.gmra.mxu1 %vm1497_vm8, %v9184_v43 }
 0xc81   : > { %7876 = vmatprep.mubr.msk.f32.mxu0 %vm8323_vm1, %v8322_v1  ;;  %7881 = vmatprep.mubr.msk.f32.mxu1 %vm8323_vm1, %v8322_v1 }
 0xc85   : > { %v4639_v45 = vpop.permute.xlu1 %4638 }
 0xc86   : > { %7875 = vmatpush3.xpose.msk.msra.mxu0 %vm1497_vm8, %v4639_v45 }
 0xc87   : > { %7884 = vmatprep.subr.mxu0 %v8322_v1 }
 0xc89   : > { %7877 = vmatmul.mubr.msk.f32.vlgmr.msra.gmra.mxu0 %vm1497_vm8, %v9193_v22  ;;  %v4716_v5 = vpop.permute.xlu1 %4715 }
 0xc8a   : > { %7880 = vmatpush3.xpose.msk.msra.mxu1 %vm1497_vm8, %v4716_v5  ;;  %7886 = vmatprep.mubr.msk.f32.mxu0 %vm8323_vm1, %v8322_v1 }
 0xc8b   : > { %7889 = vmatprep.subr.mxu1 %v8322_v1 }
 0xc8d   : > { %7882 = vmatmul.mubr.msk.f32.vlgmr.msra.gmra.mxu1 %vm1497_vm8, %v9200_v54 }
 0xc8e   : > { %7891 = vmatprep.mubr.msk.f32.mxu1 %vm8323_vm1, %v8322_v1 }
 0xc93   : > { %v4870_v6 = vpop.permute.xlu1 %4869  ;;  %v4793_v44 = vpop.permute.xlu0 %4792 }
 0xc94   : > { %7885 = vmatpush3.xpose.msk.msra.mxu0 %vm1497_vm8, %v4793_v44  ;;  %7890 = vmatpush3.xpose.msk.msra.mxu1 %vm1497_vm8, %v4870_v6 }
 0xc95   : > { %7899 = vmatprep.subr.mxu1 %v8322_v1  ;;  %7894 = vmatprep.subr.mxu0 %v8322_v1 }
 0xc97   : > { %7887 = vmatmul.mubr.msk.f32.vlgmr.msra.gmra.mxu0 %vm1497_vm8, %v9204_v56  ;;  %7892 = vmatmul.mubr.msk.f32.vlgmr.msra.gmra.mxu1 %vm1497_vm8, %v9206_v57 }
 0xc98   : > { %7896 = vmatprep.mubr.msk.f32.mxu0 %vm8323_vm1, %v8322_v1  ;;  %7901 = vmatprep.mubr.msk.f32.mxu1 %vm8323_vm1, %v8322_v1 }
 0xc9c   : > { %v5024_v7 = vpop.permute.xlu1 %5023  ;;  %v4947_v8 = vpop.permute.xlu0 %4946 }
 0xc9d   : > { %7895 = vmatpush3.xpose.msk.msra.mxu0 %vm1497_vm8, %v4947_v8  ;;  %7900 = vmatpush3.xpose.msk.msra.mxu1 %vm1497_vm8, %v5024_v7 }
 0xc9e   : > { %7909 = vmatprep.subr.mxu1 %v8322_v1  ;;  %7904 = vmatprep.subr.mxu0 %v8322_v1 }
 0xca0   : > { %7897 = vmatmul.mubr.msk.f32.vlgmr.msra.gmra.mxu0 %vm1497_vm8, %v9212_v62  ;;  %7902 = vmatmul.mubr.msk.f32.vlgmr.msra.gmra.mxu1 %vm1497_vm8, %v9214_v63 }
 0xca1   : > { %7906 = vmatprep.mubr.msk.f32.mxu0 %vm8323_vm1, %v8322_v1  ;;  %7911 = vmatprep.mubr.msk.f32.mxu1 %vm8323_vm1, %v8322_v1 }
 0xd40   : > { %v4556_v9 = vpop.f32.mrf.mxu0  ;;  %v4633_v10 = vpop.f32.mrf.mxu1 }
 0xd41   : > { %v9268_v11 = vmul.f32 0.35355338, %v4556_v9  ;;  %v7196_v12 = vmul.f32 -0.35355338, %v4556_v9  ;;  %v9270_v13 = vmul.f32 0.35355338, %v4633_v10 }
 0xd42   : > { %v7197_v14 = vmul.f32 -0.35355338, %v4633_v10  ;;  %v7868_v15 = vpop.f32.mrf.mxu0  ;;  %v7873_v16 = vpop.f32.mrf.mxu1 }
 0xd43   : > { %v5115_v17 = vmul.f32 1.442695, %v7196_v12  ;;  %v5175_v18 = vsel %vm1497_vm8, %v9270_v13, -inf  ;;  %v5172_v19 = vsel %vm1497_vm8, %v9268_v11, -inf }
 0xd44   : > { %v5117_v20 = vmul.f32 1.442695, %v7197_v14  ;;  %5176 = vmax.xlane.f32.xlu1 %v5175_v18  ;;  %5173 = vmax.xlane.f32.xlu0 %v5172_v19 }
 0xd45   : > { %8150 = vpow2.f32 %v5115_v17 }
 0xd46   : > { %8152 = vpow2.f32 %v5117_v20 }
 0xd49   : > { %v4710_v21 = vpop.f32.mrf.mxu0 }
 0xd4a   : > { %v9276_v50 = vmul.f32 0.35355338, %v4710_v21  ;;  %v7198_v51 = vmul.f32 -0.35355338, %v4710_v21 }
 0xd4b   : > { %v7878_v23 = vpop.f32.mrf.mxu0 }
 0xd4c   : > { %v5119_v24 = vmul.f32 1.442695, %v7198_v51  ;;  %v5178_v25 = vsel %vm1497_vm8, %v9276_v50, -inf }
 0xd4d   : > { %v4787_v26 = vpop.f32.mrf.mxu1  ;;  %5179 = vmax.xlane.f32.xlu0 %v5178_v25 }
 0xd4e   : > { %8154 = vpow2.f32 %v5119_v24  ;;  %v9280_v27 = vmul.f32 0.35355338, %v4787_v26  ;;  %v7199_v30 = vmul.f32 -0.35355338, %v4787_v26 }
 0xd4f   : > { %v7883_v33 = vpop.f32.mrf.mxu1 }
 0xd50   : > { %v5121_v34 = vmul.f32 1.442695, %v7199_v30  ;;  %v5181_v35 = vsel %vm1497_vm8, %v9280_v27, -inf }
 0xd51   : > { %5182 = vmax.xlane.f32.xlu0 %v5181_v35 }
 0xd52   : > { %v8151_v31 = vpop.eup %8150  ;;  %8156 = vpow2.f32 %v5121_v34 }
 0xd53   : > { %v8153_v36 = vpop.eup %8152  ;;  %v5131_v38 = vadd.f32 1.0, %v8151_v31 }
 0xd54   : > { %v5132_v39 = vadd.f32 1.0, %v8153_v36 }
 0xd55   : > { %8158 = vrcp.f32 %v5131_v38 }
 0xd56   : > { %8160 = vrcp.f32 %v5132_v39 }
 0xd57   : > { %v4864_v42 = vpop.f32.mrf.mxu0  ;;  %v4941_v28 = vpop.f32.mrf.mxu1 }
 0xd58   : > { %v9284_v46 = vmul.f32 0.35355338, %v4864_v42  ;;  %v7200_v48 = vmul.f32 -0.35355338, %v4864_v42  ;;  %v9286_v41 = vmul.f32 0.35355338, %v4941_v28 }
 0xd59   : > { %v7201_v32 = vmul.f32 -0.35355338, %v4941_v28  ;;  %v7888_v49 = vpop.f32.mrf.mxu0  ;;  %v7893_v52 = vpop.f32.mrf.mxu1 }
 0xd5a   : > { %v5123_v53 = vmul.f32 1.442695, %v7200_v48  ;;  %v5187_v55 = vsel %vm1497_vm8, %v9286_v41, -inf  ;;  %v5184_v40 = vsel %vm1497_vm8, %v9284_v46, -inf }
 0xd5b   : > { %v8155_v58 = vpop.eup %8154  ;;  %v5125_v59 = vmul.f32 1.442695, %v7201_v32  ;;  %5188 = vmax.xlane.f32.xlu1 %v5187_v55  ;;  %5185 = vmax.xlane.f32.xlu0 %v5184_v40 }
 0xd5c   : > { %v5133_v60 = vadd.f32 1.0, %v8155_v58  ;;  %8162 = vpow2.f32 %v5123_v53 }
 0xd5d   : > { %8164 = vpow2.f32 %v5125_v59 }
 0xd5e   : > { %8166 = vrcp.f32 %v5133_v60 }
 0xd5f   : > { %v8157_v61 = vpop.eup %8156 }
 0xd60   : > { %v5134_v0 = vadd.f32 1.0, %v8157_v61  ;;  %v5018_v2 = vpop.f32.mrf.mxu0  ;;  %v5095_v3 = vpop.f32.mrf.mxu1 }
 0xd61   : > { %v9292_v4 = vmul.f32 0.35355338, %v5018_v2  ;;  %v7202_v45 = vmul.f32 -0.35355338, %v5018_v2  ;;  %v9294_v5 = vmul.f32 0.35355338, %v5095_v3 }
 0xd62   : > { %8168 = vrcp.f32 %v5134_v0  ;;  %v7203_v6 = vmul.f32 -0.35355338, %v5095_v3  ;;  %v7898_v44 = vpop.f32.mrf.mxu0  ;;  %v7903_v7 = vpop.f32.mrf.mxu1 }
 0xd63   : > { %v5127_v8 = vmul.f32 1.442695, %v7202_v45  ;;  %v5193_v9 = vsel %vm1497_vm8, %v9294_v5, -inf  ;;  %v5190_v10 = vsel %vm1497_vm8, %v9292_v4, -inf  ;;  %v8159_v14 = vpop.eup %8158 }
 0xd64   : > { %v5129_v12 = vmul.f32 1.442695, %v7203_v6  ;;  %5194 = vmax.xlane.f32.xlu1 %v5193_v9  ;;  %5191 = vmax.xlane.f32.xlu0 %v5190_v10  ;;  %v8161_v15 = vpop.eup %8160  ;;  %v5155_v18 = vsel %vm1497_vm8, %v8159_v14, 0.0 }
 0xd65   : > { %8170 = vpow2.f32 %v5127_v8  ;;  %v5156_v19 = vsel %vm1497_vm8, %v8161_v15, 0.0 }
 0xd66   : > { %8172 = vpow2.f32 %v5129_v12  ;;  %v5157_v24 = vadd.f32 %v5156_v19, %v5155_v18 }
 0xd69   : > { %v8163_v16 = vpop.eup %8162 }
 0xd6a   : > { %v8165_v17 = vpop.eup %8164  ;;  %v5135_v20 = vadd.f32 1.0, %v8163_v16 }
 0xd6b   : > { %v8167_v21 = vpop.eup %8166  ;;  %v5136_v51 = vadd.f32 1.0, %v8165_v17 }
 0xd6c   : > { %v5158_v23 = vsel %vm1497_vm8, %v8167_v21, 0.0  ;;  %8174 = vrcp.f32 %v5135_v20 }
 0xd6d   : > { %8176 = vrcp.f32 %v5136_v51  ;;  %v5159_v26 = vadd.f32 %v5158_v23, %v5157_v24 }
 0xd6f   : > { %v8169_v25 = vpop.eup %8168 }
 0xd70   : > { %v5160_v30 = vsel %vm1497_vm8, %v8169_v25, 0.0 }
 0xd71   : > { %v5161_v33 = vadd.f32 %v5160_v30, %v5159_v26 }
 0xd72   : > { %v8171_v34 = vpop.eup %8170 }
 0xd73   : > { %v8173_v35 = vpop.eup %8172  ;;  %v5137_v31 = vadd.f32 1.0, %v8171_v34  ;;  %v5170_v36 = vmul.f32 0.25, %v5161_v33 }
 0xd74   : > { %v5138_v38 = vadd.f32 1.0, %v8173_v35 }
 0xd75   : > { %8178 = vrcp.f32 %v5137_v31  ;;  %5336 = vrot.lane.b32.xlu1 %v9184_v43, %s9713_s24  ;;  %6931 = vst.msk [vmem:[%s9312_s20] sm:$0xff] %vm1497_vm8, %v5170_v36 }
 0xd76   : > { %8180 = vrcp.f32 %v5138_v38 }
 0xd79   : > { %5412 = vrot.lane.b32.xlu1 %v9193_v22, %s9713_s24  ;;  %v8175_v39 = vpop.eup %8174 }
 0xd7a   : > { %5260 = vrot.lane.b32.xlu0 %v9182_v37, %s9713_s24  ;;  %v8177_v42 = vpop.eup %8176  ;;  %v5162_v43 = vsel %vm1497_vm8, %v8175_v39, 0.0 }
 0xd7b   : > { %v5163_v28 = vsel %vm1497_vm8, %v8177_v42, 0.0 }
 0xd7c   : > { %v5164_v48 = vadd.f32 %v5163_v28, %v5162_v43 }
 0xd7d   : > { %5488 = vrot.lane.b32.xlu1 %v9200_v54, %s9713_s24 }
 0xd7e   : > { %5564 = vrot.lane.b32.xlu0 %v9204_v56, %s9713_s24 }
 0xd81   : > { %5640 = vrot.lane.b32.xlu1 %v9206_v57, %s9713_s24 }
 0xd82   : > { %v8179_v22 = vpop.eup %8178 }
 0xd83   : > { %v8181_v32 = vpop.eup %8180  ;;  %v5165_v37 = vsel %vm1497_vm8, %v8179_v22, 0.0 }
 0xd84   : > { %v5166_v49 = vadd.f32 %v5165_v37, %v5164_v48  ;;  %v5167_v52 = vsel %vm1497_vm8, %v8181_v32, 0.0 }
 0xd86   : > { %v5168_v53 = vadd.f32 %v5167_v52, %v5166_v49 }
 0xd88   : > { %v5171_v54 = vmul.f32 0.25, %v5168_v53 }
 0xd8a   : > { %6932 = vst.msk [vmem:[%s9312_s20 + $0x8] sm:$0xff] %vm1497_vm8, %v5171_v54 }
 0xdcd   : > { %v5177_v56 = vpop.xlane.xlu1 %5176  ;;  %v5174_v55 = vpop.xlane.xlu0 %5173 }
 0xdce   : > { %v5197_v40 = vsub.f32 %v9270_v13, %v5177_v56  ;;  %v5196_v58 = vsub.f32 %v9268_v11, %v5174_v55 }
 0xdd0   : > { %v5206_v59 = vmul.f32 1.442695, %v5197_v40  ;;  %v5204_v57 = vmul.f32 1.442695, %v5196_v58 }
 0xdd2   : > { %8182 = vpow2.f32 %v5206_v59 }
 0xdd3   : > { %8184 = vpow2.f32 %v5204_v57 }
 0xdd6   : > { %v5180_v60 = vpop.xlane.xlu0 %5179 }
 0xdd7   : > { %v5198_v61 = vsub.f32 %v9276_v50, %v5180_v60 }
 0xdd9   : > { %v5208_v0 = vmul.f32 1.442695, %v5198_v61 }
 0xdda   : > { %v5183_v2 = vpop.xlane.xlu0 %5182 }
 0xddb   : > { %8186 = vpow2.f32 %v5208_v0  ;;  %v5199_v3 = vsub.f32 %v9280_v27, %v5183_v2 }
 0xddd   : > { %v5210_v45 = vmul.f32 1.442695, %v5199_v3 }
 0xddf   : > { %v9336_v6 = vpop.eup %8182  ;;  %8188 = vpow2.f32 %v5210_v45  ;;  %v7212_v45 = vld [vmem:[%s9672_s8 + $0x20] sm:$0xff] }
 0xde0   : > { %v8185_v44 = vpop.eup %8184  ;;  %v5223_v11 = vsel %vm1497_vm8, %v9336_v6, 0.0 }
 0xde1   : > { %5224 = vadd.xlane.f32.xlu1 %v5223_v11  ;;  %v5220_v13 = vsel %vm1497_vm8, %v8185_v44, 0.0 }
 0xde2   : > { %5221 = vadd.xlane.f32.xlu0 %v5220_v13  ;;  %v7214_v13 = vld [vmem:[%s9672_s8 + $0x30] sm:$0xff] }
 0xde4   : > { %v5189_v7 = vpop.xlane.xlu1 %5188  ;;  %v5186_v8 = vpop.xlane.xlu0 %5185 }
 0xde5   : > { %v5201_v50 = vsub.f32 %v9286_v41, %v5189_v7  ;;  %v5200_v9 = vsub.f32 %v9284_v46, %v5186_v8 }
 0xde7   : > { %v5214_v10 = vmul.f32 1.442695, %v5201_v50  ;;  %v5212_v27 = vmul.f32 1.442695, %v5200_v9 }
 0xde8   : > { %v9343_v12 = vpop.eup %8186 }
 0xde9   : > { %8190 = vpow2.f32 %v5214_v10  ;;  %v5226_v14 = vsel %vm1497_vm8, %v9343_v12, 0.0 }
 0xdea   : > { %8192 = vpow2.f32 %v5212_v27  ;;  %5227 = vadd.xlane.f32.xlu0 %v5226_v14 }
 0xdec   : > { %v9347_v15 = vpop.eup %8188 }
 0xded   : > { %v5195_v16 = vpop.xlane.xlu1 %5194  ;;  %v5192_v17 = vpop.xlane.xlu0 %5191  ;;  %v5229_v18 = vsel %vm1497_vm8, %v9347_v15, 0.0 }
 0xdee   : > { %v5203_v41 = vsub.f32 %v9294_v5, %v5195_v16  ;;  %v5202_v46 = vsub.f32 %v9292_v4, %v5192_v17  ;;  %5230 = vadd.xlane.f32.xlu1 %v5229_v18 }
 0xdf0   : > { %v5218_v19 = vmul.f32 1.442695, %v5203_v41  ;;  %v5216_v20 = vmul.f32 1.442695, %v5202_v46 }
 0xdf1   : > { %v5337_v21 = vpop.permute.xlu1 %5336  ;;  %v5261_v51 = vpop.permute.xlu0 %5260 }
 0xdf2   : > { %8194 = vpow2.f32 %v5218_v19  ;;  %7910 = vmatpush3.msra.mxu1 %v5337_v21  ;;  %7905 = vmatpush3.msra.mxu0 %v5261_v51 }
 0xdf3   : > { %8196 = vpow2.f32 %v5216_v20  ;;  %7914 = vmatprep.subr.mxu0 %v8322_v1  ;;  %7919 = vmatprep.subr.mxu1 %v8322_v1 }
 0xdf5   : > { %v5413_v34 = vpop.permute.xlu1 %5412  ;;  %v5565_v36 = vpop.permute.xlu0 %5564 }
 0xdf6   : > { %v8191_v23 = vpop.eup %8190 }
 0xdf7   : > { %v8193_v24 = vpop.eup %8192  ;;  %v5235_v25 = vsel %vm1497_vm8, %v8191_v23, 0.0 }
 0xdf8   : > { %5236 = vadd.xlane.f32.xlu1 %v5235_v25  ;;  %v5232_v4 = vsel %vm1497_vm8, %v8193_v24, 0.0 }
 0xdf9   : > { %5233 = vadd.xlane.f32.xlu0 %v5232_v4  ;;  %v5489_v35 = vpop.permute.xlu1 %5488 }
 0xdfd   : > { %v5641_v31 = vpop.permute.xlu1 %5640 }
 0xdff   : > { %v9357_v5 = vpop.eup %8194 }
 0xe00   : > { %v9359_v26 = vpop.eup %8196  ;;  %v5241_v30 = vsel %vm1497_vm8, %v9357_v5, 0.0 }
 0xe01   : > { %5242 = vadd.xlane.f32.xlu1 %v5241_v30  ;;  %v5238_v33 = vsel %vm1497_vm8, %v9359_v26, 0.0 }
 0xe02   : > { %5239 = vadd.xlane.f32.xlu0 %v5238_v33 }
 0xe12   : > { %5792 = vrot.lane.b32.xlu1 %v9214_v63, %s9713_s24 }
 0xe18   : > { %5716 = vrot.lane.b32.xlu0 %v9212_v62, %s9713_s24 }
 0xe6a   : > { %v5225_v38 = vpop.xlane.xlu1 %5224 }
 0xe6b   : > { %8198 = vrcp.f32 %v5225_v38  ;;  %v5222_v39 = vpop.xlane.xlu0 %5221 }
 0xe6c   : > { %8200 = vrcp.f32 %v5222_v39 }
 0xe73   : > { %v5228_v42 = vpop.xlane.xlu0 %5227 }
 0xe74   : > { %8202 = vrcp.f32 %v5228_v42 }
 0xe77   : > { %v5231_v43 = vpop.xlane.xlu1 %5230 }
 0xe78   : > { %v8199_v28 = vpop.eup %8198  ;;  %8204 = vrcp.f32 %v5231_v43 }
 0xe79   : > { %v8201_v22 = vpop.eup %8200  ;;  %v5253_v48 = vmul.f32 %v8199_v28, %v9336_v6  ;;  %v7213_v6 = vld [vmem:[%s9672_s8 + $0x28] sm:$0xff] }
 0xe7a   : > { %v5252_v63 = vmul.f32 %v8201_v22, %v8185_v44  ;;  %v7215_v44 = vld [vmem:[%s9672_s8 + $0x38] sm:$0xff] }
 0xe7b   : > { %7912 = vmatmul.mubr.msk.f32.vlgmr.msra.gmra.mxu1 %vm1497_vm8, %v5253_v48 }
 0xe7c   : > { %7907 = vmatmul.mubr.msk.f32.vlgmr.msra.gmra.mxu0 %vm1497_vm8, %v5252_v63  ;;  %7920 = vmatpush3.msra.mxu1 %v5489_v35 }
 0xe7d   : > { %7915 = vmatpush3.msra.mxu0 %v5413_v34  ;;  %7916 = vmatprep.mubr.msk.f32.mxu0 %vm8323_vm1, %v8322_v1 }
 0xe7e   : > { %7924 = vmatprep.subr.mxu0 %v8322_v1  ;;  %7921 = vmatprep.mubr.msk.f32.mxu1 %vm8323_vm1, %v8322_v1 }
 0xe7f   : > { %7929 = vmatprep.subr.mxu1 %v8322_v1 }
 0xe81   : > { %v8203_v62 = vpop.eup %8202  ;;  %v5237_v32 = vpop.xlane.xlu1 %5236 }
 0xe82   : > { %8206 = vrcp.f32 %v5237_v32  ;;  %v5234_v37 = vpop.xlane.xlu0 %5233  ;;  %v5254_v49 = vmul.f32 %v8203_v62, %v9343_v12 }
 0xe83   : > { %8208 = vrcp.f32 %v5234_v37 }
 0xe84   : > { %7917 = vmatmul.mubr.msk.f32.vlgmr.msra.gmra.mxu0 %vm1497_vm8, %v5254_v49 }
 0xe85   : > { %v8205_v52 = vpop.eup %8204  ;;  %7925 = vmatpush3.msra.mxu0 %v5565_v36  ;;  %7926 = vmatprep.mubr.msk.f32.mxu0 %vm8323_vm1, %v8322_v1 }
 0xe86   : > { %v5255_v53 = vmul.f32 %v8205_v52, %v9347_v15  ;;  %7934 = vmatprep.subr.mxu0 %v8322_v1 }
 0xe88   : > { %7922 = vmatmul.mubr.msk.f32.vlgmr.msra.gmra.mxu1 %vm1497_vm8, %v5255_v53 }
 0xe89   : > { %7930 = vmatpush3.msra.mxu1 %v5641_v31  ;;  %7931 = vmatprep.mubr.msk.f32.mxu1 %vm8323_vm1, %v8322_v1  ;;  %v7225_v31 = vld [vmem:[%s9673_s9 + $0x1] ss:$0 sm:$0xff] }
 0xe8a   : > { %v5243_v54 = vpop.xlane.xlu1 %5242  ;;  %7939 = vmatprep.subr.mxu1 %v8322_v1 }
 0xe8b   : > { %8210 = vrcp.f32 %v5243_v54  ;;  %v5240_v56 = vpop.xlane.xlu0 %5239 }
 0xe8c   : > { %8212 = vrcp.f32 %v5240_v56 }
 0xe8e   : > { %v5793_v57 = vpop.permute.xlu1 %5792 }
 0xe8f   : > { %v8207_v55 = vpop.eup %8206  ;;  %v5717_v60 = vpop.permute.xlu0 %5716 }
 0xe90   : > { %v8209_v40 = vpop.eup %8208  ;;  %v5257_v58 = vmul.f32 %v8207_v55, %v8191_v23 }
 0xe91   : > { %v5256_v59 = vmul.f32 %v8209_v40, %v8193_v24 }
 0xe92   : > { %7932 = vmatmul.mubr.msk.f32.vlgmr.msra.gmra.mxu1 %vm1497_vm8, %v5257_v58 }
 0xe93   : > { %7927 = vmatmul.mubr.msk.f32.vlgmr.msra.gmra.mxu0 %vm1497_vm8, %v5256_v59  ;;  %7940 = vmatpush3.msra.mxu1 %v5793_v57 }
 0xe94   : > { %7935 = vmatpush3.msra.mxu0 %v5717_v60  ;;  %7936 = vmatprep.mubr.msk.f32.mxu0 %vm8323_vm1, %v8322_v1 }
 0xe95   : > { %7941 = vmatprep.mubr.msk.f32.mxu1 %vm8323_vm1, %v8322_v1  ;;  %7944 = vmatprep.subr.mxu0 %v8322_v1 }
 0xe96   : > { %7949 = vmatprep.subr.mxu1 %v8322_v1 }
 0xe98   : > { %v8211_v61 = vpop.eup %8210 }
 0xe99   : > { %v8213_v0 = vpop.eup %8212  ;;  %v5259_v2 = vmul.f32 %v8211_v61, %v9357_v5 }
 0xe9a   : > { %v5258_v3 = vmul.f32 %v8213_v0, %v9359_v26 }
 0xe9b   : > { %7942 = vmatmul.mubr.msk.f32.vlgmr.msra.gmra.mxu1 %vm1497_vm8, %v5259_v2 }
 0xe9c   : > { %7937 = vmatmul.mubr.msk.f32.vlgmr.msra.gmra.mxu0 %vm1497_vm8, %v5258_v3  ;;  %7951 = vmatprep.mubr.msk.f32.mxu1 %vm8323_vm1, %v8322_v1 }
 0xe9d   : > { %7946 = vmatprep.mubr.msk.f32.mxu0 %vm8323_vm1, %v8322_v1  ;;  %7945 = vmatpush3.msra.mxu0 %v7212_v45 }
 0xe9e   : > { %7950 = vmatpush3.msra.mxu1 %v7213_v6  ;;  %7954 = vmatprep.subr.mxu0 %v8322_v1 }
 0xe9f   : > { %7959 = vmatprep.subr.mxu1 %v8322_v1 }
 0xf3b   : > { %v5408_v11 = vpop.f32.mrf.mxu1 }
 0xf3c   : > { %v5332_v7 = vpop.f32.mrf.mxu0  ;;  %7952 = vmatmul.mubr.msk.f32.vlgmr.msra.gmra.mxu1 %vm1497_vm8, %v5408_v11 }
 0xf3d   : > { %7947 = vmatmul.mubr.msk.f32.vlgmr.msra.gmra.mxu0 %vm1497_vm8, %v5332_v7  ;;  %v7913_v8 = vpop.f32.mrf.mxu1  ;;  %7960 = vmatpush3.msra.mxu1 %v7215_v44  ;;  %v7232_v7 = vld [vmem:[%s9676_s12 + $0x30] sm:$0xff] }
 0xf3e   : > { %v7908_v50 = vpop.f32.mrf.mxu0  ;;  %7955 = vmatpush3.msra.mxu0 %v7214_v13  ;;  %7956 = vmatprep.mubr.msk.f32.mxu0 %vm8323_vm1, %v8322_v1  ;;  %v7231_v8 = vld [vmem:[%s9676_s12 + $0x28] sm:$0xff] }
 0xf3f   : > { %7961 = vmatprep.mubr.msk.f32.mxu1 %vm8323_vm1, %v8322_v1  ;;  %7964 = vmatprep.subr.mxu0 %v8322_v1  ;;  %v7230_v50 = vld [vmem:[%s9676_s12 + $0x20] sm:$0xff] }
 0xf40   : > { %7969 = vmatprep.subr.mxu1 %v8322_v1 }
 0xf44   : > { %v5484_v9 = vpop.f32.mrf.mxu0 }
 0xf45   : > { %7957 = vmatmul.mubr.msk.f32.vlgmr.msra.gmra.mxu0 %vm1497_vm8, %v5484_v9 }
 0xf46   : > { %v7918_v10 = vpop.f32.mrf.mxu0  ;;  %7965 = vmatpush3.msra.mxu0 %v7212_v45  ;;  %7966 = vmatprep.mubr.msk.f32.mxu0 %vm8323_vm1, %v8322_v1 }
 0xf47   : > { %7974 = vmatprep.subr.mxu0 %v8322_v1 }
 0xf48   : > { %v5560_v27 = vpop.f32.mrf.mxu1 }
 0xf49   : > { %7962 = vmatmul.mubr.msk.f32.vlgmr.msra.gmra.mxu1 %vm1497_vm8, %v5560_v27 }
 0xf4a   : > { %v7923_v12 = vpop.f32.mrf.mxu1  ;;  %7970 = vmatpush3.msra.mxu1 %v7213_v6  ;;  %7971 = vmatprep.mubr.msk.f32.mxu1 %vm8323_vm1, %v8322_v1 }
 0xf4b   : > { %7979 = vmatprep.subr.mxu1 %v8322_v1 }
 0xf52   : > { %v5712_v14 = vpop.f32.mrf.mxu1 }
 0xf53   : > { %v5636_v15 = vpop.f32.mrf.mxu0  ;;  %7972 = vmatmul.mubr.msk.f32.vlgmr.msra.gmra.mxu1 %vm1497_vm8, %v5712_v14 }
 0xf54   : > { %7967 = vmatmul.mubr.msk.f32.vlgmr.msra.gmra.mxu0 %vm1497_vm8, %v5636_v15  ;;  %v7933_v16 = vpop.f32.mrf.mxu1  ;;  %7980 = vmatpush3.msra.mxu1 %v7215_v44 }
 0xf55   : > { %v7928_v17 = vpop.f32.mrf.mxu0  ;;  %7975 = vmatpush3.msra.mxu0 %v7214_v13  ;;  %7976 = vmatprep.mubr.msk.f32.mxu0 %vm8323_vm1, %v8322_v1  ;;  %v7233_v13 = vld [vmem:[%s9676_s12 + $0x38] sm:$0xff] }
 0xf56   : > { %7981 = vmatprep.mubr.msk.f32.mxu1 %vm8323_vm1, %v8322_v1  ;;  %7984 = vmatprep.subr.mxu0 %v8322_v1 }
 0xf57   : > { %7995 = vmatprep.subr.mxu1 %v8322_v1 }
 0xf5b   : > { %v5864_v18 = vpop.f32.mrf.mxu1 }
 0xf5c   : > { %v5788_v41 = vpop.f32.mrf.mxu0  ;;  %7982 = vmatmul.mubr.msk.f32.vlgmr.msra.gmra.mxu1 %vm1497_vm8, %v5864_v18 }
 0xf5d   : > { %7977 = vmatmul.mubr.msk.f32.vlgmr.msra.gmra.mxu0 %vm1497_vm8, %v5788_v41  ;;  %v7943_v46 = vpop.f32.mrf.mxu1  ;;  %8003 = vmatprep.mubr.msk.f32.mxu1 %vm8323_vm1, %v8322_v1 }
 0xf5e   : > { %v7938_v19 = vpop.f32.mrf.mxu0  ;;  %7992 = vmatprep.mubr.msk.f32.mxu0 %vm8323_vm1, %v8322_v1  ;;  %7985 = vmatpush3.msra.mxu0 %v7233_v13 }
 0xf5f   : > { %7996 = vmatpush3.msra.mxu1 %v7233_v13  ;;  %7986 = vmatprep.subr.mxu0 %v8322_v1  ;;  %v7228_v19 = vld [vmem:[%s9674_s10 + $0x1] ss:$0 sm:$0xff] }
 0xf60   : > { %7997 = vmatprep.subr.mxu1 %v8322_v1  ;;  %7987 = vmatpush3.msra.mxu0 %v7232_v7 }
 0xf61   : > { %7998 = vmatpush3.msra.mxu1 %v7232_v7  ;;  %7988 = vmatprep.subr.mxu0 %v8322_v1 }
 0xf62   : > { %7999 = vmatprep.subr.mxu1 %v8322_v1  ;;  %7989 = vmatpush3.msra.mxu0 %v7231_v8 }
 0xf63   : > { %8000 = vmatpush3.msra.mxu1 %v7231_v8  ;;  %7990 = vmatprep.subr.mxu0 %v8322_v1 }
 0xf64   : > { %8001 = vmatprep.subr.mxu1 %v8322_v1  ;;  %7991 = vmatpush3.msra.mxu0 %v7230_v50 }
 0xf65   : > { %8002 = vmatpush3.msra.mxu1 %v7230_v50  ;;  %8006 = vmatprep.subr.mxu0 %v8322_v1 }
 0xf66   : > { %8025 = vmatprep.subr.mxu1 %v8322_v1 }
 0xffc   : > { %v6015_v20 = vpop.f32.mrf.mxu1 }
 0xffd   : > { %v5942_v21 = vpop.f32.mrf.mxu0  ;;  %v6458_v25 = vsel %vm826_vm3, %v6015_v20, 0.0 }
 0xffe   : > { %v7953_v51 = vpop.f32.mrf.mxu1  ;;  %v6457_v24 = vsel %vm826_vm3, %v5942_v21, 0.0 }
 0xfff   : > { %v7948_v23 = vpop.f32.mrf.mxu0  ;;  %v6459_v26 = vadd.f32 %v6458_v25, %v6457_v24  ;;  %v7229_v51 = vld [vmem:[%s9675_s11 + $0x1] ss:$0 sm:$0xff] }
0x1005   : > { %v6088_v4 = vpop.f32.mrf.mxu0 }
0x1006   : > { %v6460_v5 = vsel %vm826_vm3, %v6088_v4, 0.0 }
0x1007   : > { %v7958_v30 = vpop.f32.mrf.mxu0  ;;  %v6461_v33 = vadd.f32 %v6460_v5, %v6459_v26  ;;  %v7241_v26 = vld [vmem:[%s9678_s14 + $0x78] sm:$0xff] }
0x1009   : > { %v6161_v34 = vpop.f32.mrf.mxu1 }
0x100a   : > { %v6462_v35 = vsel %vm826_vm3, %v6161_v34, 0.0  ;;  %v7240_v34 = vld [vmem:[%s9678_s14 + $0x70] sm:$0xff] }
0x100b   : > { %v6463_v36 = vadd.f32 %v6462_v35, %v6461_v33  ;;  %v7963_v38 = vpop.f32.mrf.mxu1  ;;  %v7239_v35 = vld [vmem:[%s9678_s14 + $0x68] sm:$0xff] }
0x100d   : > { %v6479_v39 = vadd.f32 %v7225_v31, %v6463_v36  ;;  %v7237_v36 = vld [vmem:[%s9678_s14 + $0x58] sm:$0xff] }
0x100f   : > { %v9456_v42 = vadd.f32 %v6479_v39, %v9008_v29 }
0x1011   : > { %v6487_v43 = vsel %vm826_vm3, %v9456_v42, 0.0 }
0x1012   : > { %6488 = vadd.xlane.f32.xlu0 %v6487_v43 }
0x1013   : > { %v6307_v28 = vpop.f32.mrf.mxu1 }
0x1014   : > { %v6234_v22 = vpop.f32.mrf.mxu0  ;;  %v6465_v32 = vsel %vm826_vm3, %v6307_v28, 0.0 }
0x1015   : > { %v7973_v48 = vpop.f32.mrf.mxu1  ;;  %v6464_v62 = vsel %vm826_vm3, %v6234_v22, 0.0  ;;  %v7236_v22 = vld [vmem:[%s9678_s14 + $0x50] sm:$0xff] }
0x1016   : > { %v7968_v63 = vpop.f32.mrf.mxu0  ;;  %v6466_v49 = vadd.f32 %v6465_v32, %v6464_v62  ;;  %v7235_v48 = vld [vmem:[%s9678_s14 + $0x48] sm:$0xff]  ;;  %v7243_v62 = vld [vmem:[%s9677_s13 + $0x1] ss:$0 sm:$0xff] }
0x1017   : > { %v7234_v63 = vld [vmem:[%s9678_s14 + $0x40] sm:$0xff] }
0x101c   : > { %v6453_v37 = vpop.f32.mrf.mxu1 }
0x101d   : > { %v6380_v52 = vpop.f32.mrf.mxu0  ;;  %v6469_v55 = vsel %vm826_vm3, %v6453_v37, 0.0 }
0x101e   : > { %v6467_v53 = vsel %vm826_vm3, %v6380_v52, 0.0  ;;  %v7983_v54 = vpop.f32.mrf.mxu1 }
0x101f   : > { %v6468_v29 = vadd.f32 %v6467_v53, %v6466_v49  ;;  %v7978_v56 = vpop.f32.mrf.mxu0 }
0x1021   : > { %v6470_v40 = vadd.f32 %v6469_v55, %v6468_v29 }
0x1023   : > { %v6480_v58 = vadd.f32 %v7225_v31, %v6470_v40  ;;  %v7238_v31 = vld [vmem:[%s9678_s14 + $0x60] sm:$0xff] }
0x1025   : > { %v9465_v59 = vadd.f32 %v6480_v58, %v9013_v47 }
0x1027   : > { %v6490_v57 = vsel %vm826_vm3, %v9465_v59, 0.0 }
0x1028   : > { %6491 = vadd.xlane.f32.xlu1 %v6490_v57 }
0x109b   : > { %v6489_v60 = vpop.xlane.xlu0 %6488 }
0x109c   : > { %v6493_v61 = vmul.f32 0.03125, %v6489_v60 }
0x109e   : > { %v6495_v0 = vsub.f32 %v9456_v42, %v6493_v61 }
0x10a0   : > { %v6497_v2 = vmul.f32 %v6495_v0, %v6495_v0 }
0x10a2   : > { %v6499_v3 = vsel %vm826_vm3, %v6497_v2, 0.0 }
0x10a3   : > { %6500 = vadd.xlane.f32.xlu0 %v6499_v3 }
0x10b1   : > { %v6492_v45 = vpop.xlane.xlu1 %6491 }
0x10b2   : > { %v6494_v6 = vmul.f32 0.03125, %v6492_v45 }
0x10b4   : > { %v9472_v44 = vsub.f32 %v9465_v59, %v6494_v6 }
0x10b6   : > { %v6498_v47 = vmul.f32 %v9472_v44, %v9472_v44 }
0x10b8   : > { %v6502_v11 = vsel %vm826_vm3, %v6498_v47, 0.0 }
0x10b9   : > { %6503 = vadd.xlane.f32.xlu0 %v6502_v11 }
0x112c   : > { %v6501_v9 = vpop.xlane.xlu0 %6500 }
0x112d   : > { %v6505_v10 = vmul.f32 0.032258064, %v6501_v9 }
0x112f   : > { %8214 = vrsqrt.f32 %v6505_v10  ;;  %vm6509_vm4 = vcmp.eq.f32.partialorder %v6505_v10, inf  ;;  %v6512_v14 = vand.u32 2147483648, %v6505_v10  ;;  %vm6511_vm5 = vcmp.eq.f32.partialorder %v6505_v10, 0.0 }
0x113c   : > { %v8215_v27 = vpop.eup %8214 }
0x113d   : > { %v6508_v12 = vmul.f32 %v8215_v27, %v6505_v10 }
0x113f   : > { %v6510_v15 = vsel %vm6509_vm4, %v6505_v10, %v6508_v12 }
0x1140   : > { %v6513_v16 = vsel %vm6511_vm5, %v6512_v14, %v6510_v15 }
0x1141   : > { %v6521_v17 = vadd.f32 1e-06, %v6513_v16 }
0x1142   : > { %v6504_v18 = vpop.xlane.xlu0 %6503 }
0x1143   : > { %8216 = vrcp.f32 %v6521_v17  ;;  %v6506_v41 = vmul.f32 0.032258064, %v6504_v18 }
0x1145   : > { %8218 = vrsqrt.f32 %v6506_v41  ;;  %vm6516_vm6 = vcmp.eq.f32.partialorder %v6506_v41, inf  ;;  %v6519_v25 = vand.u32 2147483648, %v6506_v41  ;;  %vm6518_vm7 = vcmp.eq.f32.partialorder %v6506_v41, 0.0 }
0x1150   : > { %v8217_v46 = vpop.eup %8216 }
0x1151   : > { %v6525_v20 = vmul.f32 %v8217_v46, %v6495_v0 }
0x1152   : > { %v8219_v21 = vpop.eup %8218 }
0x1153   : > { %v6515_v23 = vmul.f32 %v8219_v21, %v6506_v41  ;;  %v6533_v24 = vmul.f32 %v7228_v19, %v6525_v20 }
0x1155   : > { %v6517_v4 = vsel %vm6516_vm6, %v6506_v41, %v6515_v23  ;;  %v6541_v5 = vadd.f32 %v7229_v51, %v6533_v24 }
0x1156   : > { %v6520_v30 = vsel %vm6518_vm7, %v6519_v25, %v6517_v4 }
0x1157   : > { %v6522_v33 = vadd.f32 1e-06, %v6520_v30  ;;  %7993 = vmatmul.mubr.msk.f32.vlgmr.msra.gmra.mxu0 %vm826_vm3, %v6541_v5 }
0x1158   : > { %8007 = vmatpush3.msra.mxu0 %v7241_v26  ;;  %8022 = vmatprep.mubr.msk.f32.mxu0 %vm8323_vm1, %v8322_v1 }
0x1159   : > { %8220 = vrcp.f32 %v6522_v33  ;;  %8008 = vmatprep.subr.mxu0 %v8322_v1 }
0x115a   : > { %8009 = vmatpush3.msra.mxu0 %v7240_v34 }
0x115b   : > { %8010 = vmatprep.subr.mxu0 %v8322_v1 }
0x115c   : > { %8011 = vmatpush3.msra.mxu0 %v7239_v35 }
0x115d   : > { %8012 = vmatprep.subr.mxu0 %v8322_v1 }
0x115e   : > { %8013 = vmatpush3.msra.mxu0 %v7238_v31 }
0x115f   : > { %8014 = vmatprep.subr.mxu0 %v8322_v1 }
0x1160   : > { %8015 = vmatpush3.msra.mxu0 %v7237_v36 }
0x1161   : > { %8016 = vmatprep.subr.mxu0 %v8322_v1 }
0x1162   : > { %8017 = vmatpush3.msra.mxu0 %v7236_v22 }
0x1163   : > { %8018 = vmatprep.subr.mxu0 %v8322_v1 }
0x1164   : > { %8019 = vmatpush3.msra.mxu0 %v7235_v48 }
0x1165   : > { %8020 = vmatprep.subr.mxu0 %v8322_v1 }
0x1166   : > { %v8221_v38 = vpop.eup %8220  ;;  %8021 = vmatpush3.msra.mxu0 %v7234_v63 }
0x1167   : > { %v6526_v39 = vmul.f32 %v8221_v38, %v9472_v44 }
0x1169   : > { %v6534_v43 = vmul.f32 %v7228_v19, %v6526_v39 }
0x116b   : > { %v6542_v28 = vadd.f32 %v7229_v51, %v6534_v43 }
0x116d   : > { %8004 = vmatmul.mubr.msk.f32.vlgmr.msra.gmra.mxu1 %vm826_vm3, %v6542_v28 }
0x116e   : > { %8026 = vmatpush3.msra.mxu1 %v7241_v26  ;;  %8041 = vmatprep.mubr.msk.f32.mxu1 %vm8323_vm1, %v8322_v1 }
0x116f   : > { %8027 = vmatprep.subr.mxu1 %v8322_v1 }
0x1170   : > { %8028 = vmatpush3.msra.mxu1 %v7240_v34 }
0x1171   : > { %8029 = vmatprep.subr.mxu1 %v8322_v1 }
0x1172   : > { %8030 = vmatpush3.msra.mxu1 %v7239_v35 }
0x1173   : > { %8031 = vmatprep.subr.mxu1 %v8322_v1 }
0x1174   : > { %8032 = vmatpush3.msra.mxu1 %v7238_v31 }
0x1175   : > { %8033 = vmatprep.subr.mxu1 %v8322_v1 }
0x1176   : > { %8034 = vmatpush3.msra.mxu1 %v7237_v36 }
0x1177   : > { %8035 = vmatprep.subr.mxu1 %v8322_v1 }
0x1178   : > { %8036 = vmatpush3.msra.mxu1 %v7236_v22 }
0x1179   : > { %8037 = vmatprep.subr.mxu1 %v8322_v1 }
0x117a   : > { %8038 = vmatpush3.msra.mxu1 %v7235_v48 }
0x117b   : > { %8039 = vmatprep.subr.mxu1 %v8322_v1  ;;  %v7249_v1 = vld [vmem:[%s9679_s15 + $0x1] ss:$0 sm:$0xff] }
0x117c   : > { %8040 = vmatpush3.msra.mxu1 %v7234_v63 }
0x1217   : > { %v6634_v32 = vpop.f32.mrf.mxu0 }
0x1218   : > { %v6635_v37 = vadd.f32 %v7243_v62, %v6634_v32 }
0x1219   : > { %v7994_v49 = vpop.f32.mrf.mxu0 }
0x121a   : > { %v6711_v52 = vmax.f32 %v6635_v37, 0.0 }
0x121c   : > { %8023 = vmatmul.mubr.msk.f32.vlgmr.msra.gmra.mxu0 %vm3653_vm13, %v6711_v52 }
0x122d   : > { %v6707_v53 = vpop.f32.mrf.mxu1 }
0x122e   : > { %v6708_v54 = vadd.f32 %v7243_v62, %v6707_v53 }
0x122f   : > { %v8005_v29 = vpop.f32.mrf.mxu1 }
0x1230   : > { %v6712_v56 = vmax.f32 %v6708_v54, 0.0 }
0x1232   : > { %8042 = vmatmul.mubr.msk.f32.vlgmr.msra.gmra.mxu1 %vm3653_vm13, %v6712_v56 }
0x12dc   : > { %v6782_v55 = vpop.f32.mrf.mxu0 }
0x12dd   : > { %v6859_v40 = vadd.f32 %v6782_v55, %v9456_v42 }
0x12de   : > { %v8024_v58 = vpop.f32.mrf.mxu0 }
0x12df   : > { %v6869_v57 = vadd.f32 %v7249_v1, %v6859_v40 }
0x12e1   : > { %v6873_v60 = vsel %vm826_vm3, %v6869_v57, 0.0 }
0x12e2   : > { %6874 = vadd.xlane.f32.xlu0 %v6873_v60 }
0x12f2   : > { %v6855_v61 = vpop.f32.mrf.mxu1 }
0x12f3   : > { %v6860_v0 = vadd.f32 %v6855_v61, %v9465_v59 }
0x12f4   : > { %v8043_v2 = vpop.f32.mrf.mxu1 }
0x12f5   : > { %v6870_v3 = vadd.f32 %v7249_v1, %v6860_v0 }
0x12f7   : > { %v6876_v45 = vsel %vm826_vm3, %v6870_v3, 0.0 }
0x12f8   : > { %6877 = vadd.xlane.f32.xlu1 %v6876_v45 }
0x136b   : > { %v6875_v6 = vpop.xlane.xlu0 %6874 }
0x136c   : > { %v6879_v44 = vmul.f32 0.03125, %v6875_v6 }
0x136e   : > { %v6881_v42 = vsub.f32 %v6869_v57, %v6879_v44 }
0x1370   : > { %v6883_v47 = vmul.f32 %v6881_v42, %v6881_v42 }
0x1372   : > { %v6885_v11 = vsel %vm826_vm3, %v6883_v47, 0.0 }
0x1373   : > { %6886 = vadd.xlane.f32.xlu0 %v6885_v11 }
0x1381   : > { %v6878_v13 = vpop.xlane.xlu1 %6877 }
0x1382   : > { %v6880_v7 = vmul.f32 0.03125, %v6878_v13 }
0x1384   : > { %v9561_v59 = vsub.f32 %v6870_v3, %v6880_v7 }
0x1386   : > { %v6884_v8 = vmul.f32 %v9561_v59, %v9561_v59 }
0x1388   : > { %v6888_v50 = vsel %vm826_vm3, %v6884_v8, 0.0 }
0x1389   : > { %6889 = vadd.xlane.f32.xlu1 %v6888_v50 }
0x138a   : > { %8243 = shalt.err (!%p8240_p3)
}
0x138b   : > { %s8244_s20 = scalar_lea.hbm %s9572_s29, 256  ;;  %s8248_s5 = scalar_lea.hbm %s9683_s19, 512 }
0x138c   : > { %p8245_p4 = scmp.ne.s32.totalorder %s9572_s29, %s8244_s20  ;;  %p8249_p9 = scmp.lt.s32.totalorder %s9572_s29, %s9683_s19 }
0x138d   : > { %p8250_p10 = scmp.lt.s32.totalorder %s8248_s5, %s8244_s20 }
0x138e   : > { %p8246_p7 = pnand %p8245_p4, %p8468_p5 }
0x138f   : > { %p8251_p11 = por %p8250_p10, %p8249_p9 }
0x1390   : > { %p8247_p8 = pneg %p8246_p7 }
0x1392   : > { %p8252_p12 = pnand %p8251_p11, %p8247_p8 }
0x1394   : > { %8255 = shalt.err (!%p8252_p12)
}
0x1395   : > { %s9691_s6 = smov 128   ;;  %s8328_s7 = smov 8   ;;  %v7250_v19 = vld [vmem:[%s9680_s16] ss:$0 sm:$0xff] }
0x1396   : > { %s9714_s4 = scalar_lea.sflag [#allocation5], %s9303_s23  ;;  %v7251_v51 = vld [vmem:[%s9681_s17] ss:$0 sm:$0xff]  ;;  %s9715_s20 = sshll.u32 %s9303_s23, 4 }
0x1397   : > { %8045 = dma.vmem_to_hbm [thread:$0]  (%p8468_p5), %s9575_s25, 256, %s9572_s29, %s9714_s4, %s9691_s6, %s9691_s6, %s8328_s7  }
0x1398   : > { %s616_s27 = scalar_lea.vmem [#allocation2], %s9715_s20  ;;  %s9716_s5 = sshll.u32 %s8451_s1, 8 }
0x1399   : > { %s6952_s28 = sshll.u32 %s616_s27, 4  ;;  %s9618_s24 = scalar_lea.hbm %s9682_s18, %s9716_s5  ;;  %s9620_s28 = int_to_ptr.vmem [resolvable:$true] %s6952_s28 }
0x139a   : > { %s6934_s29 = scalar_lea.sflag [#allocation3], %s9303_s23  ;;  %s8256_s25 = scalar_lea.vmem %s9620_s28, 256 }
0x139b   : > { %p8257_p13 = scmp.ne.s32.totalorder %s9620_s28, %s8256_s25  ;;  %s8329_s20 = smov [#allocation2]  }
0x139c   : > { %s8260_s1 = sshll.u32 %s8329_s20, 4  ;;  %s8261_s1 = int_to_ptr.vmem [resolvable:$false] %s8260_s1 }
0x139d   : > { %p8258_p0 = pnand %p8257_p13, %p8468_p5  ;;  %s8262_s6 = scalar_lea.vmem %s8261_s1, 512 }
0x139e   : > { %p8263_p2 = scmp.lt.s32.totalorder %s9620_s28, %s8261_s1  ;;  %p8264_p3 = scmp.lt.s32.totalorder %s8262_s6, %s8256_s25 }
0x139f   : > { %p8259_p1 = pneg %p8258_p0 }
0x13a0   : > { %p8265_p4 = por %p8264_p3, %p8263_p2 }
0x13a2   : > { %p8266_p7 = pnand %p8265_p4, %p8259_p1 }
0x13fc   : > { %v6887_v9 = vpop.xlane.xlu0 %6886 }
0x13fd   : > { %v6891_v10 = vmul.f32 0.032258064, %v6887_v9 }
0x13ff   : > { %8222 = vrsqrt.f32 %v6891_v10  ;;  %vm6895_vm1 = vcmp.eq.f32.partialorder %v6891_v10, inf  ;;  %v6898_v14 = vand.u32 2147483648, %v6891_v10  ;;  %vm6897_vm8 = vcmp.eq.f32.partialorder %v6891_v10, 0.0 }
0x140c   : > { %v8223_v27 = vpop.eup %8222 }
0x140d   : > { %v6894_v12 = vmul.f32 %v8223_v27, %v6891_v10 }
0x140f   : > { %v6896_v15 = vsel %vm6895_vm1, %v6891_v10, %v6894_v12 }
0x1410   : > { %v6899_v16 = vsel %vm6897_vm8, %v6898_v14, %v6896_v15 }
0x1411   : > { %v6907_v17 = vadd.f32 1e-06, %v6899_v16 }
0x1412   : > { %v6890_v18 = vpop.xlane.xlu1 %6889 }
0x1413   : > { %8224 = vrcp.f32 %v6907_v17  ;;  %v6892_v41 = vmul.f32 0.032258064, %v6890_v18 }
0x1415   : > { %8226 = vrsqrt.f32 %v6892_v41  ;;  %vm6902_vm9 = vcmp.eq.f32.partialorder %v6892_v41, inf  ;;  %v6905_v25 = vand.u32 2147483648, %v6892_v41  ;;  %vm6904_vm10 = vcmp.eq.f32.partialorder %v6892_v41, 0.0 }
0x1420   : > { %v8225_v46 = vpop.eup %8224 }
0x1421   : > { %v6911_v20 = vmul.f32 %v8225_v46, %v6881_v42 }
0x1422   : > { %v8227_v21 = vpop.eup %8226 }
0x1423   : > { %v6901_v23 = vmul.f32 %v8227_v21, %v6892_v41  ;;  %v6919_v24 = vmul.f32 %v7250_v19, %v6911_v20 }
0x1425   : > { %v6903_v4 = vsel %vm6902_vm9, %v6892_v41, %v6901_v23  ;;  %v6927_v5 = vadd.f32 %v7251_v51, %v6919_v24 }
0x1426   : > { %v6906_v26 = vsel %vm6904_vm10, %v6905_v25, %v6903_v4 }
0x1427   : > { %v6908_v30 = vadd.f32 1e-06, %v6906_v26  ;;  %6929 = vst.msk [vmem:[%s616_s27] sm:$0xff] %vm826_vm3, %v6927_v5 }
0x1429   : > { %8228 = vrcp.f32 %v6908_v30 }
0x1436   : > { %v8229_v33 = vpop.eup %8228 }
0x1437   : > { %v6912_v34 = vmul.f32 %v8229_v33, %v9561_v59 }
0x1439   : > { %v6920_v35 = vmul.f32 %v7250_v19, %v6912_v34 }
0x143b   : > { %v6928_v31 = vadd.f32 %v7251_v51, %v6920_v35 }
0x143d   : > { %6930 = vst.msk [vmem:[%s616_s27 + $0x8] sm:$0xff] %vm826_vm3, %v6928_v31 }
0x143e   : > { %8269 = shalt.err (!%p8266_p7)
}
0x143f   : > { %s8270_s27 = scalar_lea.hbm %s9618_s24, 256  ;;  %s8274_s4 = scalar_lea.hbm %s9682_s18, 512 }
0x1440   : > { %p8271_p8 = scmp.ne.s32.totalorder %s9618_s24, %s8270_s27  ;;  %p8275_p11 = scmp.lt.s32.totalorder %s9618_s24, %s9682_s18 }
0x1441   : > { %p8276_p12 = scmp.lt.s32.totalorder %s8274_s4, %s8270_s27 }
0x1442   : > { %p8272_p9 = pnand %p8271_p8, %p8468_p5 }
0x1443   : > { %p8277_p13 = por %p8276_p12, %p8275_p11 }
0x1444   : > { %p8273_p10 = pneg %p8272_p9 }
0x1446   : > { %p8278_p0 = pnand %p8277_p13, %p8273_p10 }
0x1448   : > { %8281 = shalt.err (!%p8278_p0)
}
0x1449   : > { %s9717_s6 = smov 128  }
0x144a   : > { %8044 = dma.vmem_to_hbm [thread:$0]  (%p8468_p5), %s9620_s28, 256, %s9618_s24, %s6934_s29, %s9717_s6, %s9717_s6, %s8328_s7  }
0x144b PF: > { %p8055_p1 = scmp.ge.s32.totalorder %s8320_s21, 2  ;;  %s6983_s25 = sand.u32 1, %s8308_s0  }
0x144c   : > { %s6984_s1 = scalar_lea.sflag [#allocation3], %s6983_s25 }
0x144d   : > { %p8049_p2 = pnand %p8055_p1, %p8472_p6 }
0x144f   : > { %p8050_p3 = pneg %p8049_p2 }
0x1451   : > { %8299 = dma.done.wait (%p8050_p3), %s6984_s1, 256  }
0x1452   : > { %8301 = vsyncadd (%p8050_p3), %s6984_s1, 4294967040  ;;  %s6993_s27 = scalar_lea.sflag [#allocation5], %s6983_s25 }
0x1453   : > { %8303 = dma.done.wait (%p8050_p3), %s6993_s27, 256  }
0x1454   : > { %8305 = vsyncadd (%p8050_p3), %s6993_s27, 4294967040  ;;  %s9718_s3 = sld [smem:[#allocation8_spill]]  ;;  %p33_p5 = scmp.ge.s32.totalorder %s8455_s2, 4  }
0x1455   : > { %s9719_s20 = sld [smem:[#allocation9_spill]]  ;;  %s9720_s0 = smov %s8312_s30 }
0x1456   : > { %s9722_s21 = smov %s8455_s2  ;;  %35 = sbr.rel (!%p33_p5) target bundleno = 14 (0xe), region = 159 }
0x145a   : > { %s9721_s30 = smov %s9718_s3 }
0x145b   :  { %6998 = vsyncpa [#allocation3], 1 }
0x145c   :  { %7000 = vsyncpa [#allocation3 + $0x1], 1 }
0x145d   :  { %7001 = vsyncpa [#allocation5], 1 }
0x145e   :  { %7003 = vsyncpa [#allocation5 + $0x1], 1 }

</bundles_post_ra>
